<compile_context>
chip_gen: v6e
topology: v6e:2x2x1
jax: 0.10.0
libtpu: 0.0.40
codegen_flags: <defaults>
</compile_context>

<pallas_src>
import math

import jax
import jax.numpy as jnp
from jax.experimental import pallas as pl
from jax.experimental.pallas import tpu as pltpu


# ----------------------------------------------------------------------------
# small helpers
# ----------------------------------------------------------------------------
_VMEM_LIMIT = 32 * 1024 * 1024   # >= v5e's 16 MiB scoped default, safe on v6e/v7x


def _cp(sem):
    return pltpu.CompilerParams(dimension_semantics=sem,
                                vmem_limit_bytes=_VMEM_LIMIT)


def _lane_tile(n, cap=2048):
    """Lane (last-axis) tile: full extent when small / ragged, else the largest
    128-aligned divisor <= cap so big slabs pipeline through VMEM."""
    if n % 128 != 0 or n <= cap:
        return n
    for t in range(cap, 127, -128):
        if n % t == 0:
            return t
    return n


def _leading_tile(n, cap):
    """Largest divisor of n that is <= cap (used for batched-head / batched-bk)."""
    for t in range(min(n, cap), 0, -1):
        if n % t == 0:
            return t
    return 1


def _bf16(x):
    return x.astype(jnp.bfloat16)


def _f32(x):
    return x.astype(jnp.float32)


# ----------------------------------------------------------------------------
# Pallas kernels (channel-first: activations are (D, N), N lane-dense)
# ----------------------------------------------------------------------------
def left_matmul(x, w, b, out_dtype=jnp.float32):
    """y = w @ x + b.   x: (Din, N), w: (Dout, Din), b: (Dout,).  bf16 operands,
    f32 accumulation."""
    x, w = _bf16(x), _bf16(w)
    Din, N = x.shape
    Dout = w.shape[0]
    tn = _lane_tile(N)

    def kern(x_ref, w_ref, b_ref, o_ref):
        acc = jnp.dot(w_ref[...], x_ref[...],
                      preferred_element_type=jnp.float32) + b_ref[...]
        o_ref[...] = acc.astype(o_ref.dtype)

    return pl.pallas_call(
        kern,
        out_shape=jax.ShapeDtypeStruct((Dout, N), out_dtype),
        grid=(N // tn,),
        in_specs=[pl.BlockSpec((Din, tn), lambda i: (0, i)),
                  pl.BlockSpec((Dout, Din), lambda i: (0, 0)),
                  pl.BlockSpec((Dout, 1), lambda i: (0, 0))],
        out_specs=pl.BlockSpec((Dout, tn), lambda i: (0, i)),
        compiler_params=_cp(("parallel",)),
    )(x, w, _f32(b).reshape(Dout, 1))


def left_matmul2(x1, w1, x2, w2, b):
    """y = w1 @ x1 + w2 @ x2 + b  (single launch, no activation concat needed)."""
    x1, x2, w1, w2 = _bf16(x1), _bf16(x2), _bf16(w1), _bf16(w2)
    D1, N = x1.shape
    D2 = x2.shape[0]
    Dout = w1.shape[0]
    tn = _lane_tile(N)

    def kern(x1_ref, x2_ref, w1_ref, w2_ref, b_ref, o_ref):
        o_ref[...] = (
            jnp.dot(w1_ref[...], x1_ref[...], preferred_element_type=jnp.float32)
            + jnp.dot(w2_ref[...], x2_ref[...], preferred_element_type=jnp.float32)
            + b_ref[...])

    return pl.pallas_call(
        kern,
        out_shape=jax.ShapeDtypeStruct((Dout, N), jnp.float32),
        grid=(N // tn,),
        in_specs=[pl.BlockSpec((D1, tn), lambda i: (0, i)),
                  pl.BlockSpec((D2, tn), lambda i: (0, i)),
                  pl.BlockSpec((Dout, D1), lambda i: (0, 0)),
                  pl.BlockSpec((Dout, D2), lambda i: (0, 0)),
                  pl.BlockSpec((Dout, 1), lambda i: (0, 0))],
        out_specs=pl.BlockSpec((Dout, tn), lambda i: (0, i)),
        compiler_params=_cp(("parallel",)),
    )(x1, x2, w1, w2, _f32(b).reshape(Dout, 1))


def left_matmul_chain(x, w1, b1, w2, b2):
    """y = w2 @ relu(w1 @ x + b1) + b2, fused in one launch."""
    x, w1, w2 = _bf16(x), _bf16(w1), _bf16(w2)
    Din, N = x.shape
    Dh = w1.shape[0]
    Dout = w2.shape[0]
    tn = _lane_tile(N)

    def kern(x_ref, w1_ref, b1_ref, w2_ref, b2_ref, o_ref):
        h = jnp.maximum(
            jnp.dot(w1_ref[...], x_ref[...], preferred_element_type=jnp.float32)
            + b1_ref[...], 0.0)
        o_ref[...] = (jnp.dot(w2_ref[...], h.astype(jnp.bfloat16),
                              preferred_element_type=jnp.float32) + b2_ref[...])

    return pl.pallas_call(
        kern,
        out_shape=jax.ShapeDtypeStruct((Dout, N), jnp.float32),
        grid=(N // tn,),
        in_specs=[pl.BlockSpec((Din, tn), lambda i: (0, i)),
                  pl.BlockSpec((Dh, Din), lambda i: (0, 0)),
                  pl.BlockSpec((Dh, 1), lambda i: (0, 0)),
                  pl.BlockSpec((Dout, Dh), lambda i: (0, 0)),
                  pl.BlockSpec((Dout, 1), lambda i: (0, 0))],
        out_specs=pl.BlockSpec((Dout, tn), lambda i: (0, i)),
        compiler_params=_cp(("parallel",)),
    )(x, w1, _f32(b1).reshape(Dh, 1), w2, _f32(b2).reshape(Dout, 1))


def complex_left_matmul(x_r, x_i, wr, wi, br, bi):
    """Complex y = W @ x + b as ONE real kernel: packed input [xr ; xi] against
    packed weights [wr | -wi] and [wi | wr]  ->  (yr, yi)  (bf16 outputs)."""
    Din, N = x_r.shape
    Dout = wr.shape[0]
    xp = _bf16(jnp.concatenate([x_r, x_i], axis=0))              # (2Din, N)
    a_r = _bf16(jnp.concatenate([wr, -wi], axis=1))              # (Dout, 2Din)
    a_i = _bf16(jnp.concatenate([wi, wr], axis=1))
    tn = _lane_tile(N)

    def kern(x_ref, ar_ref, ai_ref, br_ref, bi_ref, yr_ref, yi_ref):
        xv = x_ref[...]
        yr_ref[...] = (jnp.dot(ar_ref[...], xv, preferred_element_type=jnp.float32)
                       + br_ref[...]).astype(yr_ref.dtype)
        yi_ref[...] = (jnp.dot(ai_ref[...], xv, preferred_element_type=jnp.float32)
                       + bi_ref[...]).astype(yi_ref.dtype)

    act_in = pl.BlockSpec((2 * Din, tn), lambda i: (0, i))
    w_spec = pl.BlockSpec((Dout, 2 * Din), lambda i: (0, 0))
    b_spec = pl.BlockSpec((Dout, 1), lambda i: (0, 0))
    out_spec = pl.BlockSpec((Dout, tn), lambda i: (0, i))
    return pl.pallas_call(
        kern,
        out_shape=(jax.ShapeDtypeStruct((Dout, N), jnp.bfloat16),
                   jax.ShapeDtypeStruct((Dout, N), jnp.bfloat16)),
        grid=(N // tn,),
        in_specs=[act_in, w_spec, w_spec, b_spec, b_spec],
        out_specs=(out_spec, out_spec),
        compiler_params=_cp(("parallel",)),
    )(xp, a_r, a_i, _f32(br).reshape(Dout, 1), _f32(bi).reshape(Dout, 1))


def mha_attention_t(q_t, k_t, v_t):
    """Fused self-attention on (NH, hd, S) head-transposed bf16 tensors (S on lanes).
    Scale already folded into q; several heads per grid step.  Returns (NH, hd, S)."""
    NH, hd, S = q_t.shape
    Hb = _leading_tile(NH, 8)

    def kern(q_ref, k_ref, v_ref, o_ref):
        s = jnp.einsum("ads,adt->ast", q_ref[...], k_ref[...],
                       preferred_element_type=jnp.float32)       # (Hb, S, S)
        m = jnp.max(s, axis=-1, keepdims=True)
        e = jnp.exp(s - m)
        att = e * pl.reciprocal(jnp.sum(e, axis=-1, keepdims=True), approx=True)
        ctx = jnp.einsum("adt,ast->ads", v_ref[...], att.astype(jnp.bfloat16),
                         preferred_element_type=jnp.float32)     # (Hb, hd, S)
        o_ref[...] = ctx.astype(o_ref.dtype)

    spec = pl.BlockSpec((Hb, hd, S), lambda i: (i, 0, 0))
    return pl.pallas_call(
        kern,
        out_shape=jax.ShapeDtypeStruct((NH, hd, S), jnp.bfloat16),
        grid=(NH // Hb,),
        in_specs=[spec, spec, spec],
        out_specs=spec,
        compiler_params=_cp(("parallel",)),
    )(q_t, k_t, v_t)


def attn_out_layernorm(src, ctx, w, b, g, beta, eps=1e-5):
    """Fused: LayerNorm1(src + W_out @ ctx + b_out) over the channel (sublane) axis."""
    C_, N = src.shape
    tn = _lane_tile(N)

    def kern(src_ref, ctx_ref, w_ref, b_ref, g_ref, be_ref, o_ref):
        y = (src_ref[...]
             + jnp.dot(w_ref[...], ctx_ref[...], preferred_element_type=jnp.float32)
             + b_ref[...])
        mu = jnp.mean(y, axis=0, keepdims=True)
        d = y - mu
        var = jnp.mean(d * d, axis=0, keepdims=True)
        o_ref[...] = d * jax.lax.rsqrt(var + eps) * g_ref[...] + be_ref[...]

    act = pl.BlockSpec((C_, tn), lambda i: (0, i))
    cvec = pl.BlockSpec((C_, 1), lambda i: (0, 0))
    return pl.pallas_call(
        kern,
        out_shape=jax.ShapeDtypeStruct((C_, N), jnp.float32),
        grid=(N // tn,),
        in_specs=[act, act, pl.BlockSpec((C_, C_), lambda i: (0, 0)),
                  cvec, cvec, cvec],
        out_specs=act,
        compiler_params=_cp(("parallel",)),
    )(_f32(src), _bf16(ctx), _bf16(w), _f32(b).reshape(C_, 1),
      _f32(g).reshape(C_, 1), _f32(beta).reshape(C_, 1))


def ffn_layernorm(x, w1, b1, w2, b2, g, beta, eps=1e-5):
    """Fused: LayerNorm2(x + W_ff2 @ gelu(W_ff1 @ x + b1) + b2)."""
    C_, N = x.shape
    dff = w1.shape[0]
    tn = _lane_tile(N)

    def kern(x_ref, w1_ref, b1_ref, w2_ref, b2_ref, g_ref, be_ref, o_ref):
        xv = x_ref[...]
        h = (jnp.dot(w1_ref[...], xv.astype(jnp.bfloat16),
                     preferred_element_type=jnp.float32) + b1_ref[...])
        # TODO(synk): reference uses exact erf-GELU; tanh approximation (EUP) here.
        h = jax.nn.gelu(h, approximate=True)
        ff = (jnp.dot(w2_ref[...], h.astype(jnp.bfloat16),
                      preferred_element_type=jnp.float32) + b2_ref[...])
        y = xv + ff
        mu = jnp.mean(y, axis=0, keepdims=True)
        d = y - mu
        var = jnp.mean(d * d, axis=0, keepdims=True)
        o_ref[...] = d * jax.lax.rsqrt(var + eps) * g_ref[...] + be_ref[...]

    act = pl.BlockSpec((C_, tn), lambda i: (0, i))
    cvec = pl.BlockSpec((C_, 1), lambda i: (0, 0))
    return pl.pallas_call(
        kern,
        out_shape=jax.ShapeDtypeStruct((C_, N), jnp.float32),
        grid=(N // tn,),
        in_specs=[act,
                  pl.BlockSpec((dff, C_), lambda i: (0, 0)),
                  pl.BlockSpec((dff, 1), lambda i: (0, 0)),
                  pl.BlockSpec((C_, dff), lambda i: (0, 0)),
                  cvec, cvec, cvec],
        out_specs=act,
        compiler_params=_cp(("parallel",)),
    )(_f32(x), _bf16(w1), _f32(b1).reshape(dff, 1), _bf16(w2),
      _f32(b2).reshape(C_, 1), _f32(g).reshape(C_, 1), _f32(beta).reshape(C_, 1))


def fca_attention(q_r, q_i, k_r, k_i, v_r, v_i):
    """Fused Fourier cross attention: per (b,k) row, softmax(|q k^T|/sqrt(E)) @ v,
    summed over the F selected bands in-register.  q_*: (F, BK, E, C) bf16,
    k_*/v_*: (BK, E, C) bf16  ->  (BK, E, C) f32 real/imag parts."""
    F_, BK, E_, C_ = q_r.shape
    inv_sqrt_e = 1.0 / math.sqrt(E_)
    BKt = _leading_tile(BK, 8)

    def kern(qr_ref, qi_ref, kr_ref, ki_ref, vr_ref, vi_ref, or_ref, oi_ref):
        kr, ki = kr_ref[...], ki_ref[...]
        vr, vi = vr_ref[...], vi_ref[...]
        acc_r = jnp.zeros((BKt, E_, C_), jnp.float32)
        acc_i = jnp.zeros((BKt, E_, C_), jnp.float32)
        for f in range(F_):                                     # static, F is small
            qr, qi = qr_ref[f], qi_ref[f]
            sr = (jnp.einsum("bec,bfc->bef", qr, kr, preferred_element_type=jnp.float32)
                  - jnp.einsum("bec,bfc->bef", qi, ki, preferred_element_type=jnp.float32))
            si = (jnp.einsum("bec,bfc->bef", qr, ki, preferred_element_type=jnp.float32)
                  + jnp.einsum("bec,bfc->bef", qi, kr, preferred_element_type=jnp.float32))
            mag = jnp.sqrt(sr * sr + si * si) * inv_sqrt_e
            m = jnp.max(mag, axis=-1, keepdims=True)
            e = jnp.exp(mag - m)
            att = (e * pl.reciprocal(jnp.sum(e, axis=-1, keepdims=True),
                                     approx=True)).astype(jnp.bfloat16)
            acc_r += jnp.einsum("bef,bfc->bec", att, vr,
                                preferred_element_type=jnp.float32)
            acc_i += jnp.einsum("bef,bfc->bec", att, vi,
                                preferred_element_type=jnp.float32)
        or_ref[...] = acc_r
        oi_ref[...] = acc_i

    q_spec = pl.BlockSpec((F_, BKt, E_, C_), lambda i: (0, i, 0, 0))
    kv_spec = pl.BlockSpec((BKt, E_, C_), lambda i: (i, 0, 0))
    out_spec = pl.BlockSpec((BKt, E_, C_), lambda i: (i, 0, 0))
    return pl.pallas_call(
        kern,
        out_shape=(jax.ShapeDtypeStruct((BK, E_, C_), jnp.float32),
                   jax.ShapeDtypeStruct((BK, E_, C_), jnp.float32)),
        grid=(BK // BKt,),
        in_specs=[q_spec, q_spec, kv_spec, kv_spec, kv_spec, kv_spec],
        out_specs=(out_spec, out_spec),
        compiler_params=_cp(("parallel",)),
    )(q_r, q_i, k_r, k_i, v_r, v_i)


def fused_graph_tail(y_dis, y_poi, y_res, xpe, x_cf,
                     w1, b1, w2, b2, w3, b3, w4, b4, w5a, w5b, b5,
                     wgf, bgf, wrs, brs):
    """ONE lane-tiled launch: l1->relu->l2 ; l3->relu->l4 + y_res ; layer5 + x_pe ;
    stacked (2C,C) gate/filter projection -> sigmoid*tanh ; stacked (2C,C)
    residual/skip projection; final (x + residual)/sqrt(2)."""
    C_, N = x_cf.shape
    tn = _lane_tile(N, 1024)
    inv_sqrt2 = 1.0 / math.sqrt(2.0)

    def kern(yd_ref, yp_ref, yr_ref, xpe_ref, x_ref,
             w1_ref, b1_ref, w2_ref, b2_ref, w3_ref, b3_ref, w4_ref, b4_ref,
             w5a_ref, w5b_ref, b5_ref, wgf_ref, bgf_ref, wrs_ref, brs_ref,
             res_ref, skip_ref):
        h1 = jnp.maximum(
            jnp.dot(w1_ref[...], yd_ref[...], preferred_element_type=jnp.float32)
            + b1_ref[...], 0.0)
        yd = (jnp.dot(w2_ref[...], h1.astype(jnp.bfloat16),
                      preferred_element_type=jnp.float32) + b2_ref[...])
        h3 = jnp.maximum(
            jnp.dot(w3_ref[...], yp_ref[...], preferred_element_type=jnp.float32)
            + b3_ref[...], 0.0)
        yp = (jnp.dot(w4_ref[...], h3.astype(jnp.bfloat16),
                      preferred_element_type=jnp.float32) + b4_ref[...] + yr_ref[...])
        y = (jnp.dot(w5a_ref[...], yd.astype(jnp.bfloat16),
                     preferred_element_type=jnp.float32)
             + jnp.dot(w5b_ref[...], yp.astype(jnp.bfloat16),
                       preferred_element_type=jnp.float32)
             + b5_ref[...] + xpe_ref[...])
        gf = (jnp.dot(wgf_ref[...], y.astype(jnp.bfloat16),
                      preferred_element_type=jnp.float32) + bgf_ref[...])   # (2C, tn)
        z = jax.nn.sigmoid(gf[:C_]) * jnp.tanh(gf[C_:])
        rs = (jnp.dot(wrs_ref[...], z.astype(jnp.bfloat16),
                      preferred_element_type=jnp.float32) + brs_ref[...])   # (2C, tn)
        res_ref[...] = (x_ref[...] + rs[:C_]) * inv_sqrt2
        skip_ref[...] = rs[C_:]

    act = pl.BlockSpec((C_, tn), lambda i: (0, i))
    wC = pl.BlockSpec((C_, C_), lambda i: (0, 0))
    bC = pl.BlockSpec((C_, 1), lambda i: (0, 0))
    w2C = pl.BlockSpec((2 * C_, C_), lambda i: (0, 0))
    b2C = pl.BlockSpec((2 * C_, 1), lambda i: (0, 0))
    in_specs = [act, act, act, act, act,
                wC, bC, wC, bC, wC, bC, wC, bC,
                wC, wC, bC, w2C, b2C, w2C, b2C]
    return pl.pallas_call(
        kern,
        out_shape=(jax.ShapeDtypeStruct((C_, N), jnp.float32),
                   jax.ShapeDtypeStruct((C_, N), jnp.float32)),
        grid=(N // tn,),
        in_specs=in_specs,
        out_specs=(act, act),
        compiler_params=_cp(("parallel",)),
    )(_bf16(y_dis), _bf16(y_poi), _f32(y_res), _f32(xpe), _f32(x_cf),
      _bf16(w1), _f32(b1).reshape(C_, 1), _bf16(w2), _f32(b2).reshape(C_, 1),
      _bf16(w3), _f32(b3).reshape(C_, 1), _bf16(w4), _f32(b4).reshape(C_, 1),
      _bf16(w5a), _bf16(w5b), _f32(b5).reshape(C_, 1),
      _bf16(wgf), _f32(bgf).reshape(2 * C_, 1),
      _bf16(wrs), _f32(brs).reshape(2 * C_, 1))


# ----------------------------------------------------------------------------
# module pieces (JAX glue around the Pallas kernels)
# ----------------------------------------------------------------------------
def transformer_layer_cf(src_cf, p, nheads, S, Nb):
    """nn.TransformerEncoderLayer (post-norm, gelu, dropout=identity).
    src_cf: (C, S*Nb) channel-first, column index = s*Nb + n (seq-major)."""
    C_ = src_cf.shape[0]
    H = nheads
    hd = C_ // H
    scale = 1.0 / math.sqrt(hd)

    # fold the attention scale into the q rows of the in-projection (free at runtime)
    w_in = p["w_in"].at[:C_].multiply(scale)
    b_in = p["b_in"].at[:C_].multiply(scale)
    qkv = left_matmul(src_cf, w_in, b_in, out_dtype=jnp.bfloat16)   # (3C, S*Nb)

    def to_heads(t):                    # (C, S*Nb) -> (Nb*H, hd, S), S lane-dense
        return t.reshape(H, hd, S, Nb).transpose(3, 0, 1, 2).reshape(Nb * H, hd, S)

    ctx_t = mha_attention_t(to_heads(qkv[:C_]), to_heads(qkv[C_:2 * C_]),
                            to_heads(qkv[2 * C_:]))                 # (Nb*H, hd, S)
    ctx_c = ctx_t.reshape(Nb, H, hd, S).transpose(1, 2, 3, 0).reshape(C_, S * Nb)

    x1 = attn_out_layernorm(src_cf, ctx_c, p["w_out"], p["b_out"],
                            p["ln1_g"], p["ln1_b"])
    x2 = ffn_layernorm(x1, p["w_ff1"], p["b_ff1"], p["w_ff2"], p["b_ff2"],
                       p["ln2_g"], p["ln2_b"])
    return x2


def extract_frequency(x_ft, m):
    """Top-q frequency extraction (q=4), faithful to the reference (stays in XLA)."""
    E = x_ft.shape[-1]
    q = 4
    temp = x_ft
    subs = []
    for _ in range(m):
        _, top_idx = jax.lax.top_k(jnp.abs(temp), q)
        selected = jnp.take_along_axis(temp, top_idx, axis=-1)
        onehot = jax.nn.one_hot(top_idx, E, dtype=jnp.float32)
        result = jnp.sum(onehot * selected[..., None], axis=-2)
        subs.append(result)
        temp = temp - result
    return subs, temp


# ----------------------------------------------------------------------------
# ResidualBlock.forward
# ----------------------------------------------------------------------------
def residual_block_forward(params, x, diffusion_emb, idx, x_pe, freq_select, nheads):
    B, C, K, L = x.shape
    KL = K * L
    N = B * KL

    # ---- tiny per-batch projections: no (Dd,N)/(Dk,N) broadcast streams in HBM ----
    diff_cb = left_matmul(diffusion_emb.T, params["diff_w"], params["diff_b"])  # (C,B)
    bs_emb = jnp.take(params["kg_table"], idx, axis=0)                          # (B,Dk)
    bs_cb = left_matmul(bs_emb.T, params["kg_w"], params["kg_b"])               # (C,B)

    # ---- channel-first re-layout; diffusion add fuses into the XLA transpose ----
    x_cf = jnp.transpose(x.reshape(B, C, KL), (1, 0, 2)).reshape(C, N)
    x_d_cf = x_cf + jnp.repeat(diff_cb, KL, axis=1)                 # col = b*KL + t
    xpe_cf = jnp.transpose(x_pe.reshape(B, KL, C), (2, 0, 1)).reshape(C, N)
    xpe_proj = left_matmul(xpe_cf, params["pe_w"], params["pe_b"])  # (C, N)

    # ---- transformer encoder over the kg embedding (seq-major columns s*B + b) ----
    bs_src = jnp.broadcast_to(bs_cb[:, None, :], (C, KL, B)).reshape(C, KL * B)
    bs_seq = transformer_layer_cf(bs_src, params["trans"], nheads, KL, B)
    bs_cf3 = jnp.transpose(bs_seq.reshape(C, KL, B), (0, 2, 1))     # (C, B, KL)
    bs_cf4 = bs_cf3.reshape(C, B, K, L)

    # ---- frequency domain ----
    # TODO(synk): rfft/irfft/top-k have no Pallas equivalent; they stay in XLA.
    x_d_cf4 = x_d_cf.reshape(C, B, K, L)
    bs_fre = jnp.fft.rfft(bs_cf4)                                   # (C, B, K, E)
    x_ft = jnp.fft.rfft(x_d_cf4)                                    # (C, B, K, E)
    E = x_ft.shape[-1]
    Ne = B * K * E

    x_fre, resid_freq = extract_frequency(x_ft, freq_select)

    bs_r, bs_i = jnp.real(bs_fre), jnp.imag(bs_fre)

    def pack_with_bs(xs):    # list of (C,B,K,E) complex -> (2C, len(xs)*Ne) r/i pair
        n = len(xs)
        xr = jnp.stack([jnp.real(t) for t in xs])                   # (n, C, B, K, E)
        xi = jnp.stack([jnp.imag(t) for t in xs])
        br = jnp.broadcast_to(bs_r[None], (n,) + bs_r.shape)
        bi = jnp.broadcast_to(bs_i[None], (n,) + bs_i.shape)
        cr = jnp.concatenate([xr, br], axis=1).transpose(1, 0, 2, 3, 4)
        ci = jnp.concatenate([xi, bi], axis=1).transpose(1, 0, 2, 3, 4)
        return cr.reshape(2 * C, n * Ne), ci.reshape(2 * C, n * Ne)

    # ONE complex projection for all F query bands; ONE for K and V together
    # (reference feeds k = x_ft into both W_K and W_V).
    q_in_r, q_in_i = pack_with_bs(x_fre)                            # (2C, F*Ne)
    kv_in_r, kv_in_i = pack_with_bs([x_ft])                         # (2C, Ne)

    wq = params["fca"]["WQ"]
    wk = params["fca"]["WK"]
    wv = params["fca"]["WV"]
    q_r, q_i = complex_left_matmul(q_in_r, q_in_i, *wq)             # (C, F*Ne) bf16
    kv_r, kv_i = complex_left_matmul(
        kv_in_r, kv_in_i,
        jnp.concatenate([wk[0], wv[0]], axis=0),
        jnp.concatenate([wk[1], wv[1]], axis=0),
        jnp.concatenate([wk[2], wv[2]], axis=0),
        jnp.concatenate([wk[3], wv[3]], axis=0))                    # (2C, Ne) bf16

    def to_bkec(y, lead=1):   # (C, lead*Ne) -> (lead, B*K, E, C)   [or (B*K, E, C)]
        t = (y.reshape(C, lead, B, K, E).transpose(1, 2, 3, 4, 0)
             .reshape(lead, B * K, E, C))
        return t if lead > 1 else t[0]

    qh_r = to_bkec(q_r, freq_select)
    qh_i = to_bkec(q_i, freq_select)
    k_r, v_r = to_bkec(kv_r[:C]), to_bkec(kv_r[C:])
    k_i, v_i = to_bkec(kv_i[:C]), to_bkec(kv_i[C:])

    out_r, out_i = fca_attention(qh_r, qh_i, k_r, k_i, v_r, v_i)    # summed over F
    cross_sum_cf = (jax.lax.complex(out_r, out_i)
                    .reshape(B, K, E, C).transpose(3, 0, 1, 2))     # (C, B, K, E)

    # frequency-weight gate:  softmax(MLP(|X|)) over E  (fused fw1a->relu->fw1b)
    xf_abs = jnp.abs(x_ft)
    h = left_matmul_chain(xf_abs.reshape(C, Ne),
                          params["fw1a_w"], params["fw1a_b"],
                          params["fw1b_w"], params["fw1b_b"])
    x_weight = jax.nn.softmax(h.reshape(C, B, K, E), axis=-1)

    x_per = jnp.fft.irfft(cross_sum_cf * x_weight, n=L)             # (C, B, K, L)
    resid_time = jnp.fft.irfft(resid_freq, n=L)
    yall_cf = (x_per + resid_time).reshape(C, N)

    # first_res_projection2 over concat([yall, bs_embed]) via split weight slices
    y_res_cf = left_matmul2(yall_cf, params["frp2_w"][:, :C],
                            bs_cf3.reshape(C, N), params["frp2_w"][:, C:],
                            params["frp2_b"])                       # (C, N)

    # ---- graph message passing ----
    # TODO(synk): DGL subgraph replaced by a dense synthetic adjacency; the tiny
    #             (B,B) batch-axis mix stays in XLA, everything else is fused below.
    feat_cf3 = y_res_cf.reshape(C, B, KL)
    y_dis = (jnp.einsum("bp,cpt->cbt", params["adj_dis"], feat_cf3)
             + feat_cf3).reshape(C, N)
    y_poi = jnp.einsum("bp,cpt->cbt", params["adj_poi"], feat_cf3).reshape(C, N)

    # ---- ONE fused tail: l1/l2 + l3/l4(+res) + layer5 + x_pe + gate*filter + res/skip
    res_cf, skip_cf = fused_graph_tail(
        y_dis, y_poi, y_res_cf, xpe_proj, x_cf,
        params["l1_w"], params["l1_b"], params["l2_w"], params["l2_b"],
        params["l3_w"], params["l3_b"], params["l4_w"], params["l4_b"],
        params["l5_w"][:, :C], params["l5_w"][:, C:], params["l5_b"],
        params["frp1_w"], params["frp1_b"],          # gate | filter (torch.chunk)
        params["drp_w"], params["drp_b"])            # residual | skip

    res = jnp.transpose(res_cf.reshape(C, B, K, L), (1, 0, 2, 3))
    skip = jnp.transpose(skip_cf.reshape(C, B, K, L), (1, 0, 2, 3))
    return res, skip


# ----------------------------------------------------------------------------
# deterministic parameter init (PyTorch (out, in) weight layout)
# ----------------------------------------------------------------------------
def init_params(key, C, ddiff, kg_emb, n_nodes, dff=64):
    keys = iter(jax.random.split(key, 64))

    def rnd(shape, scale=0.1):
        return scale * jax.random.normal(next(keys), shape, dtype=jnp.float32)

    return {
        "kg_table": rnd((n_nodes, kg_emb), 1.0),
        "diff_w": rnd((C, ddiff)), "diff_b": rnd((C,)),
        "kg_w": rnd((C, kg_emb)), "kg_b": rnd((C,)),
        "pe_w": rnd((C, C)), "pe_b": rnd((C,)),
        "frp2_w": rnd((C, 2 * C)), "frp2_b": rnd((C,)),
        "frp1_w": rnd((2 * C, C)), "frp1_b": rnd((2 * C,)),
        "drp_w": rnd((2 * C, C)), "drp_b": rnd((2 * C,)),
        "fw1a_w": rnd((C, C)), "fw1a_b": rnd((C,)),
        "fw1b_w": rnd((C, C)), "fw1b_b": rnd((C,)),
        "l1_w": rnd((C, C)), "l1_b": rnd((C,)),
        "l2_w": rnd((C, C)), "l2_b": rnd((C,)),
        "l3_w": rnd((C, C)), "l3_b": rnd((C,)),
        "l4_w": rnd((C, C)), "l4_b": rnd((C,)),
        "l5_w": rnd((C, 2 * C)), "l5_b": rnd((C,)),
        "adj_dis": jnp.array([[0.0, 1.0], [1.0, 0.0]], jnp.float32),
        "adj_poi": jnp.array([[1.0, 1.0], [0.0, 1.0]], jnp.float32),
        "trans": {
            "w_in": rnd((3 * C, C)), "b_in": rnd((3 * C,)),
            "w_out": rnd((C, C)), "b_out": rnd((C,)),
            "ln1_g": jnp.ones((C,), jnp.float32), "ln1_b": jnp.zeros((C,), jnp.float32),
            "w_ff1": rnd((dff, C)), "b_ff1": rnd((dff,)),
            "w_ff2": rnd((C, dff)), "b_ff2": rnd((C,)),
            "ln2_g": jnp.ones((C,), jnp.float32), "ln2_b": jnp.zeros((C,), jnp.float32),
        },
        "fca": {
            "WQ": (rnd((C, 2 * C)), rnd((C, 2 * C)), rnd((C,)), rnd((C,))),
            "WK": (rnd((C, 2 * C)), rnd((C, 2 * C)), rnd((C,)), rnd((C,))),
            "WV": (rnd((C, 2 * C)), rnd((C, 2 * C)), rnd((C,)), rnd((C,))),
        },
    }


if __name__ == "__main__":
    B, C, K, L = 2, 4, 4, 8          # x: (B, C, K, L)
    DDIFF, KG_EMB, NHEADS, FREQ_SELECT, N_NODES = 16, 8, 2, 2, 6

    key = jax.random.PRNGKey(0)
    k_x, k_d, k_p, k_w = jax.random.split(key, 4)
    x = jax.random.normal(k_x, (B, C, K, L), jnp.float32)
    diffusion_emb = jax.random.normal(k_d, (B, DDIFF), jnp.float32)
    x_pe = jax.random.normal(k_p, (B, K, L, C), jnp.float32)
    idx = jnp.array([1, 3], dtype=jnp.int32)

    params = init_params(k_w, C, DDIFF, KG_EMB, N_NODES)

    fwd = jax.jit(residual_block_forward, static_argnums=(5, 6))
    out, skip = fwd(params, x, diffusion_emb, idx, x_pe, FREQ_SELECT, NHEADS)
    out, skip = jax.block_until_ready((out, skip))

    assert out.shape == (B, C, K, L) and skip.shape == (B, C, K, L)
    assert bool(jnp.all(jnp.isfinite(out))) and bool(jnp.all(jnp.isfinite(skip)))
    print("KERNEL_OK")
</pallas_src>

<mosaic_0001>
module attributes {stable_mosaic.version = 11 : i64} {
  func.func @kern(%arg0: i32, %arg1: memref<16x2xbf16, #tpu.memory_space<vmem>>, %arg2: memref<4x16xbf16, #tpu.memory_space<vmem>>, %arg3: memref<4x1xf32, #tpu.memory_space<vmem>>, %arg4: memref<4x2xf32, #tpu.memory_space<vmem>>) attributes {dimension_semantics = [#tpu.dimension_semantics<parallel>], iteration_bounds = array<i64: 1>, scalar_prefetch = 0 : i64, scratch_operands = 0 : i64, tpu.core_type = #tpu.core_type<tc>, window_params = [{transform_indices = @transform_0, window_bounds = array<i64: 16, 2>}, {pipeline_mode = #tpu.pipeline_mode<synchronous>, transform_indices = @transform_1, window_bounds = array<i64: 4, 16>}, {pipeline_mode = #tpu.pipeline_mode<synchronous>, transform_indices = @transform_2, window_bounds = array<i64: 4, 1>}, {transform_indices = @transform_3, window_bounds = array<i64: 4, 2>}]} {
    %c0 = arith.constant 0 : index
    %c0_0 = arith.constant 0 : index
    %0 = vector.load %arg2[%c0, %c0_0] : memref<4x16xbf16, #tpu.memory_space<vmem>>, vector<4x16xbf16>
    %c0_1 = arith.constant 0 : index
    %c0_2 = arith.constant 0 : index
    %1 = vector.load %arg1[%c0_1, %c0_2] : memref<16x2xbf16, #tpu.memory_space<vmem>>, vector<16x2xbf16>
    %cst = arith.constant dense<0.000000e+00> : vector<4x2xf32>
    %2 = tpu.matmul %0, %1, %cst {dimension_numbers = #tpu.dot_dimension_numbers<[1], [0], [0], [1], [0, 0, 1, 1], [], []>} : vector<4x16xbf16>, vector<16x2xbf16>, vector<4x2xf32> -> vector<4x2xf32>
    %c0_3 = arith.constant 0 : index
    %c0_4 = arith.constant 0 : index
    %3 = vector.load %arg3[%c0_3, %c0_4] : memref<4x1xf32, #tpu.memory_space<vmem>>, vector<4x1xf32>
    %4 = vector.broadcast %3 : vector<4x1xf32> to vector<4x2xf32>
    %5 = arith.addf %2, %4 : vector<4x2xf32>
    %c0_5 = arith.constant 0 : index
    %c0_6 = arith.constant 0 : index
    %6 = vector.load %arg4[%c0_5, %c0_6] : memref<4x2xf32, #tpu.memory_space<vmem>>, vector<4x2xf32>
    tpu.vector_store %arg4[%c0_5, %c0_6], %5 {strides = array<i32>} : memref<4x2xf32, #tpu.memory_space<vmem>>, vector<4x2xf32>,
    return
  }
  func.func @transform_0(%arg0: i32) -> (i32, i32) {
    %c0_i32 = arith.constant 0 : i32
    %c0_i32_0 = arith.constant 0 : i32
    return %c0_i32, %arg0 : i32, i32
  }
  func.func @transform_1(%arg0: i32) -> (i32, i32) {
    %c0_i32 = arith.constant 0 : i32
    %c0_i32_0 = arith.constant 0 : i32
    %c0_i32_1 = arith.constant 0 : i32
    return %c0_i32, %c0_i32_0 : i32, i32
  }
  func.func @transform_2(%arg0: i32) -> (i32, i32) {
    %c0_i32 = arith.constant 0 : i32
    %c0_i32_0 = arith.constant 0 : i32
    %c0_i32_1 = arith.constant 0 : i32
    return %c0_i32, %c0_i32_0 : i32, i32
  }
  func.func @transform_3(%arg0: i32) -> (i32, i32) {
    %c0_i32 = arith.constant 0 : i32
    %c0_i32_0 = arith.constant 0 : i32
    return %c0_i32, %arg0 : i32, i32
  }
}

module attributes {stable_mosaic.version = 11 : i64} {
  func.func @kern(%arg0: i32, %arg1: memref<8x2xbf16, #tpu.memory_space<vmem>>, %arg2: memref<4x8xbf16, #tpu.memory_space<vmem>>, %arg3: memref<4x1xf32, #tpu.memory_space<vmem>>, %arg4: memref<4x2xf32, #tpu.memory_space<vmem>>) attributes {dimension_semantics = [#tpu.dimension_semantics<parallel>], iteration_bounds = array<i64: 1>, scalar_prefetch = 0 : i64, scratch_operands = 0 : i64, tpu.core_type = #tpu.core_type<tc>, window_params = [{transform_indices = @transform_0, window_bounds = array<i64: 8, 2>}, {pipeline_mode = #tpu.pipeline_mode<synchronous>, transform_indices = @transform_1, window_bounds = array<i64: 4, 8>}, {pipeline_mode = #tpu.pipeline_mode<synchronous>, transform_indices = @transform_2, window_bounds = array<i64: 4, 1>}, {transform_indices = @transform_3, window_bounds = array<i64: 4, 2>}]} {
    %c0 = arith.constant 0 : index
    %c0_0 = arith.constant 0 : index
    %0 = vector.load %arg2[%c0, %c0_0] : memref<4x8xbf16, #tpu.memory_space<vmem>>, vector<4x8xbf16>
    %c0_1 = arith.constant 0 : index
    %c0_2 = arith.constant 0 : index
    %1 = vector.load %arg1[%c0_1, %c0_2] : memref<8x2xbf16, #tpu.memory_space<vmem>>, vector<8x2xbf16>
    %cst = arith.constant dense<0.000000e+00> : vector<4x2xf32>
    %2 = tpu.matmul %0, %1, %cst {dimension_numbers = #tpu.dot_dimension_numbers<[1], [0], [0], [1], [0, 0, 1, 1], [], []>} : vector<4x8xbf16>, vector<8x2xbf16>, vector<4x2xf32> -> vector<4x2xf32>
    %c0_3 = arith.constant 0 : index
    %c0_4 = arith.constant 0 : index
    %3 = vector.load %arg3[%c0_3, %c0_4] : memref<4x1xf32, #tpu.memory_space<vmem>>, vector<4x1xf32>
    %4 = vector.broadcast %3 : vector<4x1xf32> to vector<4x2xf32>
    %5 = arith.addf %2, %4 : vector<4x2xf32>
    %c0_5 = arith.constant 0 : index
    %c0_6 = arith.constant 0 : index
    %6 = vector.load %arg4[%c0_5, %c0_6] : memref<4x2xf32, #tpu.memory_space<vmem>>, vector<4x2xf32>
    tpu.vector_store %arg4[%c0_5, %c0_6], %5 {strides = array<i32>} : memref<4x2xf32, #tpu.memory_space<vmem>>, vector<4x2xf32>,
    return
  }
  func.func @transform_0(%arg0: i32) -> (i32, i32) {
    %c0_i32 = arith.constant 0 : i32
    %c0_i32_0 = arith.constant 0 : i32
    return %c0_i32, %arg0 : i32, i32
  }
  func.func @transform_1(%arg0: i32) -> (i32, i32) {
    %c0_i32 = arith.constant 0 : i32
    %c0_i32_0 = arith.constant 0 : i32
    %c0_i32_1 = arith.constant 0 : i32
    return %c0_i32, %c0_i32_0 : i32, i32
  }
  func.func @transform_2(%arg0: i32) -> (i32, i32) {
    %c0_i32 = arith.constant 0 : i32
    %c0_i32_0 = arith.constant 0 : i32
    %c0_i32_1 = arith.constant 0 : i32
    return %c0_i32, %c0_i32_0 : i32, i32
  }
  func.func @transform_3(%arg0: i32) -> (i32, i32) {
    %c0_i32 = arith.constant 0 : i32
    %c0_i32_0 = arith.constant 0 : i32
    return %c0_i32, %arg0 : i32, i32
  }
}

module attributes {stable_mosaic.version = 11 : i64} {
  func.func @kern(%arg0: i32, %arg1: memref<4x64xbf16, #tpu.memory_space<vmem>>, %arg2: memref<12x4xbf16, #tpu.memory_space<vmem>>, %arg3: memref<12x1xf32, #tpu.memory_space<vmem>>, %arg4: memref<12x64xbf16, #tpu.memory_space<vmem>>) attributes {dimension_semantics = [#tpu.dimension_semantics<parallel>], iteration_bounds = array<i64: 1>, scalar_prefetch = 0 : i64, scratch_operands = 0 : i64, tpu.core_type = #tpu.core_type<tc>, window_params = [{transform_indices = @transform_0, window_bounds = array<i64: 4, 64>}, {pipeline_mode = #tpu.pipeline_mode<synchronous>, transform_indices = @transform_1, window_bounds = array<i64: 12, 4>}, {pipeline_mode = #tpu.pipeline_mode<synchronous>, transform_indices = @transform_2, window_bounds = array<i64: 12, 1>}, {transform_indices = @transform_3, window_bounds = array<i64: 12, 64>}]} {
    %c0 = arith.constant 0 : index
    %c0_0 = arith.constant 0 : index
    %0 = vector.load %arg2[%c0, %c0_0] : memref<12x4xbf16, #tpu.memory_space<vmem>>, vector<12x4xbf16>
    %c0_1 = arith.constant 0 : index
    %c0_2 = arith.constant 0 : index
    %1 = vector.load %arg1[%c0_1, %c0_2] : memref<4x64xbf16, #tpu.memory_space<vmem>>, vector<4x64xbf16>
    %cst = arith.constant dense<0.000000e+00> : vector<12x64xf32>
    %2 = tpu.matmul %0, %1, %cst {dimension_numbers = #tpu.dot_dimension_numbers<[1], [0], [0], [1], [0, 0, 1, 1], [], []>} : vector<12x4xbf16>, vector<4x64xbf16>, vector<12x64xf32> -> vector<12x64xf32>
    %c0_3 = arith.constant 0 : index
    %c0_4 = arith.constant 0 : index
    %3 = vector.load %arg3[%c0_3, %c0_4] : memref<12x1xf32, #tpu.memory_space<vmem>>, vector<12x1xf32>
    %4 = vector.broadcast %3 : vector<12x1xf32> to vector<12x64xf32>
    %5 = arith.addf %2, %4 : vector<12x64xf32>
    %6 = arith.truncf %5 : vector<12x64xf32> to vector<12x64xbf16>
    %c0_5 = arith.constant 0 : index
    %c0_6 = arith.constant 0 : index
    %7 = vector.load %arg4[%c0_5, %c0_6] : memref<12x64xbf16, #tpu.memory_space<vmem>>, vector<12x64xbf16>
    tpu.vector_store %arg4[%c0_5, %c0_6], %6 {strides = array<i32>} : memref<12x64xbf16, #tpu.memory_space<vmem>>, vector<12x64xbf16>,
    return
  }
  func.func @transform_0(%arg0: i32) -> (i32, i32) {
    %c0_i32 = arith.constant 0 : i32
    %c0_i32_0 = arith.constant 0 : i32
    return %c0_i32, %arg0 : i32, i32
  }
  func.func @transform_1(%arg0: i32) -> (i32, i32) {
    %c0_i32 = arith.constant 0 : i32
    %c0_i32_0 = arith.constant 0 : i32
    %c0_i32_1 = arith.constant 0 : i32
    return %c0_i32, %c0_i32_0 : i32, i32
  }
  func.func @transform_2(%arg0: i32) -> (i32, i32) {
    %c0_i32 = arith.constant 0 : i32
    %c0_i32_0 = arith.constant 0 : i32
    %c0_i32_1 = arith.constant 0 : i32
    return %c0_i32, %c0_i32_0 : i32, i32
  }
  func.func @transform_3(%arg0: i32) -> (i32, i32) {
    %c0_i32 = arith.constant 0 : i32
    %c0_i32_0 = arith.constant 0 : i32
    return %c0_i32, %arg0 : i32, i32
  }
}

module attributes {stable_mosaic.version = 11 : i64} {
  func.func @kern(%arg0: i32, %arg1: memref<4x2x32xbf16, #tpu.memory_space<vmem>>, %arg2: memref<4x2x32xbf16, #tpu.memory_space<vmem>>, %arg3: memref<4x2x32xbf16, #tpu.memory_space<vmem>>, %arg4: memref<4x2x32xbf16, #tpu.memory_space<vmem>>) attributes {dimension_semantics = [#tpu.dimension_semantics<parallel>], iteration_bounds = array<i64: 1>, scalar_prefetch = 0 : i64, scratch_operands = 0 : i64, tpu.core_type = #tpu.core_type<tc>, window_params = [{transform_indices = @transform_0, window_bounds = array<i64: 4, 2, 32>}, {transform_indices = @transform_1, window_bounds = array<i64: 4, 2, 32>}, {transform_indices = @transform_2, window_bounds = array<i64: 4, 2, 32>}, {transform_indices = @transform_3, window_bounds = array<i64: 4, 2, 32>}]} {
    %c0 = arith.constant 0 : index
    %c0_0 = arith.constant 0 : index
    %c0_1 = arith.constant 0 : index
    %0 = vector.load %arg1[%c0, %c0_0, %c0_1] : memref<4x2x32xbf16, #tpu.memory_space<vmem>>, vector<4x2x32xbf16>
    %c0_2 = arith.constant 0 : index
    %c0_3 = arith.constant 0 : index
    %c0_4 = arith.constant 0 : index
    %1 = vector.load %arg2[%c0_2, %c0_3, %c0_4] : memref<4x2x32xbf16, #tpu.memory_space<vmem>>, vector<4x2x32xbf16>
    "tpu.trace_start"() <{level = 10 : i32, message = "ads,adt->ast"}> : () -> ()
    %cst = arith.constant dense<0.000000e+00> : vector<4x32x32xf32>
    %2 = tpu.matmul %0, %1, %cst {dimension_numbers = #tpu.dot_dimension_numbers<[1], [1], [2], [2], [0, 0, 0, 2, 1, 2], [0], [0]>} : vector<4x2x32xbf16>, vector<4x2x32xbf16>, vector<4x32x32xf32> -> vector<4x32x32xf32>
    "tpu.trace_stop"() : () -> ()
    %cst_5 = arith.constant dense<0xFF800000> : vector<4x32xf32>
    %3 = vector.multi_reduction <maximumf>, %2, %cst_5 [2] : vector<4x32x32xf32> to vector<4x32xf32>
    %4 = vector.shape_cast %3 : vector<4x32xf32> to vector<4x32x1xf32>
    %5 = vector.broadcast %4 : vector<4x32x1xf32> to vector<4x32x32xf32>
    %6 = arith.subf %2, %5 : vector<4x32x32xf32>
    %7 = math.exp %6 : vector<4x32x32xf32>
    %cst_6 = arith.constant dense<0.000000e+00> : vector<4x32xf32>
    %8 = vector.multi_reduction <add>, %7, %cst_6 [2] : vector<4x32x32xf32> to vector<4x32xf32>
    %9 = vector.shape_cast %8 : vector<4x32xf32> to vector<4x32x1xf32>
    %10 = tpu.reciprocal %9 {approx = true} : vector<4x32x1xf32> -> vector<4x32x1xf32>
    %11 = vector.broadcast %10 : vector<4x32x1xf32> to vector<4x32x32xf32>
    %12 = arith.mulf %7, %11 : vector<4x32x32xf32>
    %c0_7 = arith.constant 0 : index
    %c0_8 = arith.constant 0 : index
    %c0_9 = arith.constant 0 : index
    %13 = vector.load %arg3[%c0_7, %c0_8, %c0_9] : memref<4x2x32xbf16, #tpu.memory_space<vmem>>, vector<4x2x32xbf16>
    %14 = arith.truncf %12 : vector<4x32x32xf32> to vector<4x32x32xbf16>
    "tpu.trace_start"() <{level = 10 : i32, message = "adt,ast->ads"}> : () -> ()
    %cst_10 = arith.constant dense<0.000000e+00> : vector<4x2x32xf32>
    %15 = tpu.matmul %13, %14, %cst_10 {dimension_numbers = #tpu.dot_dimension_numbers<[2], [2], [1], [1], [0, 0, 0, 1, 1, 1], [0], [0]>} : vector<4x2x32xbf16>, vector<4x32x32xbf16>, vector<4x2x32xf32> -> vector<4x2x32xf32>
    "tpu.trace_stop"() : () -> ()
    %16 = arith.truncf %15 : vector<4x2x32xf32> to vector<4x2x32xbf16>
    %c0_11 = arith.constant 0 : index
    %c0_12 = arith.constant 0 : index
    %c0_13 = arith.constant 0 : index
    %17 = vector.load %arg4[%c0_11, %c0_12, %c0_13] : memref<4x2x32xbf16, #tpu.memory_space<vmem>>, vector<4x2x32xbf16>
    tpu.vector_store %arg4[%c0_11, %c0_12, %c0_13], %16 {strides = array<i32>} : memref<4x2x32xbf16, #tpu.memory_space<vmem>>, vector<4x2x32xbf16>,
    return
  }
  func.func @transform_0(%arg0: i32) -> (i32, i32, i32) {
    %c0_i32 = arith.constant 0 : i32
    %c0_i32_0 = arith.constant 0 : i32
    %c0_i32_1 = arith.constant 0 : i32
    return %arg0, %c0_i32, %c0_i32_0 : i32, i32, i32
  }
  func.func @transform_1(%arg0: i32) -> (i32, i32, i32) {
    %c0_i32 = arith.constant 0 : i32
    %c0_i32_0 = arith.constant 0 : i32
    %c0_i32_1 = arith.constant 0 : i32
    return %arg0, %c0_i32, %c0_i32_0 : i32, i32, i32
  }
  func.func @transform_2(%arg0: i32) -> (i32, i32, i32) {
    %c0_i32 = arith.constant 0 : i32
    %c0_i32_0 = arith.constant 0 : i32
    %c0_i32_1 = arith.constant 0 : i32
    return %arg0, %c0_i32, %c0_i32_0 : i32, i32, i32
  }
  func.func @transform_3(%arg0: i32) -> (i32, i32, i32) {
    %c0_i32 = arith.constant 0 : i32
    %c0_i32_0 = arith.constant 0 : i32
    %c0_i32_1 = arith.constant 0 : i32
    return %arg0, %c0_i32, %c0_i32_0 : i32, i32, i32
  }
}

module attributes {stable_mosaic.version = 11 : i64} {
  func.func @kern(%arg0: i32, %arg1: memref<4x64xf32, #tpu.memory_space<vmem>>, %arg2: memref<4x64xbf16, #tpu.memory_space<vmem>>, %arg3: memref<4x4xbf16, #tpu.memory_space<vmem>>, %arg4: memref<4x1xf32, #tpu.memory_space<vmem>>, %arg5: memref<4x1xf32, #tpu.memory_space<vmem>>, %arg6: memref<4x1xf32, #tpu.memory_space<vmem>>, %arg7: memref<4x64xf32, #tpu.memory_space<vmem>>) attributes {dimension_semantics = [#tpu.dimension_semantics<parallel>], iteration_bounds = array<i64: 1>, scalar_prefetch = 0 : i64, scratch_operands = 0 : i64, tpu.core_type = #tpu.core_type<tc>, window_params = [{transform_indices = @transform_0, window_bounds = array<i64: 4, 64>}, {transform_indices = @transform_1, window_bounds = array<i64: 4, 64>}, {pipeline_mode = #tpu.pipeline_mode<synchronous>, transform_indices = @transform_2, window_bounds = array<i64: 4, 4>}, {pipeline_mode = #tpu.pipeline_mode<synchronous>, transform_indices = @transform_3, window_bounds = array<i64: 4, 1>}, {pipeline_mode = #tpu.pipeline_mode<synchronous>, transform_indices = @transform_4, window_bounds = array<i64: 4, 1>}, {pipeline_mode = #tpu.pipeline_mode<synchronous>, transform_indices = @transform_5, window_bounds = array<i64: 4, 1>}, {transform_indices = @transform_6, window_bounds = array<i64: 4, 64>}]} {
    %c0 = arith.constant 0 : index
    %c0_0 = arith.constant 0 : index
    %0 = vector.load %arg1[%c0, %c0_0] : memref<4x64xf32, #tpu.memory_space<vmem>>, vector<4x64xf32>
    %c0_1 = arith.constant 0 : index
    %c0_2 = arith.constant 0 : index
    %1 = vector.load %arg3[%c0_1, %c0_2] : memref<4x4xbf16, #tpu.memory_space<vmem>>, vector<4x4xbf16>
    %c0_3 = arith.constant 0 : index
    %c0_4 = arith.constant 0 : index
    %2 = vector.load %arg2[%c0_3, %c0_4] : memref<4x64xbf16, #tpu.memory_space<vmem>>, vector<4x64xbf16>
    %cst = arith.constant dense<0.000000e+00> : vector<4x64xf32>
    %3 = tpu.matmul %1, %2, %cst {dimension_numbers = #tpu.dot_dimension_numbers<[1], [0], [0], [1], [0, 0, 1, 1], [], []>} : vector<4x4xbf16>, vector<4x64xbf16>, vector<4x64xf32> -> vector<4x64xf32>
    %4 = arith.addf %0, %3 : vector<4x64xf32>
    %c0_5 = arith.constant 0 : index
    %c0_6 = arith.constant 0 : index
    %5 = vector.load %arg4[%c0_5, %c0_6] : memref<4x1xf32, #tpu.memory_space<vmem>>, vector<4x1xf32>
    %6 = vector.broadcast %5 : vector<4x1xf32> to vector<4x64xf32>
    %7 = arith.addf %4, %6 : vector<4x64xf32>
    %cst_7 = arith.constant dense<0.000000e+00> : vector<64xf32>
    %8 = vector.multi_reduction <add>, %7, %cst_7 [0] : vector<4x64xf32> to vector<64xf32>
    %9 = vector.shape_cast %8 : vector<64xf32> to vector<1x64xf32>
    %cst_8 = arith.constant 4.000000e+00 : f32
    %10 = vector.broadcast %cst_8 : f32 to vector<1x64xf32>
    %11 = arith.divf %9, %10 : vector<1x64xf32>
    %12 = vector.broadcast %11 : vector<1x64xf32> to vector<4x64xf32>
    %13 = arith.subf %7, %12 : vector<4x64xf32>
    %14 = arith.mulf %13, %13 : vector<4x64xf32>
    %cst_9 = arith.constant dense<0.000000e+00> : vector<64xf32>
    %15 = vector.multi_reduction <add>, %14, %cst_9 [0] : vector<4x64xf32> to vector<64xf32>
    %16 = vector.shape_cast %15 : vector<64xf32> to vector<1x64xf32>
    %cst_10 = arith.constant 4.000000e+00 : f32
    %17 = vector.broadcast %cst_10 : f32 to vector<1x64xf32>
    %18 = arith.divf %16, %17 : vector<1x64xf32>
    %cst_11 = arith.constant 9.99999974E-6 : f32
    %19 = vector.broadcast %cst_11 : f32 to vector<1x64xf32>
    %20 = arith.addf %18, %19 : vector<1x64xf32>
    %21 = math.rsqrt %20 : vector<1x64xf32>
    %22 = vector.broadcast %21 : vector<1x64xf32> to vector<4x64xf32>
    %23 = arith.mulf %13, %22 : vector<4x64xf32>
    %c0_12 = arith.constant 0 : index
    %c0_13 = arith.constant 0 : index
    %24 = vector.load %arg5[%c0_12, %c0_13] : memref<4x1xf32, #tpu.memory_space<vmem>>, vector<4x1xf32>
    %25 = vector.broadcast %24 : vector<4x1xf32> to vector<4x64xf32>
    %26 = arith.mulf %23, %25 : vector<4x64xf32>
    %c0_14 = arith.constant 0 : index
    %c0_15 = arith.constant 0 : index
    %27 = vector.load %arg6[%c0_14, %c0_15] : memref<4x1xf32, #tpu.memory_space<vmem>>, vector<4x1xf32>
    %28 = vector.broadcast %27 : vector<4x1xf32> to vector<4x64xf32>
    %29 = arith.addf %26, %28 : vector<4x64xf32>
    %c0_16 = arith.constant 0 : index
    %c0_17 = arith.constant 0 : index
    %30 = vector.load %arg7[%c0_16, %c0_17] : memref<4x64xf32, #tpu.memory_space<vmem>>, vector<4x64xf32>
    tpu.vector_store %arg7[%c0_16, %c0_17], %29 {strides = array<i32>} : memref<4x64xf32, #tpu.memory_space<vmem>>, vector<4x64xf32>,
    return
  }
  func.func @transform_0(%arg0: i32) -> (i32, i32) {
    %c0_i32 = arith.constant 0 : i32
    %c0_i32_0 = arith.constant 0 : i32
    return %c0_i32, %arg0 : i32, i32
  }
  func.func @transform_1(%arg0: i32) -> (i32, i32) {
    %c0_i32 = arith.constant 0 : i32
    %c0_i32_0 = arith.constant 0 : i32
    return %c0_i32, %arg0 : i32, i32
  }
  func.func @transform_2(%arg0: i32) -> (i32, i32) {
    %c0_i32 = arith.constant 0 : i32
    %c0_i32_0 = arith.constant 0 : i32
    %c0_i32_1 = arith.constant 0 : i32
    return %c0_i32, %c0_i32_0 : i32, i32
  }
  func.func @transform_3(%arg0: i32) -> (i32, i32) {
    %c0_i32 = arith.constant 0 : i32
    %c0_i32_0 = arith.constant 0 : i32
    %c0_i32_1 = arith.constant 0 : i32
    return %c0_i32, %c0_i32_0 : i32, i32
  }
  func.func @transform_4(%arg0: i32) -> (i32, i32) {
    %c0_i32 = arith.constant 0 : i32
    %c0_i32_0 = arith.constant 0 : i32
    %c0_i32_1 = arith.constant 0 : i32
    return %c0_i32, %c0_i32_0 : i32, i32
  }
  func.func @transform_5(%arg0: i32) -> (i32, i32) {
    %c0_i32 = arith.constant 0 : i32
    %c0_i32_0 = arith.constant 0 : i32
    %c0_i32_1 = arith.constant 0 : i32
    return %c0_i32, %c0_i32_0 : i32, i32
  }
  func.func @transform_6(%arg0: i32) -> (i32, i32) {
    %c0_i32 = arith.constant 0 : i32
    %c0_i32_0 = arith.constant 0 : i32
    return %c0_i32, %arg0 : i32, i32
  }
}

module attributes {stable_mosaic.version = 11 : i64} {
  func.func @kern(%arg0: i32, %arg1: memref<4x64xf32, #tpu.memory_space<vmem>>, %arg2: memref<64x4xbf16, #tpu.memory_space<vmem>>, %arg3: memref<64x1xf32, #tpu.memory_space<vmem>>, %arg4: memref<4x64xbf16, #tpu.memory_space<vmem>>, %arg5: memref<4x1xf32, #tpu.memory_space<vmem>>, %arg6: memref<4x1xf32, #tpu.memory_space<vmem>>, %arg7: memref<4x1xf32, #tpu.memory_space<vmem>>, %arg8: memref<4x64xf32, #tpu.memory_space<vmem>>) attributes {dimension_semantics = [#tpu.dimension_semantics<parallel>], iteration_bounds = array<i64: 1>, scalar_prefetch = 0 : i64, scratch_operands = 0 : i64, tpu.core_type = #tpu.core_type<tc>, window_params = [{transform_indices = @transform_0, window_bounds = array<i64: 4, 64>}, {pipeline_mode = #tpu.pipeline_mode<synchronous>, transform_indices = @transform_1, window_bounds = array<i64: 64, 4>}, {pipeline_mode = #tpu.pipeline_mode<synchronous>, transform_indices = @transform_2, window_bounds = array<i64: 64, 1>}, {pipeline_mode = #tpu.pipeline_mode<synchronous>, transform_indices = @transform_3, window_bounds = array<i64: 4, 64>}, {pipeline_mode = #tpu.pipeline_mode<synchronous>, transform_indices = @transform_4, window_bounds = array<i64: 4, 1>}, {pipeline_mode = #tpu.pipeline_mode<synchronous>, transform_indices = @transform_5, window_bounds = array<i64: 4, 1>}, {pipeline_mode = #tpu.pipeline_mode<synchronous>, transform_indices = @transform_6, window_bounds = array<i64: 4, 1>}, {transform_indices = @transform_7, window_bounds = array<i64: 4, 64>}]} {
    %c0 = arith.constant 0 : index
    %c0_0 = arith.constant 0 : index
    %0 = vector.load %arg1[%c0, %c0_0] : memref<4x64xf32, #tpu.memory_space<vmem>>, vector<4x64xf32>
    %c0_1 = arith.constant 0 : index
    %c0_2 = arith.constant 0 : index
    %1 = vector.load %arg2[%c0_1, %c0_2] : memref<64x4xbf16, #tpu.memory_space<vmem>>, vector<64x4xbf16>
    %2 = arith.truncf %0 : vector<4x64xf32> to vector<4x64xbf16>
    %cst = arith.constant dense<0.000000e+00> : vector<64x64xf32>
    %3 = tpu.matmul %1, %2, %cst {dimension_numbers = #tpu.dot_dimension_numbers<[1], [0], [0], [1], [0, 0, 1, 1], [], []>} : vector<64x4xbf16>, vector<4x64xbf16>, vector<64x64xf32> -> vector<64x64xf32>
    %c0_3 = arith.constant 0 : index
    %c0_4 = arith.constant 0 : index
    %4 = vector.load %arg3[%c0_3, %c0_4] : memref<64x1xf32, #tpu.memory_space<vmem>>, vector<64x1xf32>
    %5 = vector.broadcast %4 : vector<64x1xf32> to vector<64x64xf32>
    %6 = arith.addf %3, %5 : vector<64x64xf32>
    %7 = arith.mulf %6, %6 : vector<64x64xf32>
    %8 = arith.mulf %6, %7 : vector<64x64xf32>
    %cst_5 = arith.constant 4.471500e-02 : f32
    %9 = vector.broadcast %cst_5 : f32 to vector<64x64xf32>
    %10 = arith.mulf %9, %8 : vector<64x64xf32>
    %11 = arith.addf %6, %10 : vector<64x64xf32>
    %cst_6 = arith.constant 0.797884583 : f32
    %12 = vector.broadcast %cst_6 : f32 to vector<64x64xf32>
    %13 = arith.mulf %12, %11 : vector<64x64xf32>
    %14 = math.tanh %13 : vector<64x64xf32>
    %cst_7 = arith.constant 1.000000e+00 : f32
    %15 = vector.broadcast %cst_7 : f32 to vector<64x64xf32>
    %16 = arith.addf %15, %14 : vector<64x64xf32>
    %cst_8 = arith.constant 5.000000e-01 : f32
    %17 = vector.broadcast %cst_8 : f32 to vector<64x64xf32>
    %18 = arith.mulf %17, %16 : vector<64x64xf32>
    %19 = arith.mulf %6, %18 : vector<64x64xf32>
    %c0_9 = arith.constant 0 : index
    %c0_10 = arith.constant 0 : index
    %20 = vector.load %arg4[%c0_9, %c0_10] : memref<4x64xbf16, #tpu.memory_space<vmem>>, vector<4x64xbf16>
    %21 = arith.truncf %19 : vector<64x64xf32> to vector<64x64xbf16>
    %cst_11 = arith.constant dense<0.000000e+00> : vector<4x64xf32>
    %22 = tpu.matmul %20, %21, %cst_11 {dimension_numbers = #tpu.dot_dimension_numbers<[1], [0], [0], [1], [0, 0, 1, 1], [], []>} : vector<4x64xbf16>, vector<64x64xbf16>, vector<4x64xf32> -> vector<4x64xf32>
    %c0_12 = arith.constant 0 : index
    %c0_13 = arith.constant 0 : index
    %23 = vector.load %arg5[%c0_12, %c0_13] : memref<4x1xf32, #tpu.memory_space<vmem>>, vector<4x1xf32>
    %24 = vector.broadcast %23 : vector<4x1xf32> to vector<4x64xf32>
    %25 = arith.addf %22, %24 : vector<4x64xf32>
    %26 = arith.addf %0, %25 : vector<4x64xf32>
    %cst_14 = arith.constant dense<0.000000e+00> : vector<64xf32>
    %27 = vector.multi_reduction <add>, %26, %cst_14 [0] : vector<4x64xf32> to vector<64xf32>
    %28 = vector.shape_cast %27 : vector<64xf32> to vector<1x64xf32>
    %cst_15 = arith.constant 4.000000e+00 : f32
    %29 = vector.broadcast %cst_15 : f32 to vector<1x64xf32>
    %30 = arith.divf %28, %29 : vector<1x64xf32>
    %31 = vector.broadcast %30 : vector<1x64xf32> to vector<4x64xf32>
    %32 = arith.subf %26, %31 : vector<4x64xf32>
    %33 = arith.mulf %32, %32 : vector<4x64xf32>
    %cst_16 = arith.constant dense<0.000000e+00> : vector<64xf32>
    %34 = vector.multi_reduction <add>, %33, %cst_16 [0] : vector<4x64xf32> to vector<64xf32>
    %35 = vector.shape_cast %34 : vector<64xf32> to vector<1x64xf32>
    %cst_17 = arith.constant 4.000000e+00 : f32
    %36 = vector.broadcast %cst_17 : f32 to vector<1x64xf32>
    %37 = arith.divf %35, %36 : vector<1x64xf32>
    %cst_18 = arith.constant 9.99999974E-6 : f32
    %38 = vector.broadcast %cst_18 : f32 to vector<1x64xf32>
    %39 = arith.addf %37, %38 : vector<1x64xf32>
    %40 = math.rsqrt %39 : vector<1x64xf32>
    %41 = vector.broadcast %40 : vector<1x64xf32> to vector<4x64xf32>
    %42 = arith.mulf %32, %41 : vector<4x64xf32>
    %c0_19 = arith.constant 0 : index
    %c0_20 = arith.constant 0 : index
    %43 = vector.load %arg6[%c0_19, %c0_20] : memref<4x1xf32, #tpu.memory_space<vmem>>, vector<4x1xf32>
    %44 = vector.broadcast %43 : vector<4x1xf32> to vector<4x64xf32>
    %45 = arith.mulf %42, %44 : vector<4x64xf32>
    %c0_21 = arith.constant 0 : index
    %c0_22 = arith.constant 0 : index
    %46 = vector.load %arg7[%c0_21, %c0_22] : memref<4x1xf32, #tpu.memory_space<vmem>>, vector<4x1xf32>
    %47 = vector.broadcast %46 : vector<4x1xf32> to vector<4x64xf32>
    %48 = arith.addf %45, %47 : vector<4x64xf32>
    %c0_23 = arith.constant 0 : index
    %c0_24 = arith.constant 0 : index
    %49 = vector.load %arg8[%c0_23, %c0_24] : memref<4x64xf32, #tpu.memory_space<vmem>>, vector<4x64xf32>
    tpu.vector_store %arg8[%c0_23, %c0_24], %48 {strides = array<i32>} : memref<4x64xf32, #tpu.memory_space<vmem>>, vector<4x64xf32>,
    return
  }
  func.func @transform_0(%arg0: i32) -> (i32, i32) {
    %c0_i32 = arith.constant 0 : i32
    %c0_i32_0 = arith.constant 0 : i32
    return %c0_i32, %arg0 : i32, i32
  }
  func.func @transform_1(%arg0: i32) -> (i32, i32) {
    %c0_i32 = arith.constant 0 : i32
    %c0_i32_0 = arith.constant 0 : i32
    %c0_i32_1 = arith.constant 0 : i32
    return %c0_i32, %c0_i32_0 : i32, i32
  }
  func.func @transform_2(%arg0: i32) -> (i32, i32) {
    %c0_i32 = arith.constant 0 : i32
    %c0_i32_0 = arith.constant 0 : i32
    %c0_i32_1 = arith.constant 0 : i32
    return %c0_i32, %c0_i32_0 : i32, i32
  }
  func.func @transform_3(%arg0: i32) -> (i32, i32) {
    %c0_i32 = arith.constant 0 : i32
    %c0_i32_0 = arith.constant 0 : i32
    %c0_i32_1 = arith.constant 0 : i32
    return %c0_i32, %c0_i32_0 : i32, i32
  }
  func.func @transform_4(%arg0: i32) -> (i32, i32) {
    %c0_i32 = arith.constant 0 : i32
    %c0_i32_0 = arith.constant 0 : i32
    %c0_i32_1 = arith.constant 0 : i32
    return %c0_i32, %c0_i32_0 : i32, i32
  }
  func.func @transform_5(%arg0: i32) -> (i32, i32) {
    %c0_i32 = arith.constant 0 : i32
    %c0_i32_0 = arith.constant 0 : i32
    %c0_i32_1 = arith.constant 0 : i32
    return %c0_i32, %c0_i32_0 : i32, i32
  }
  func.func @transform_6(%arg0: i32) -> (i32, i32) {
    %c0_i32 = arith.constant 0 : i32
    %c0_i32_0 = arith.constant 0 : i32
    %c0_i32_1 = arith.constant 0 : i32
    return %c0_i32, %c0_i32_0 : i32, i32
  }
  func.func @transform_7(%arg0: i32) -> (i32, i32) {
    %c0_i32 = arith.constant 0 : i32
    %c0_i32_0 = arith.constant 0 : i32
    return %c0_i32, %arg0 : i32, i32
  }
}

module attributes {stable_mosaic.version = 11 : i64} {
  func.func @kern(%arg0: i32, %arg1: memref<16x80xbf16, #tpu.memory_space<vmem>>, %arg2: memref<4x16xbf16, #tpu.memory_space<vmem>>, %arg3: memref<4x16xbf16, #tpu.memory_space<vmem>>, %arg4: memref<4x1xf32, #tpu.memory_space<vmem>>, %arg5: memref<4x1xf32, #tpu.memory_space<vmem>>, %arg6: memref<4x80xbf16, #tpu.memory_space<vmem>>, %arg7: memref<4x80xbf16, #tpu.memory_space<vmem>>) attributes {dimension_semantics = [#tpu.dimension_semantics<parallel>], iteration_bounds = array<i64: 1>, scalar_prefetch = 0 : i64, scratch_operands = 0 : i64, tpu.core_type = #tpu.core_type<tc>, window_params = [{transform_indices = @transform_0, window_bounds = array<i64: 16, 80>}, {pipeline_mode = #tpu.pipeline_mode<synchronous>, transform_indices = @transform_1, window_bounds = array<i64: 4, 16>}, {pipeline_mode = #tpu.pipeline_mode<synchronous>, transform_indices = @transform_2, window_bounds = array<i64: 4, 16>}, {pipeline_mode = #tpu.pipeline_mode<synchronous>, transform_indices = @transform_3, window_bounds = array<i64: 4, 1>}, {pipeline_mode = #tpu.pipeline_mode<synchronous>, transform_indices = @transform_4, window_bounds = array<i64: 4, 1>}, {transform_indices = @transform_5, window_bounds = array<i64: 4, 80>}, {transform_indices = @transform_6, window_bounds = array<i64: 4, 80>}]} {
    %c0 = arith.constant 0 : index
    %c0_0 = arith.constant 0 : index
    %0 = vector.load %arg1[%c0, %c0_0] : memref<16x80xbf16, #tpu.memory_space<vmem>>, vector<16x80xbf16>
    %c0_1 = arith.constant 0 : index
    %c0_2 = arith.constant 0 : index
    %1 = vector.load %arg2[%c0_1, %c0_2] : memref<4x16xbf16, #tpu.memory_space<vmem>>, vector<4x16xbf16>
    %cst = arith.constant dense<0.000000e+00> : vector<4x80xf32>
    %2 = tpu.matmul %1, %0, %cst {dimension_numbers = #tpu.dot_dimension_numbers<[1], [0], [0], [1], [0, 0, 1, 1], [], []>} : vector<4x16xbf16>, vector<16x80xbf16>, vector<4x80xf32> -> vector<4x80xf32>
    %c0_3 = arith.constant 0 : index
    %c0_4 = arith.constant 0 : index
    %3 = vector.load %arg4[%c0_3, %c0_4] : memref<4x1xf32, #tpu.memory_space<vmem>>, vector<4x1xf32>
    %4 = vector.broadcast %3 : vector<4x1xf32> to vector<4x80xf32>
    %5 = arith.addf %2, %4 : vector<4x80xf32>
    %6 = arith.truncf %5 : vector<4x80xf32> to vector<4x80xbf16>
    %c0_5 = arith.constant 0 : index
    %c0_6 = arith.constant 0 : index
    %7 = vector.load %arg6[%c0_5, %c0_6] : memref<4x80xbf16, #tpu.memory_space<vmem>>, vector<4x80xbf16>
    tpu.vector_store %arg6[%c0_5, %c0_6], %6 {strides = array<i32>} : memref<4x80xbf16, #tpu.memory_space<vmem>>, vector<4x80xbf16>,
    %c0_7 = arith.constant 0 : index
    %c0_8 = arith.constant 0 : index
    %8 = vector.load %arg3[%c0_7, %c0_8] : memref<4x16xbf16, #tpu.memory_space<vmem>>, vector<4x16xbf16>
    %cst_9 = arith.constant dense<0.000000e+00> : vector<4x80xf32>
    %9 = tpu.matmul %8, %0, %cst_9 {dimension_numbers = #tpu.dot_dimension_numbers<[1], [0], [0], [1], [0, 0, 1, 1], [], []>} : vector<4x16xbf16>, vector<16x80xbf16>, vector<4x80xf32> -> vector<4x80xf32>
    %c0_10 = arith.constant 0 : index
    %c0_11 = arith.constant 0 : index
    %10 = vector.load %arg5[%c0_10, %c0_11] : memref<4x1xf32, #tpu.memory_space<vmem>>, vector<4x1xf32>
    %11 = vector.broadcast %10 : vector<4x1xf32> to vector<4x80xf32>
    %12 = arith.addf %9, %11 : vector<4x80xf32>
    %13 = arith.truncf %12 : vector<4x80xf32> to vector<4x80xbf16>
    %c0_12 = arith.constant 0 : index
    %c0_13 = arith.constant 0 : index
    %14 = vector.load %arg7[%c0_12, %c0_13] : memref<4x80xbf16, #tpu.memory_space<vmem>>, vector<4x80xbf16>
    tpu.vector_store %arg7[%c0_12, %c0_13], %13 {strides = array<i32>} : memref<4x80xbf16, #tpu.memory_space<vmem>>, vector<4x80xbf16>,
    return
  }
  func.func @transform_0(%arg0: i32) -> (i32, i32) {
    %c0_i32 = arith.constant 0 : i32
    %c0_i32_0 = arith.constant 0 : i32
    return %c0_i32, %arg0 : i32, i32
  }
  func.func @transform_1(%arg0: i32) -> (i32, i32) {
    %c0_i32 = arith.constant 0 : i32
    %c0_i32_0 = arith.constant 0 : i32
    %c0_i32_1 = arith.constant 0 : i32
    return %c0_i32, %c0_i32_0 : i32, i32
  }
  func.func @transform_2(%arg0: i32) -> (i32, i32) {
    %c0_i32 = arith.constant 0 : i32
    %c0_i32_0 = arith.constant 0 : i32
    %c0_i32_1 = arith.constant 0 : i32
    return %c0_i32, %c0_i32_0 : i32, i32
  }
  func.func @transform_3(%arg0: i32) -> (i32, i32) {
    %c0_i32 = arith.constant 0 : i32
    %c0_i32_0 = arith.constant 0 : i32
    %c0_i32_1 = arith.constant 0 : i32
    return %c0_i32, %c0_i32_0 : i32, i32
  }
  func.func @transform_4(%arg0: i32) -> (i32, i32) {
    %c0_i32 = arith.constant 0 : i32
    %c0_i32_0 = arith.constant 0 : i32
    %c0_i32_1 = arith.constant 0 : i32
    return %c0_i32, %c0_i32_0 : i32, i32
  }
  func.func @transform_5(%arg0: i32) -> (i32, i32) {
    %c0_i32 = arith.constant 0 : i32
    %c0_i32_0 = arith.constant 0 : i32
    return %c0_i32, %arg0 : i32, i32
  }
  func.func @transform_6(%arg0: i32) -> (i32, i32) {
    %c0_i32 = arith.constant 0 : i32
    %c0_i32_0 = arith.constant 0 : i32
    return %c0_i32, %arg0 : i32, i32
  }
}

module attributes {stable_mosaic.version = 11 : i64} {
  func.func @kern(%arg0: i32, %arg1: memref<16x40xbf16, #tpu.memory_space<vmem>>, %arg2: memref<8x16xbf16, #tpu.memory_space<vmem>>, %arg3: memref<8x16xbf16, #tpu.memory_space<vmem>>, %arg4: memref<8x1xf32, #tpu.memory_space<vmem>>, %arg5: memref<8x1xf32, #tpu.memory_space<vmem>>, %arg6: memref<8x40xbf16, #tpu.memory_space<vmem>>, %arg7: memref<8x40xbf16, #tpu.memory_space<vmem>>) attributes {dimension_semantics = [#tpu.dimension_semantics<parallel>], iteration_bounds = array<i64: 1>, scalar_prefetch = 0 : i64, scratch_operands = 0 : i64, tpu.core_type = #tpu.core_type<tc>, window_params = [{transform_indices = @transform_0, window_bounds = array<i64: 16, 40>}, {pipeline_mode = #tpu.pipeline_mode<synchronous>, transform_indices = @transform_1, window_bounds = array<i64: 8, 16>}, {pipeline_mode = #tpu.pipeline_mode<synchronous>, transform_indices = @transform_2, window_bounds = array<i64: 8, 16>}, {pipeline_mode = #tpu.pipeline_mode<synchronous>, transform_indices = @transform_3, window_bounds = array<i64: 8, 1>}, {pipeline_mode = #tpu.pipeline_mode<synchronous>, transform_indices = @transform_4, window_bounds = array<i64: 8, 1>}, {transform_indices = @transform_5, window_bounds = array<i64: 8, 40>}, {transform_indices = @transform_6, window_bounds = array<i64: 8, 40>}]} {
    %c0 = arith.constant 0 : index
    %c0_0 = arith.constant 0 : index
    %0 = vector.load %arg1[%c0, %c0_0] : memref<16x40xbf16, #tpu.memory_space<vmem>>, vector<16x40xbf16>
    %c0_1 = arith.constant 0 : index
    %c0_2 = arith.constant 0 : index
    %1 = vector.load %arg2[%c0_1, %c0_2] : memref<8x16xbf16, #tpu.memory_space<vmem>>, vector<8x16xbf16>
    %cst = arith.constant dense<0.000000e+00> : vector<8x40xf32>
    %2 = tpu.matmul %1, %0, %cst {dimension_numbers = #tpu.dot_dimension_numbers<[1], [0], [0], [1], [0, 0, 1, 1], [], []>} : vector<8x16xbf16>, vector<16x40xbf16>, vector<8x40xf32> -> vector<8x40xf32>
    %c0_3 = arith.constant 0 : index
    %c0_4 = arith.constant 0 : index
    %3 = vector.load %arg4[%c0_3, %c0_4] : memref<8x1xf32, #tpu.memory_space<vmem>>, vector<8x1xf32>
    %4 = vector.broadcast %3 : vector<8x1xf32> to vector<8x40xf32>
    %5 = arith.addf %2, %4 : vector<8x40xf32>
    %6 = arith.truncf %5 : vector<8x40xf32> to vector<8x40xbf16>
    %c0_5 = arith.constant 0 : index
    %c0_6 = arith.constant 0 : index
    %7 = vector.load %arg6[%c0_5, %c0_6] : memref<8x40xbf16, #tpu.memory_space<vmem>>, vector<8x40xbf16>
    tpu.vector_store %arg6[%c0_5, %c0_6], %6 {strides = array<i32>} : memref<8x40xbf16, #tpu.memory_space<vmem>>, vector<8x40xbf16>,
    %c0_7 = arith.constant 0 : index
    %c0_8 = arith.constant 0 : index
    %8 = vector.load %arg3[%c0_7, %c0_8] : memref<8x16xbf16, #tpu.memory_space<vmem>>, vector<8x16xbf16>
    %cst_9 = arith.constant dense<0.000000e+00> : vector<8x40xf32>
    %9 = tpu.matmul %8, %0, %cst_9 {dimension_numbers = #tpu.dot_dimension_numbers<[1], [0], [0], [1], [0, 0, 1, 1], [], []>} : vector<8x16xbf16>, vector<16x40xbf16>, vector<8x40xf32> -> vector<8x40xf32>
    %c0_10 = arith.constant 0 : index
    %c0_11 = arith.constant 0 : index
    %10 = vector.load %arg5[%c0_10, %c0_11] : memref<8x1xf32, #tpu.memory_space<vmem>>, vector<8x1xf32>
    %11 = vector.broadcast %10 : vector<8x1xf32> to vector<8x40xf32>
    %12 = arith.addf %9, %11 : vector<8x40xf32>
    %13 = arith.truncf %12 : vector<8x40xf32> to vector<8x40xbf16>
    %c0_12 = arith.constant 0 : index
    %c0_13 = arith.constant 0 : index
    %14 = vector.load %arg7[%c0_12, %c0_13] : memref<8x40xbf16, #tpu.memory_space<vmem>>, vector<8x40xbf16>
    tpu.vector_store %arg7[%c0_12, %c0_13], %13 {strides = array<i32>} : memref<8x40xbf16, #tpu.memory_space<vmem>>, vector<8x40xbf16>,
    return
  }
  func.func @transform_0(%arg0: i32) -> (i32, i32) {
    %c0_i32 = arith.constant 0 : i32
    %c0_i32_0 = arith.constant 0 : i32
    return %c0_i32, %arg0 : i32, i32
  }
  func.func @transform_1(%arg0: i32) -> (i32, i32) {
    %c0_i32 = arith.constant 0 : i32
    %c0_i32_0 = arith.constant 0 : i32
    %c0_i32_1 = arith.constant 0 : i32
    return %c0_i32, %c0_i32_0 : i32, i32
  }
  func.func @transform_2(%arg0: i32) -> (i32, i32) {
    %c0_i32 = arith.constant 0 : i32
    %c0_i32_0 = arith.constant 0 : i32
    %c0_i32_1 = arith.constant 0 : i32
    return %c0_i32, %c0_i32_0 : i32, i32
  }
  func.func @transform_3(%arg0: i32) -> (i32, i32) {
    %c0_i32 = arith.constant 0 : i32
    %c0_i32_0 = arith.constant 0 : i32
    %c0_i32_1 = arith.constant 0 : i32
    return %c0_i32, %c0_i32_0 : i32, i32
  }
  func.func @transform_4(%arg0: i32) -> (i32, i32) {
    %c0_i32 = arith.constant 0 : i32
    %c0_i32_0 = arith.constant 0 : i32
    %c0_i32_1 = arith.constant 0 : i32
    return %c0_i32, %c0_i32_0 : i32, i32
  }
  func.func @transform_5(%arg0: i32) -> (i32, i32) {
    %c0_i32 = arith.constant 0 : i32
    %c0_i32_0 = arith.constant 0 : i32
    return %c0_i32, %arg0 : i32, i32
  }
  func.func @transform_6(%arg0: i32) -> (i32, i32) {
    %c0_i32 = arith.constant 0 : i32
    %c0_i32_0 = arith.constant 0 : i32
    return %c0_i32, %arg0 : i32, i32
  }
}

module attributes {stable_mosaic.version = 11 : i64} {
  func.func @kern(%arg0: i32, %arg1: memref<2x8x5x4xbf16, #tpu.memory_space<vmem>>, %arg2: memref<2x8x5x4xbf16, #tpu.memory_space<vmem>>, %arg3: memref<8x5x4xbf16, #tpu.memory_space<vmem>>, %arg4: memref<8x5x4xbf16, #tpu.memory_space<vmem>>, %arg5: memref<8x5x4xbf16, #tpu.memory_space<vmem>>, %arg6: memref<8x5x4xbf16, #tpu.memory_space<vmem>>, %arg7: memref<8x5x4xf32, #tpu.memory_space<vmem>>, %arg8: memref<8x5x4xf32, #tpu.memory_space<vmem>>) attributes {dimension_semantics = [#tpu.dimension_semantics<parallel>], iteration_bounds = array<i64: 1>, scalar_prefetch = 0 : i64, scratch_operands = 0 : i64, tpu.core_type = #tpu.core_type<tc>, window_params = [{transform_indices = @transform_0, window_bounds = array<i64: 2, 8, 5, 4>}, {transform_indices = @transform_1, window_bounds = array<i64: 2, 8, 5, 4>}, {transform_indices = @transform_2, window_bounds = array<i64: 8, 5, 4>}, {transform_indices = @transform_3, window_bounds = array<i64: 8, 5, 4>}, {transform_indices = @transform_4, window_bounds = array<i64: 8, 5, 4>}, {transform_indices = @transform_5, window_bounds = array<i64: 8, 5, 4>}, {transform_indices = @transform_6, window_bounds = array<i64: 8, 5, 4>}, {transform_indices = @transform_7, window_bounds = array<i64: 8, 5, 4>}]} {
    %c0 = arith.constant 0 : index
    %c0_0 = arith.constant 0 : index
    %c0_1 = arith.constant 0 : index
    %0 = vector.load %arg3[%c0, %c0_0, %c0_1] : memref<8x5x4xbf16, #tpu.memory_space<vmem>>, vector<8x5x4xbf16>
    %c0_2 = arith.constant 0 : index
    %c0_3 = arith.constant 0 : index
    %c0_4 = arith.constant 0 : index
    %1 = vector.load %arg4[%c0_2, %c0_3, %c0_4] : memref<8x5x4xbf16, #tpu.memory_space<vmem>>, vector<8x5x4xbf16>
    %c0_5 = arith.constant 0 : index
    %c0_6 = arith.constant 0 : index
    %c0_7 = arith.constant 0 : index
    %2 = vector.load %arg5[%c0_5, %c0_6, %c0_7] : memref<8x5x4xbf16, #tpu.memory_space<vmem>>, vector<8x5x4xbf16>
    %c0_8 = arith.constant 0 : index
    %c0_9 = arith.constant 0 : index
    %c0_10 = arith.constant 0 : index
    %3 = vector.load %arg6[%c0_8, %c0_9, %c0_10] : memref<8x5x4xbf16, #tpu.memory_space<vmem>>, vector<8x5x4xbf16>
    %cst = arith.constant 0.000000e+00 : f32
    %4 = vector.broadcast %cst : f32 to vector<8x5x4xf32>
    %cst_11 = arith.constant 0.000000e+00 : f32
    %5 = vector.broadcast %cst_11 : f32 to vector<8x5x4xf32>
    %c0_12 = arith.constant 0 : index
    %c0_13 = arith.constant 0 : index
    %c0_14 = arith.constant 0 : index
    %c0_15 = arith.constant 0 : index
    %6 = vector.load %arg1[%c0_12, %c0_13, %c0_14, %c0_15] : memref<2x8x5x4xbf16, #tpu.memory_space<vmem>>, vector<1x8x5x4xbf16>
    %7 = vector.shape_cast %6 : vector<1x8x5x4xbf16> to vector<8x5x4xbf16>
    %c0_16 = arith.constant 0 : index
    %c0_17 = arith.constant 0 : index
    %c0_18 = arith.constant 0 : index
    %c0_19 = arith.constant 0 : index
    %8 = vector.load %arg2[%c0_16, %c0_17, %c0_18, %c0_19] : memref<2x8x5x4xbf16, #tpu.memory_space<vmem>>, vector<1x8x5x4xbf16>
    %9 = vector.shape_cast %8 : vector<1x8x5x4xbf16> to vector<8x5x4xbf16>
    "tpu.trace_start"() <{level = 10 : i32, message = "bec,bfc->bef"}> : () -> ()
    %cst_20 = arith.constant dense<0.000000e+00> : vector<8x5x5xf32>
    %10 = tpu.matmul %7, %0, %cst_20 {dimension_numbers = #tpu.dot_dimension_numbers<[2], [2], [1], [1], [0, 0, 0, 1, 1, 1], [0], [0]>} : vector<8x5x4xbf16>, vector<8x5x4xbf16>, vector<8x5x5xf32> -> vector<8x5x5xf32>
    %cst_21 = arith.constant dense<0.000000e+00> : vector<8x5x5xf32>
    %11 = tpu.matmul %9, %1, %cst_21 {dimension_numbers = #tpu.dot_dimension_numbers<[2], [2], [1], [1], [0, 0, 0, 1, 1, 1], [0], [0]>} : vector<8x5x4xbf16>, vector<8x5x4xbf16>, vector<8x5x5xf32> -> vector<8x5x5xf32>
    "tpu.trace_stop"() : () -> ()
    %12 = arith.subf %10, %11 : vector<8x5x5xf32>
    "tpu.trace_start"() <{level = 10 : i32, message = "bec,bfc->bef"}> : () -> ()
    %cst_22 = arith.constant dense<0.000000e+00> : vector<8x5x5xf32>
    %13 = tpu.matmul %7, %1, %cst_22 {dimension_numbers = #tpu.dot_dimension_numbers<[2], [2], [1], [1], [0, 0, 0, 1, 1, 1], [0], [0]>} : vector<8x5x4xbf16>, vector<8x5x4xbf16>, vector<8x5x5xf32> -> vector<8x5x5xf32>
    %cst_23 = arith.constant dense<0.000000e+00> : vector<8x5x5xf32>
    %14 = tpu.matmul %9, %0, %cst_23 {dimension_numbers = #tpu.dot_dimension_numbers<[2], [2], [1], [1], [0, 0, 0, 1, 1, 1], [0], [0]>} : vector<8x5x4xbf16>, vector<8x5x4xbf16>, vector<8x5x5xf32> -> vector<8x5x5xf32>
    "tpu.trace_stop"() : () -> ()
    %15 = arith.addf %13, %14 : vector<8x5x5xf32>
    %16 = arith.mulf %12, %12 : vector<8x5x5xf32>
    %17 = arith.mulf %15, %15 : vector<8x5x5xf32>
    %18 = arith.addf %16, %17 : vector<8x5x5xf32>
    %19 = math.sqrt %18 : vector<8x5x5xf32>
    %cst_24 = arith.constant 0.44721359 : f32
    %20 = vector.broadcast %cst_24 : f32 to vector<8x5x5xf32>
    %21 = arith.mulf %19, %20 : vector<8x5x5xf32>
    %cst_25 = arith.constant dense<0xFF800000> : vector<8x5xf32>
    %22 = vector.multi_reduction <maximumf>, %21, %cst_25 [2] : vector<8x5x5xf32> to vector<8x5xf32>
    %23 = vector.shape_cast %22 : vector<8x5xf32> to vector<8x5x1xf32>
    %24 = vector.broadcast %23 : vector<8x5x1xf32> to vector<8x5x5xf32>
    %25 = arith.subf %21, %24 : vector<8x5x5xf32>
    %26 = math.exp %25 : vector<8x5x5xf32>
    %cst_26 = arith.constant dense<0.000000e+00> : vector<8x5xf32>
    %27 = vector.multi_reduction <add>, %26, %cst_26 [2] : vector<8x5x5xf32> to vector<8x5xf32>
    %28 = vector.shape_cast %27 : vector<8x5xf32> to vector<8x5x1xf32>
    %29 = tpu.reciprocal %28 {approx = true} : vector<8x5x1xf32> -> vector<8x5x1xf32>
    %30 = vector.broadcast %29 : vector<8x5x1xf32> to vector<8x5x5xf32>
    %31 = arith.mulf %26, %30 : vector<8x5x5xf32>
    %32 = arith.truncf %31 : vector<8x5x5xf32> to vector<8x5x5xbf16>
    "tpu.trace_start"() <{level = 10 : i32, message = "bef,bfc->bec"}> : () -> ()
    %cst_27 = arith.constant dense<0.000000e+00> : vector<8x5x4xf32>
    %33 = tpu.matmul %32, %2, %cst_27 {dimension_numbers = #tpu.dot_dimension_numbers<[2], [1], [1], [2], [0, 0, 0, 1, 1, 2], [0], [0]>} : vector<8x5x5xbf16>, vector<8x5x4xbf16>, vector<8x5x4xf32> -> vector<8x5x4xf32>
    "tpu.trace_stop"() : () -> ()
    %34 = arith.addf %4, %33 : vector<8x5x4xf32>
    "tpu.trace_start"() <{level = 10 : i32, message = "bef,bfc->bec"}> : () -> ()
    %cst_28 = arith.constant dense<0.000000e+00> : vector<8x5x4xf32>
    %35 = tpu.matmul %32, %3, %cst_28 {dimension_numbers = #tpu.dot_dimension_numbers<[2], [1], [1], [2], [0, 0, 0, 1, 1, 2], [0], [0]>} : vector<8x5x5xbf16>, vector<8x5x4xbf16>, vector<8x5x4xf32> -> vector<8x5x4xf32>
    "tpu.trace_stop"() : () -> ()
    %36 = arith.addf %5, %35 : vector<8x5x4xf32>
    %c1 = arith.constant 1 : index
    %c0_29 = arith.constant 0 : index
    %c0_30 = arith.constant 0 : index
    %c0_31 = arith.constant 0 : index
    %37 = vector.load %arg1[%c1, %c0_29, %c0_30, %c0_31] : memref<2x8x5x4xbf16, #tpu.memory_space<vmem>>, vector<1x8x5x4xbf16>
    %38 = vector.shape_cast %37 : vector<1x8x5x4xbf16> to vector<8x5x4xbf16>
    %c1_32 = arith.constant 1 : index
    %c0_33 = arith.constant 0 : index
    %c0_34 = arith.constant 0 : index
    %c0_35 = arith.constant 0 : index
    %39 = vector.load %arg2[%c1_32, %c0_33, %c0_34, %c0_35] : memref<2x8x5x4xbf16, #tpu.memory_space<vmem>>, vector<1x8x5x4xbf16>
    %40 = vector.shape_cast %39 : vector<1x8x5x4xbf16> to vector<8x5x4xbf16>
    "tpu.trace_start"() <{level = 10 : i32, message = "bec,bfc->bef"}> : () -> ()
    %cst_36 = arith.constant dense<0.000000e+00> : vector<8x5x5xf32>
    %41 = tpu.matmul %38, %0, %cst_36 {dimension_numbers = #tpu.dot_dimension_numbers<[2], [2], [1], [1], [0, 0, 0, 1, 1, 1], [0], [0]>} : vector<8x5x4xbf16>, vector<8x5x4xbf16>, vector<8x5x5xf32> -> vector<8x5x5xf32>
    %cst_37 = arith.constant dense<0.000000e+00> : vector<8x5x5xf32>
    %42 = tpu.matmul %40, %1, %cst_37 {dimension_numbers = #tpu.dot_dimension_numbers<[2], [2], [1], [1], [0, 0, 0, 1, 1, 1], [0], [0]>} : vector<8x5x4xbf16>, vector<8x5x4xbf16>, vector<8x5x5xf32> -> vector<8x5x5xf32>
    "tpu.trace_stop"() : () -> ()
    %43 = arith.subf %41, %42 : vector<8x5x5xf32>
    "tpu.trace_start"() <{level = 10 : i32, message = "bec,bfc->bef"}> : () -> ()
    %cst_38 = arith.constant dense<0.000000e+00> : vector<8x5x5xf32>
    %44 = tpu.matmul %38, %1, %cst_38 {dimension_numbers = #tpu.dot_dimension_numbers<[2], [2], [1], [1], [0, 0, 0, 1, 1, 1], [0], [0]>} : vector<8x5x4xbf16>, vector<8x5x4xbf16>, vector<8x5x5xf32> -> vector<8x5x5xf32>
    %cst_39 = arith.constant dense<0.000000e+00> : vector<8x5x5xf32>
    %45 = tpu.matmul %40, %0, %cst_39 {dimension_numbers = #tpu.dot_dimension_numbers<[2], [2], [1], [1], [0, 0, 0, 1, 1, 1], [0], [0]>} : vector<8x5x4xbf16>, vector<8x5x4xbf16>, vector<8x5x5xf32> -> vector<8x5x5xf32>
    "tpu.trace_stop"() : () -> ()
    %46 = arith.addf %44, %45 : vector<8x5x5xf32>
    %47 = arith.mulf %43, %43 : vector<8x5x5xf32>
    %48 = arith.mulf %46, %46 : vector<8x5x5xf32>
    %49 = arith.addf %47, %48 : vector<8x5x5xf32>
    %50 = math.sqrt %49 : vector<8x5x5xf32>
    %cst_40 = arith.constant 0.44721359 : f32
    %51 = vector.broadcast %cst_40 : f32 to vector<8x5x5xf32>
    %52 = arith.mulf %50, %51 : vector<8x5x5xf32>
    %cst_41 = arith.constant dense<0xFF800000> : vector<8x5xf32>
    %53 = vector.multi_reduction <maximumf>, %52, %cst_41 [2] : vector<8x5x5xf32> to vector<8x5xf32>
    %54 = vector.shape_cast %53 : vector<8x5xf32> to vector<8x5x1xf32>
    %55 = vector.broadcast %54 : vector<8x5x1xf32> to vector<8x5x5xf32>
    %56 = arith.subf %52, %55 : vector<8x5x5xf32>
    %57 = math.exp %56 : vector<8x5x5xf32>
    %cst_42 = arith.constant dense<0.000000e+00> : vector<8x5xf32>
    %58 = vector.multi_reduction <add>, %57, %cst_42 [2] : vector<8x5x5xf32> to vector<8x5xf32>
    %59 = vector.shape_cast %58 : vector<8x5xf32> to vector<8x5x1xf32>
    %60 = tpu.reciprocal %59 {approx = true} : vector<8x5x1xf32> -> vector<8x5x1xf32>
    %61 = vector.broadcast %60 : vector<8x5x1xf32> to vector<8x5x5xf32>
    %62 = arith.mulf %57, %61 : vector<8x5x5xf32>
    %63 = arith.truncf %62 : vector<8x5x5xf32> to vector<8x5x5xbf16>
    "tpu.trace_start"() <{level = 10 : i32, message = "bef,bfc->bec"}> : () -> ()
    %cst_43 = arith.constant dense<0.000000e+00> : vector<8x5x4xf32>
    %64 = tpu.matmul %63, %2, %cst_43 {dimension_numbers = #tpu.dot_dimension_numbers<[2], [1], [1], [2], [0, 0, 0, 1, 1, 2], [0], [0]>} : vector<8x5x5xbf16>, vector<8x5x4xbf16>, vector<8x5x4xf32> -> vector<8x5x4xf32>
    "tpu.trace_stop"() : () -> ()
    %65 = arith.addf %34, %64 : vector<8x5x4xf32>
    "tpu.trace_start"() <{level = 10 : i32, message = "bef,bfc->bec"}> : () -> ()
    %cst_44 = arith.constant dense<0.000000e+00> : vector<8x5x4xf32>
    %66 = tpu.matmul %63, %3, %cst_44 {dimension_numbers = #tpu.dot_dimension_numbers<[2], [1], [1], [2], [0, 0, 0, 1, 1, 2], [0], [0]>} : vector<8x5x5xbf16>, vector<8x5x4xbf16>, vector<8x5x4xf32> -> vector<8x5x4xf32>
    "tpu.trace_stop"() : () -> ()
    %67 = arith.addf %36, %66 : vector<8x5x4xf32>
    %c0_45 = arith.constant 0 : index
    %c0_46 = arith.constant 0 : index
    %c0_47 = arith.constant 0 : index
    %68 = vector.load %arg7[%c0_45, %c0_46, %c0_47] : memref<8x5x4xf32, #tpu.memory_space<vmem>>, vector<8x5x4xf32>
    tpu.vector_store %arg7[%c0_45, %c0_46, %c0_47], %65 {strides = array<i32>} : memref<8x5x4xf32, #tpu.memory_space<vmem>>, vector<8x5x4xf32>,
    %c0_48 = arith.constant 0 : index
    %c0_49 = arith.constant 0 : index
    %c0_50 = arith.constant 0 : index
    %69 = vector.load %arg8[%c0_48, %c0_49, %c0_50] : memref<8x5x4xf32, #tpu.memory_space<vmem>>, vector<8x5x4xf32>
    tpu.vector_store %arg8[%c0_48, %c0_49, %c0_50], %67 {strides = array<i32>} : memref<8x5x4xf32, #tpu.memory_space<vmem>>, vector<8x5x4xf32>,
    return
  }
  func.func @transform_0(%arg0: i32) -> (i32, i32, i32, i32) {
    %c0_i32 = arith.constant 0 : i32
    %c0_i32_0 = arith.constant 0 : i32
    %c0_i32_1 = arith.constant 0 : i32
    %c0_i32_2 = arith.constant 0 : i32
    return %c0_i32, %arg0, %c0_i32_0, %c0_i32_1 : i32, i32, i32, i32
  }
  func.func @transform_1(%arg0: i32) -> (i32, i32, i32, i32) {
    %c0_i32 = arith.constant 0 : i32
    %c0_i32_0 = arith.constant 0 : i32
    %c0_i32_1 = arith.constant 0 : i32
    %c0_i32_2 = arith.constant 0 : i32
    return %c0_i32, %arg0, %c0_i32_0, %c0_i32_1 : i32, i32, i32, i32
  }
  func.func @transform_2(%arg0: i32) -> (i32, i32, i32) {
    %c0_i32 = arith.constant 0 : i32
    %c0_i32_0 = arith.constant 0 : i32
    %c0_i32_1 = arith.constant 0 : i32
    return %arg0, %c0_i32, %c0_i32_0 : i32, i32, i32
  }
  func.func @transform_3(%arg0: i32) -> (i32, i32, i32) {
    %c0_i32 = arith.constant 0 : i32
    %c0_i32_0 = arith.constant 0 : i32
    %c0_i32_1 = arith.constant 0 : i32
    return %arg0, %c0_i32, %c0_i32_0 : i32, i32, i32
  }
  func.func @transform_4(%arg0: i32) -> (i32, i32, i32) {
    %c0_i32 = arith.constant 0 : i32
    %c0_i32_0 = arith.constant 0 : i32
    %c0_i32_1 = arith.constant 0 : i32
    return %arg0, %c0_i32, %c0_i32_0 : i32, i32, i32
  }
  func.func @transform_5(%arg0: i32) -> (i32, i32, i32) {
    %c0_i32 = arith.constant 0 : i32
    %c0_i32_0 = arith.constant 0 : i32
    %c0_i32_1 = arith.constant 0 : i32
    return %arg0, %c0_i32, %c0_i32_0 : i32, i32, i32
  }
  func.func @transform_6(%arg0: i32) -> (i32, i32, i32) {
    %c0_i32 = arith.constant 0 : i32
    %c0_i32_0 = arith.constant 0 : i32
    %c0_i32_1 = arith.constant 0 : i32
    return %arg0, %c0_i32, %c0_i32_0 : i32, i32, i32
  }
  func.func @transform_7(%arg0: i32) -> (i32, i32, i32) {
    %c0_i32 = arith.constant 0 : i32
    %c0_i32_0 = arith.constant 0 : i32
    %c0_i32_1 = arith.constant 0 : i32
    return %arg0, %c0_i32, %c0_i32_0 : i32, i32, i32
  }
}

module attributes {stable_mosaic.version = 11 : i64} {
  func.func @kern(%arg0: i32, %arg1: memref<4x40xbf16, #tpu.memory_space<vmem>>, %arg2: memref<4x4xbf16, #tpu.memory_space<vmem>>, %arg3: memref<4x1xf32, #tpu.memory_space<vmem>>, %arg4: memref<4x4xbf16, #tpu.memory_space<vmem>>, %arg5: memref<4x1xf32, #tpu.memory_space<vmem>>, %arg6: memref<4x40xf32, #tpu.memory_space<vmem>>) attributes {dimension_semantics = [#tpu.dimension_semantics<parallel>], iteration_bounds = array<i64: 1>, scalar_prefetch = 0 : i64, scratch_operands = 0 : i64, tpu.core_type = #tpu.core_type<tc>, window_params = [{transform_indices = @transform_0, window_bounds = array<i64: 4, 40>}, {pipeline_mode = #tpu.pipeline_mode<synchronous>, transform_indices = @transform_1, window_bounds = array<i64: 4, 4>}, {pipeline_mode = #tpu.pipeline_mode<synchronous>, transform_indices = @transform_2, window_bounds = array<i64: 4, 1>}, {pipeline_mode = #tpu.pipeline_mode<synchronous>, transform_indices = @transform_3, window_bounds = array<i64: 4, 4>}, {pipeline_mode = #tpu.pipeline_mode<synchronous>, transform_indices = @transform_4, window_bounds = array<i64: 4, 1>}, {transform_indices = @transform_5, window_bounds = array<i64: 4, 40>}]} {
    %c0 = arith.constant 0 : index
    %c0_0 = arith.constant 0 : index
    %0 = vector.load %arg2[%c0, %c0_0] : memref<4x4xbf16, #tpu.memory_space<vmem>>, vector<4x4xbf16>
    %c0_1 = arith.constant 0 : index
    %c0_2 = arith.constant 0 : index
    %1 = vector.load %arg1[%c0_1, %c0_2] : memref<4x40xbf16, #tpu.memory_space<vmem>>, vector<4x40xbf16>
    %cst = arith.constant dense<0.000000e+00> : vector<4x40xf32>
    %2 = tpu.matmul %0, %1, %cst {dimension_numbers = #tpu.dot_dimension_numbers<[1], [0], [0], [1], [0, 0, 1, 1], [], []>} : vector<4x4xbf16>, vector<4x40xbf16>, vector<4x40xf32> -> vector<4x40xf32>
    %c0_3 = arith.constant 0 : index
    %c0_4 = arith.constant 0 : index
    %3 = vector.load %arg3[%c0_3, %c0_4] : memref<4x1xf32, #tpu.memory_space<vmem>>, vector<4x1xf32>
    %4 = vector.broadcast %3 : vector<4x1xf32> to vector<4x40xf32>
    %5 = arith.addf %2, %4 : vector<4x40xf32>
    %cst_5 = arith.constant 0.000000e+00 : f32
    %6 = vector.broadcast %cst_5 : f32 to vector<4x40xf32>
    %7 = arith.maximumf %5, %6 : vector<4x40xf32>
    %c0_6 = arith.constant 0 : index
    %c0_7 = arith.constant 0 : index
    %8 = vector.load %arg4[%c0_6, %c0_7] : memref<4x4xbf16, #tpu.memory_space<vmem>>, vector<4x4xbf16>
    %9 = arith.truncf %7 : vector<4x40xf32> to vector<4x40xbf16>
    %cst_8 = arith.constant dense<0.000000e+00> : vector<4x40xf32>
    %10 = tpu.matmul %8, %9, %cst_8 {dimension_numbers = #tpu.dot_dimension_numbers<[1], [0], [0], [1], [0, 0, 1, 1], [], []>} : vector<4x4xbf16>, vector<4x40xbf16>, vector<4x40xf32> -> vector<4x40xf32>
    %c0_9 = arith.constant 0 : index
    %c0_10 = arith.constant 0 : index
    %11 = vector.load %arg5[%c0_9, %c0_10] : memref<4x1xf32, #tpu.memory_space<vmem>>, vector<4x1xf32>
    %12 = vector.broadcast %11 : vector<4x1xf32> to vector<4x40xf32>
    %13 = arith.addf %10, %12 : vector<4x40xf32>
    %c0_11 = arith.constant 0 : index
    %c0_12 = arith.constant 0 : index
    %14 = vector.load %arg6[%c0_11, %c0_12] : memref<4x40xf32, #tpu.memory_space<vmem>>, vector<4x40xf32>
    tpu.vector_store %arg6[%c0_11, %c0_12], %13 {strides = array<i32>} : memref<4x40xf32, #tpu.memory_space<vmem>>, vector<4x40xf32>,
    return
  }
  func.func @transform_0(%arg0: i32) -> (i32, i32) {
    %c0_i32 = arith.constant 0 : i32
    %c0_i32_0 = arith.constant 0 : i32
    return %c0_i32, %arg0 : i32, i32
  }
  func.func @transform_1(%arg0: i32) -> (i32, i32) {
    %c0_i32 = arith.constant 0 : i32
    %c0_i32_0 = arith.constant 0 : i32
    %c0_i32_1 = arith.constant 0 : i32
    return %c0_i32, %c0_i32_0 : i32, i32
  }
  func.func @transform_2(%arg0: i32) -> (i32, i32) {
    %c0_i32 = arith.constant 0 : i32
    %c0_i32_0 = arith.constant 0 : i32
    %c0_i32_1 = arith.constant 0 : i32
    return %c0_i32, %c0_i32_0 : i32, i32
  }
  func.func @transform_3(%arg0: i32) -> (i32, i32) {
    %c0_i32 = arith.constant 0 : i32
    %c0_i32_0 = arith.constant 0 : i32
    %c0_i32_1 = arith.constant 0 : i32
    return %c0_i32, %c0_i32_0 : i32, i32
  }
  func.func @transform_4(%arg0: i32) -> (i32, i32) {
    %c0_i32 = arith.constant 0 : i32
    %c0_i32_0 = arith.constant 0 : i32
    %c0_i32_1 = arith.constant 0 : i32
    return %c0_i32, %c0_i32_0 : i32, i32
  }
  func.func @transform_5(%arg0: i32) -> (i32, i32) {
    %c0_i32 = arith.constant 0 : i32
    %c0_i32_0 = arith.constant 0 : i32
    return %c0_i32, %arg0 : i32, i32
  }
}

module attributes {stable_mosaic.version = 11 : i64} {
  func.func @kern(%arg0: i32, %arg1: memref<4x64xbf16, #tpu.memory_space<vmem>>, %arg2: memref<4x64xbf16, #tpu.memory_space<vmem>>, %arg3: memref<4x4xbf16, #tpu.memory_space<vmem>>, %arg4: memref<4x4xbf16, #tpu.memory_space<vmem>>, %arg5: memref<4x1xf32, #tpu.memory_space<vmem>>, %arg6: memref<4x64xf32, #tpu.memory_space<vmem>>) attributes {dimension_semantics = [#tpu.dimension_semantics<parallel>], iteration_bounds = array<i64: 1>, scalar_prefetch = 0 : i64, scratch_operands = 0 : i64, tpu.core_type = #tpu.core_type<tc>, window_params = [{transform_indices = @transform_0, window_bounds = array<i64: 4, 64>}, {transform_indices = @transform_1, window_bounds = array<i64: 4, 64>}, {pipeline_mode = #tpu.pipeline_mode<synchronous>, transform_indices = @transform_2, window_bounds = array<i64: 4, 4>}, {pipeline_mode = #tpu.pipeline_mode<synchronous>, transform_indices = @transform_3, window_bounds = array<i64: 4, 4>}, {pipeline_mode = #tpu.pipeline_mode<synchronous>, transform_indices = @transform_4, window_bounds = array<i64: 4, 1>}, {transform_indices = @transform_5, window_bounds = array<i64: 4, 64>}]} {
    %c0 = arith.constant 0 : index
    %c0_0 = arith.constant 0 : index
    %0 = vector.load %arg3[%c0, %c0_0] : memref<4x4xbf16, #tpu.memory_space<vmem>>, vector<4x4xbf16>
    %c0_1 = arith.constant 0 : index
    %c0_2 = arith.constant 0 : index
    %1 = vector.load %arg1[%c0_1, %c0_2] : memref<4x64xbf16, #tpu.memory_space<vmem>>, vector<4x64xbf16>
    %cst = arith.constant dense<0.000000e+00> : vector<4x64xf32>
    %2 = tpu.matmul %0, %1, %cst {dimension_numbers = #tpu.dot_dimension_numbers<[1], [0], [0], [1], [0, 0, 1, 1], [], []>} : vector<4x4xbf16>, vector<4x64xbf16>, vector<4x64xf32> -> vector<4x64xf32>
    %c0_3 = arith.constant 0 : index
    %c0_4 = arith.constant 0 : index
    %3 = vector.load %arg4[%c0_3, %c0_4] : memref<4x4xbf16, #tpu.memory_space<vmem>>, vector<4x4xbf16>
    %c0_5 = arith.constant 0 : index
    %c0_6 = arith.constant 0 : index
    %4 = vector.load %arg2[%c0_5, %c0_6] : memref<4x64xbf16, #tpu.memory_space<vmem>>, vector<4x64xbf16>
    %cst_7 = arith.constant dense<0.000000e+00> : vector<4x64xf32>
    %5 = tpu.matmul %3, %4, %cst_7 {dimension_numbers = #tpu.dot_dimension_numbers<[1], [0], [0], [1], [0, 0, 1, 1], [], []>} : vector<4x4xbf16>, vector<4x64xbf16>, vector<4x64xf32> -> vector<4x64xf32>
    %6 = arith.addf %2, %5 : vector<4x64xf32>
    %c0_8 = arith.constant 0 : index
    %c0_9 = arith.constant 0 : index
    %7 = vector.load %arg5[%c0_8, %c0_9] : memref<4x1xf32, #tpu.memory_space<vmem>>, vector<4x1xf32>
    %8 = vector.broadcast %7 : vector<4x1xf32> to vector<4x64xf32>
    %9 = arith.addf %6, %8 : vector<4x64xf32>
    %c0_10 = arith.constant 0 : index
    %c0_11 = arith.constant 0 : index
    %10 = vector.load %arg6[%c0_10, %c0_11] : memref<4x64xf32, #tpu.memory_space<vmem>>, vector<4x64xf32>
    tpu.vector_store %arg6[%c0_10, %c0_11], %9 {strides = array<i32>} : memref<4x64xf32, #tpu.memory_space<vmem>>, vector<4x64xf32>,
    return
  }
  func.func @transform_0(%arg0: i32) -> (i32, i32) {
    %c0_i32 = arith.constant 0 : i32
    %c0_i32_0 = arith.constant 0 : i32
    return %c0_i32, %arg0 : i32, i32
  }
  func.func @transform_1(%arg0: i32) -> (i32, i32) {
    %c0_i32 = arith.constant 0 : i32
    %c0_i32_0 = arith.constant 0 : i32
    return %c0_i32, %arg0 : i32, i32
  }
  func.func @transform_2(%arg0: i32) -> (i32, i32) {
    %c0_i32 = arith.constant 0 : i32
    %c0_i32_0 = arith.constant 0 : i32
    %c0_i32_1 = arith.constant 0 : i32
    return %c0_i32, %c0_i32_0 : i32, i32
  }
  func.func @transform_3(%arg0: i32) -> (i32, i32) {
    %c0_i32 = arith.constant 0 : i32
    %c0_i32_0 = arith.constant 0 : i32
    %c0_i32_1 = arith.constant 0 : i32
    return %c0_i32, %c0_i32_0 : i32, i32
  }
  func.func @transform_4(%arg0: i32) -> (i32, i32) {
    %c0_i32 = arith.constant 0 : i32
    %c0_i32_0 = arith.constant 0 : i32
    %c0_i32_1 = arith.constant 0 : i32
    return %c0_i32, %c0_i32_0 : i32, i32
  }
  func.func @transform_5(%arg0: i32) -> (i32, i32) {
    %c0_i32 = arith.constant 0 : i32
    %c0_i32_0 = arith.constant 0 : i32
    return %c0_i32, %arg0 : i32, i32
  }
}

module attributes {stable_mosaic.version = 11 : i64} {
  func.func @kern(%arg0: i32, %arg1: memref<4x64xbf16, #tpu.memory_space<vmem>>, %arg2: memref<4x4xbf16, #tpu.memory_space<vmem>>, %arg3: memref<4x1xf32, #tpu.memory_space<vmem>>, %arg4: memref<4x64xf32, #tpu.memory_space<vmem>>) attributes {dimension_semantics = [#tpu.dimension_semantics<parallel>], iteration_bounds = array<i64: 1>, scalar_prefetch = 0 : i64, scratch_operands = 0 : i64, tpu.core_type = #tpu.core_type<tc>, window_params = [{transform_indices = @transform_0, window_bounds = array<i64: 4, 64>}, {pipeline_mode = #tpu.pipeline_mode<synchronous>, transform_indices = @transform_1, window_bounds = array<i64: 4, 4>}, {pipeline_mode = #tpu.pipeline_mode<synchronous>, transform_indices = @transform_2, window_bounds = array<i64: 4, 1>}, {transform_indices = @transform_3, window_bounds = array<i64: 4, 64>}]} {
    %c0 = arith.constant 0 : index
    %c0_0 = arith.constant 0 : index
    %0 = vector.load %arg2[%c0, %c0_0] : memref<4x4xbf16, #tpu.memory_space<vmem>>, vector<4x4xbf16>
    %c0_1 = arith.constant 0 : index
    %c0_2 = arith.constant 0 : index
    %1 = vector.load %arg1[%c0_1, %c0_2] : memref<4x64xbf16, #tpu.memory_space<vmem>>, vector<4x64xbf16>
    %cst = arith.constant dense<0.000000e+00> : vector<4x64xf32>
    %2 = tpu.matmul %0, %1, %cst {dimension_numbers = #tpu.dot_dimension_numbers<[1], [0], [0], [1], [0, 0, 1, 1], [], []>} : vector<4x4xbf16>, vector<4x64xbf16>, vector<4x64xf32> -> vector<4x64xf32>
    %c0_3 = arith.constant 0 : index
    %c0_4 = arith.constant 0 : index
    %3 = vector.load %arg3[%c0_3, %c0_4] : memref<4x1xf32, #tpu.memory_space<vmem>>, vector<4x1xf32>
    %4 = vector.broadcast %3 : vector<4x1xf32> to vector<4x64xf32>
    %5 = arith.addf %2, %4 : vector<4x64xf32>
    %c0_5 = arith.constant 0 : index
    %c0_6 = arith.constant 0 : index
    %6 = vector.load %arg4[%c0_5, %c0_6] : memref<4x64xf32, #tpu.memory_space<vmem>>, vector<4x64xf32>
    tpu.vector_store %arg4[%c0_5, %c0_6], %5 {strides = array<i32>} : memref<4x64xf32, #tpu.memory_space<vmem>>, vector<4x64xf32>,
    return
  }
  func.func @transform_0(%arg0: i32) -> (i32, i32) {
    %c0_i32 = arith.constant 0 : i32
    %c0_i32_0 = arith.constant 0 : i32
    return %c0_i32, %arg0 : i32, i32
  }
  func.func @transform_1(%arg0: i32) -> (i32, i32) {
    %c0_i32 = arith.constant 0 : i32
    %c0_i32_0 = arith.constant 0 : i32
    %c0_i32_1 = arith.constant 0 : i32
    return %c0_i32, %c0_i32_0 : i32, i32
  }
  func.func @transform_2(%arg0: i32) -> (i32, i32) {
    %c0_i32 = arith.constant 0 : i32
    %c0_i32_0 = arith.constant 0 : i32
    %c0_i32_1 = arith.constant 0 : i32
    return %c0_i32, %c0_i32_0 : i32, i32
  }
  func.func @transform_3(%arg0: i32) -> (i32, i32) {
    %c0_i32 = arith.constant 0 : i32
    %c0_i32_0 = arith.constant 0 : i32
    return %c0_i32, %arg0 : i32, i32
  }
}

module attributes {stable_mosaic.version = 11 : i64} {
  func.func @kern(%arg0: i32, %arg1: memref<4x64xbf16, #tpu.memory_space<vmem>>, %arg2: memref<4x64xbf16, #tpu.memory_space<vmem>>, %arg3: memref<4x64xf32, #tpu.memory_space<vmem>>, %arg4: memref<4x64xf32, #tpu.memory_space<vmem>>, %arg5: memref<4x64xf32, #tpu.memory_space<vmem>>, %arg6: memref<4x4xbf16, #tpu.memory_space<vmem>>, %arg7: memref<4x1xf32, #tpu.memory_space<vmem>>, %arg8: memref<4x4xbf16, #tpu.memory_space<vmem>>, %arg9: memref<4x1xf32, #tpu.memory_space<vmem>>, %arg10: memref<4x4xbf16, #tpu.memory_space<vmem>>, %arg11: memref<4x1xf32, #tpu.memory_space<vmem>>, %arg12: memref<4x4xbf16, #tpu.memory_space<vmem>>, %arg13: memref<4x1xf32, #tpu.memory_space<vmem>>, %arg14: memref<4x4xbf16, #tpu.memory_space<vmem>>, %arg15: memref<4x4xbf16, #tpu.memory_space<vmem>>, %arg16: memref<4x1xf32, #tpu.memory_space<vmem>>, %arg17: memref<8x4xbf16, #tpu.memory_space<vmem>>, %arg18: memref<8x1xf32, #tpu.memory_space<vmem>>, %arg19: memref<8x4xbf16, #tpu.memory_space<vmem>>, %arg20: memref<8x1xf32, #tpu.memory_space<vmem>>, %arg21: memref<4x64xf32, #tpu.memory_space<vmem>>, %arg22: memref<4x64xf32, #tpu.memory_space<vmem>>) attributes {dimension_semantics = [#tpu.dimension_semantics<parallel>], iteration_bounds = array<i64: 1>, scalar_prefetch = 0 : i64, scratch_operands = 0 : i64, tpu.core_type = #tpu.core_type<tc>, window_params = [{transform_indices = @transform_0, window_bounds = array<i64: 4, 64>}, {transform_indices = @transform_1, window_bounds = array<i64: 4, 64>}, {transform_indices = @transform_2, window_bounds = array<i64: 4, 64>}, {transform_indices = @transform_3, window_bounds = array<i64: 4, 64>}, {transform_indices = @transform_4, window_bounds = array<i64: 4, 64>}, {pipeline_mode = #tpu.pipeline_mode<synchronous>, transform_indices = @transform_5, window_bounds = array<i64: 4, 4>}, {pipeline_mode = #tpu.pipeline_mode<synchronous>, transform_indices = @transform_6, window_bounds = array<i64: 4, 1>}, {pipeline_mode = #tpu.pipeline_mode<synchronous>, transform_indices = @transform_7, window_bounds = array<i64: 4, 4>}, {pipeline_mode = #tpu.pipeline_mode<synchronous>, transform_indices = @transform_8, window_bounds = array<i64: 4, 1>}, {pipeline_mode = #tpu.pipeline_mode<synchronous>, transform_indices = @transform_9, window_bounds = array<i64: 4, 4>}, {pipeline_mode = #tpu.pipeline_mode<synchronous>, transform_indices = @transform_10, window_bounds = array<i64: 4, 1>}, {pipeline_mode = #tpu.pipeline_mode<synchronous>, transform_indices = @transform_11, window_bounds = array<i64: 4, 4>}, {pipeline_mode = #tpu.pipeline_mode<synchronous>, transform_indices = @transform_12, window_bounds = array<i64: 4, 1>}, {pipeline_mode = #tpu.pipeline_mode<synchronous>, transform_indices = @transform_13, window_bounds = array<i64: 4, 4>}, {pipeline_mode = #tpu.pipeline_mode<synchronous>, transform_indices = @transform_14, window_bounds = array<i64: 4, 4>}, {pipeline_mode = #tpu.pipeline_mode<synchronous>, transform_indices = @transform_15, window_bounds = array<i64: 4, 1>}, {pipeline_mode = #tpu.pipeline_mode<synchronous>, transform_indices = @transform_16, window_bounds = array<i64: 8, 4>}, {pipeline_mode = #tpu.pipeline_mode<synchronous>, transform_indices = @transform_17, window_bounds = array<i64: 8, 1>}, {pipeline_mode = #tpu.pipeline_mode<synchronous>, transform_indices = @transform_18, window_bounds = array<i64: 8, 4>}, {pipeline_mode = #tpu.pipeline_mode<synchronous>, transform_indices = @transform_19, window_bounds = array<i64: 8, 1>}, {transform_indices = @transform_20, window_bounds = array<i64: 4, 64>}, {transform_indices = @transform_21, window_bounds = array<i64: 4, 64>}]} {
    %c0 = arith.constant 0 : index
    %c0_0 = arith.constant 0 : index
    %0 = vector.load %arg6[%c0, %c0_0] : memref<4x4xbf16, #tpu.memory_space<vmem>>, vector<4x4xbf16>
    %c0_1 = arith.constant 0 : index
    %c0_2 = arith.constant 0 : index
    %1 = vector.load %arg1[%c0_1, %c0_2] : memref<4x64xbf16, #tpu.memory_space<vmem>>, vector<4x64xbf16>
    %cst = arith.constant dense<0.000000e+00> : vector<4x64xf32>
    %2 = tpu.matmul %0, %1, %cst {dimension_numbers = #tpu.dot_dimension_numbers<[1], [0], [0], [1], [0, 0, 1, 1], [], []>} : vector<4x4xbf16>, vector<4x64xbf16>, vector<4x64xf32> -> vector<4x64xf32>
    %c0_3 = arith.constant 0 : index
    %c0_4 = arith.constant 0 : index
    %3 = vector.load %arg7[%c0_3, %c0_4] : memref<4x1xf32, #tpu.memory_space<vmem>>, vector<4x1xf32>
    %4 = vector.broadcast %3 : vector<4x1xf32> to vector<4x64xf32>
    %5 = arith.addf %2, %4 : vector<4x64xf32>
    %cst_5 = arith.constant 0.000000e+00 : f32
    %6 = vector.broadcast %cst_5 : f32 to vector<4x64xf32>
    %7 = arith.maximumf %5, %6 : vector<4x64xf32>
    %c0_6 = arith.constant 0 : index
    %c0_7 = arith.constant 0 : index
    %8 = vector.load %arg8[%c0_6, %c0_7] : memref<4x4xbf16, #tpu.memory_space<vmem>>, vector<4x4xbf16>
    %9 = arith.truncf %7 : vector<4x64xf32> to vector<4x64xbf16>
    %cst_8 = arith.constant dense<0.000000e+00> : vector<4x64xf32>
    %10 = tpu.matmul %8, %9, %cst_8 {dimension_numbers = #tpu.dot_dimension_numbers<[1], [0], [0], [1], [0, 0, 1, 1], [], []>} : vector<4x4xbf16>, vector<4x64xbf16>, vector<4x64xf32> -> vector<4x64xf32>
    %c0_9 = arith.constant 0 : index
    %c0_10 = arith.constant 0 : index
    %11 = vector.load %arg9[%c0_9, %c0_10] : memref<4x1xf32, #tpu.memory_space<vmem>>, vector<4x1xf32>
    %12 = vector.broadcast %11 : vector<4x1xf32> to vector<4x64xf32>
    %13 = arith.addf %10, %12 : vector<4x64xf32>
    %c0_11 = arith.constant 0 : index
    %c0_12 = arith.constant 0 : index
    %14 = vector.load %arg10[%c0_11, %c0_12] : memref<4x4xbf16, #tpu.memory_space<vmem>>, vector<4x4xbf16>
    %c0_13 = arith.constant 0 : index
    %c0_14 = arith.constant 0 : index
    %15 = vector.load %arg2[%c0_13, %c0_14] : memref<4x64xbf16, #tpu.memory_space<vmem>>, vector<4x64xbf16>
    %cst_15 = arith.constant dense<0.000000e+00> : vector<4x64xf32>
    %16 = tpu.matmul %14, %15, %cst_15 {dimension_numbers = #tpu.dot_dimension_numbers<[1], [0], [0], [1], [0, 0, 1, 1], [], []>} : vector<4x4xbf16>, vector<4x64xbf16>, vector<4x64xf32> -> vector<4x64xf32>
    %c0_16 = arith.constant 0 : index
    %c0_17 = arith.constant 0 : index
    %17 = vector.load %arg11[%c0_16, %c0_17] : memref<4x1xf32, #tpu.memory_space<vmem>>, vector<4x1xf32>
    %18 = vector.broadcast %17 : vector<4x1xf32> to vector<4x64xf32>
    %19 = arith.addf %16, %18 : vector<4x64xf32>
    %cst_18 = arith.constant 0.000000e+00 : f32
    %20 = vector.broadcast %cst_18 : f32 to vector<4x64xf32>
    %21 = arith.maximumf %19, %20 : vector<4x64xf32>
    %c0_19 = arith.constant 0 : index
    %c0_20 = arith.constant 0 : index
    %22 = vector.load %arg12[%c0_19, %c0_20] : memref<4x4xbf16, #tpu.memory_space<vmem>>, vector<4x4xbf16>
    %23 = arith.truncf %21 : vector<4x64xf32> to vector<4x64xbf16>
    %cst_21 = arith.constant dense<0.000000e+00> : vector<4x64xf32>
    %24 = tpu.matmul %22, %23, %cst_21 {dimension_numbers = #tpu.dot_dimension_numbers<[1], [0], [0], [1], [0, 0, 1, 1], [], []>} : vector<4x4xbf16>, vector<4x64xbf16>, vector<4x64xf32> -> vector<4x64xf32>
    %c0_22 = arith.constant 0 : index
    %c0_23 = arith.constant 0 : index
    %25 = vector.load %arg13[%c0_22, %c0_23] : memref<4x1xf32, #tpu.memory_space<vmem>>, vector<4x1xf32>
    %26 = vector.broadcast %25 : vector<4x1xf32> to vector<4x64xf32>
    %27 = arith.addf %24, %26 : vector<4x64xf32>
    %c0_24 = arith.constant 0 : index
    %c0_25 = arith.constant 0 : index
    %28 = vector.load %arg3[%c0_24, %c0_25] : memref<4x64xf32, #tpu.memory_space<vmem>>, vector<4x64xf32>
    %29 = arith.addf %27, %28 : vector<4x64xf32>
    %c0_26 = arith.constant 0 : index
    %c0_27 = arith.constant 0 : index
    %30 = vector.load %arg14[%c0_26, %c0_27] : memref<4x4xbf16, #tpu.memory_space<vmem>>, vector<4x4xbf16>
    %31 = arith.truncf %13 : vector<4x64xf32> to vector<4x64xbf16>
    %cst_28 = arith.constant dense<0.000000e+00> : vector<4x64xf32>
    %32 = tpu.matmul %30, %31, %cst_28 {dimension_numbers = #tpu.dot_dimension_numbers<[1], [0], [0], [1], [0, 0, 1, 1], [], []>} : vector<4x4xbf16>, vector<4x64xbf16>, vector<4x64xf32> -> vector<4x64xf32>
    %c0_29 = arith.constant 0 : index
    %c0_30 = arith.constant 0 : index
    %33 = vector.load %arg15[%c0_29, %c0_30] : memref<4x4xbf16, #tpu.memory_space<vmem>>, vector<4x4xbf16>
    %34 = arith.truncf %29 : vector<4x64xf32> to vector<4x64xbf16>
    %cst_31 = arith.constant dense<0.000000e+00> : vector<4x64xf32>
    %35 = tpu.matmul %33, %34, %cst_31 {dimension_numbers = #tpu.dot_dimension_numbers<[1], [0], [0], [1], [0, 0, 1, 1], [], []>} : vector<4x4xbf16>, vector<4x64xbf16>, vector<4x64xf32> -> vector<4x64xf32>
    %36 = arith.addf %32, %35 : vector<4x64xf32>
    %c0_32 = arith.constant 0 : index
    %c0_33 = arith.constant 0 : index
    %37 = vector.load %arg16[%c0_32, %c0_33] : memref<4x1xf32, #tpu.memory_space<vmem>>, vector<4x1xf32>
    %38 = vector.broadcast %37 : vector<4x1xf32> to vector<4x64xf32>
    %39 = arith.addf %36, %38 : vector<4x64xf32>
    %c0_34 = arith.constant 0 : index
    %c0_35 = arith.constant 0 : index
    %40 = vector.load %arg4[%c0_34, %c0_35] : memref<4x64xf32, #tpu.memory_space<vmem>>, vector<4x64xf32>
    %41 = arith.addf %39, %40 : vector<4x64xf32>
    %c0_36 = arith.constant 0 : index
    %c0_37 = arith.constant 0 : index
    %42 = vector.load %arg17[%c0_36, %c0_37] : memref<8x4xbf16, #tpu.memory_space<vmem>>, vector<8x4xbf16>
    %43 = arith.truncf %41 : vector<4x64xf32> to vector<4x64xbf16>
    %cst_38 = arith.constant dense<0.000000e+00> : vector<8x64xf32>
    %44 = tpu.matmul %42, %43, %cst_38 {dimension_numbers = #tpu.dot_dimension_numbers<[1], [0], [0], [1], [0, 0, 1, 1], [], []>} : vector<8x4xbf16>, vector<4x64xbf16>, vector<8x64xf32> -> vector<8x64xf32>
    %c0_39 = arith.constant 0 : index
    %c0_40 = arith.constant 0 : index
    %45 = vector.load %arg18[%c0_39, %c0_40] : memref<8x1xf32, #tpu.memory_space<vmem>>, vector<8x1xf32>
    %46 = vector.broadcast %45 : vector<8x1xf32> to vector<8x64xf32>
    %47 = arith.addf %44, %46 : vector<8x64xf32>
    %48 = vector.extract_strided_slice %47 {offsets = [0, 0], sizes = [4, 64], strides = [1, 1]} : vector<8x64xf32> to vector<4x64xf32>
    %49 = arith.negf %48 : vector<4x64xf32>
    %50 = math.exp %49 : vector<4x64xf32>
    %cst_41 = arith.constant 1.000000e+00 : f32
    %51 = vector.broadcast %cst_41 : f32 to vector<4x64xf32>
    %52 = arith.addf %51, %50 : vector<4x64xf32>
    %53 = arith.divf %51, %52 : vector<4x64xf32>
    %54 = vector.extract_strided_slice %47 {offsets = [4, 0], sizes = [4, 64], strides = [1, 1]} : vector<8x64xf32> to vector<4x64xf32>
    %55 = math.tanh %54 : vector<4x64xf32>
    %56 = arith.mulf %53, %55 : vector<4x64xf32>
    %c0_42 = arith.constant 0 : index
    %c0_43 = arith.constant 0 : index
    %57 = vector.load %arg19[%c0_42, %c0_43] : memref<8x4xbf16, #tpu.memory_space<vmem>>, vector<8x4xbf16>
    %58 = arith.truncf %56 : vector<4x64xf32> to vector<4x64xbf16>
    %cst_44 = arith.constant dense<0.000000e+00> : vector<8x64xf32>
    %59 = tpu.matmul %57, %58, %cst_44 {dimension_numbers = #tpu.dot_dimension_numbers<[1], [0], [0], [1], [0, 0, 1, 1], [], []>} : vector<8x4xbf16>, vector<4x64xbf16>, vector<8x64xf32> -> vector<8x64xf32>
    %c0_45 = arith.constant 0 : index
    %c0_46 = arith.constant 0 : index
    %60 = vector.load %arg20[%c0_45, %c0_46] : memref<8x1xf32, #tpu.memory_space<vmem>>, vector<8x1xf32>
    %61 = vector.broadcast %60 : vector<8x1xf32> to vector<8x64xf32>
    %62 = arith.addf %59, %61 : vector<8x64xf32>
    %c0_47 = arith.constant 0 : index
    %c0_48 = arith.constant 0 : index
    %63 = vector.load %arg5[%c0_47, %c0_48] : memref<4x64xf32, #tpu.memory_space<vmem>>, vector<4x64xf32>
    %64 = vector.extract_strided_slice %62 {offsets = [0, 0], sizes = [4, 64], strides = [1, 1]} : vector<8x64xf32> to vector<4x64xf32>
    %65 = arith.addf %63, %64 : vector<4x64xf32>
    %cst_49 = arith.constant 0.707106769 : f32
    %66 = vector.broadcast %cst_49 : f32 to vector<4x64xf32>
    %67 = arith.mulf %65, %66 : vector<4x64xf32>
    %c0_50 = arith.constant 0 : index
    %c0_51 = arith.constant 0 : index
    %68 = vector.load %arg21[%c0_50, %c0_51] : memref<4x64xf32, #tpu.memory_space<vmem>>, vector<4x64xf32>
    tpu.vector_store %arg21[%c0_50, %c0_51], %67 {strides = array<i32>} : memref<4x64xf32, #tpu.memory_space<vmem>>, vector<4x64xf32>,
    %69 = vector.extract_strided_slice %62 {offsets = [4, 0], sizes = [4, 64], strides = [1, 1]} : vector<8x64xf32> to vector<4x64xf32>
    %c0_52 = arith.constant 0 : index
    %c0_53 = arith.constant 0 : index
    %70 = vector.load %arg22[%c0_52, %c0_53] : memref<4x64xf32, #tpu.memory_space<vmem>>, vector<4x64xf32>
    tpu.vector_store %arg22[%c0_52, %c0_53], %69 {strides = array<i32>} : memref<4x64xf32, #tpu.memory_space<vmem>>, vector<4x64xf32>,
    return
  }
  func.func @transform_0(%arg0: i32) -> (i32, i32) {
    %c0_i32 = arith.constant 0 : i32
    %c0_i32_0 = arith.constant 0 : i32
    return %c0_i32, %arg0 : i32, i32
  }
  func.func @transform_1(%arg0: i32) -> (i32, i32) {
    %c0_i32 = arith.constant 0 : i32
    %c0_i32_0 = arith.constant 0 : i32
    return %c0_i32, %arg0 : i32, i32
  }
  func.func @transform_2(%arg0: i32) -> (i32, i32) {
    %c0_i32 = arith.constant 0 : i32
    %c0_i32_0 = arith.constant 0 : i32
    return %c0_i32, %arg0 : i32, i32
  }
  func.func @transform_3(%arg0: i32) -> (i32, i32) {
    %c0_i32 = arith.constant 0 : i32
    %c0_i32_0 = arith.constant 0 : i32
    return %c0_i32, %arg0 : i32, i32
  }
  func.func @transform_4(%arg0: i32) -> (i32, i32) {
    %c0_i32 = arith.constant 0 : i32
    %c0_i32_0 = arith.constant 0 : i32
    return %c0_i32, %arg0 : i32, i32
  }
  func.func @transform_5(%arg0: i32) -> (i32, i32) {
    %c0_i32 = arith.constant 0 : i32
    %c0_i32_0 = arith.constant 0 : i32
    %c0_i32_1 = arith.constant 0 : i32
    return %c0_i32, %c0_i32_0 : i32, i32
  }
  func.func @transform_6(%arg0: i32) -> (i32, i32) {
    %c0_i32 = arith.constant 0 : i32
    %c0_i32_0 = arith.constant 0 : i32
    %c0_i32_1 = arith.constant 0 : i32
    return %c0_i32, %c0_i32_0 : i32, i32
  }
  func.func @transform_7(%arg0: i32) -> (i32, i32) {
    %c0_i32 = arith.constant 0 : i32
    %c0_i32_0 = arith.constant 0 : i32
    %c0_i32_1 = arith.constant 0 : i32
    return %c0_i32, %c0_i32_0 : i32, i32
  }
  func.func @transform_8(%arg0: i32) -> (i32, i32) {
    %c0_i32 = arith.constant 0 : i32
    %c0_i32_0 = arith.constant 0 : i32
    %c0_i32_1 = arith.constant 0 : i32
    return %c0_i32, %c0_i32_0 : i32, i32
  }
  func.func @transform_9(%arg0: i32) -> (i32, i32) {
    %c0_i32 = arith.constant 0 : i32
    %c0_i32_0 = arith.constant 0 : i32
    %c0_i32_1 = arith.constant 0 : i32
    return %c0_i32, %c0_i32_0 : i32, i32
  }
  func.func @transform_10(%arg0: i32) -> (i32, i32) {
    %c0_i32 = arith.constant 0 : i32
    %c0_i32_0 = arith.constant 0 : i32
    %c0_i32_1 = arith.constant 0 : i32
    return %c0_i32, %c0_i32_0 : i32, i32
  }
  func.func @transform_11(%arg0: i32) -> (i32, i32) {
    %c0_i32 = arith.constant 0 : i32
    %c0_i32_0 = arith.constant 0 : i32
    %c0_i32_1 = arith.constant 0 : i32
    return %c0_i32, %c0_i32_0 : i32, i32
  }
  func.func @transform_12(%arg0: i32) -> (i32, i32) {
    %c0_i32 = arith.constant 0 : i32
    %c0_i32_0 = arith.constant 0 : i32
    %c0_i32_1 = arith.constant 0 : i32
    return %c0_i32, %c0_i32_0 : i32, i32
  }
  func.func @transform_13(%arg0: i32) -> (i32, i32) {
    %c0_i32 = arith.constant 0 : i32
    %c0_i32_0 = arith.constant 0 : i32
    %c0_i32_1 = arith.constant 0 : i32
    return %c0_i32, %c0_i32_0 : i32, i32
  }
  func.func @transform_14(%arg0: i32) -> (i32, i32) {
    %c0_i32 = arith.constant 0 : i32
    %c0_i32_0 = arith.constant 0 : i32
    %c0_i32_1 = arith.constant 0 : i32
    return %c0_i32, %c0_i32_0 : i32, i32
  }
  func.func @transform_15(%arg0: i32) -> (i32, i32) {
    %c0_i32 = arith.constant 0 : i32
    %c0_i32_0 = arith.constant 0 : i32
    %c0_i32_1 = arith.constant 0 : i32
    return %c0_i32, %c0_i32_0 : i32, i32
  }
  func.func @transform_16(%arg0: i32) -> (i32, i32) {
    %c0_i32 = arith.constant 0 : i32
    %c0_i32_0 = arith.constant 0 : i32
    %c0_i32_1 = arith.constant 0 : i32
    return %c0_i32, %c0_i32_0 : i32, i32
  }
  func.func @transform_17(%arg0: i32) -> (i32, i32) {
    %c0_i32 = arith.constant 0 : i32
    %c0_i32_0 = arith.constant 0 : i32
    %c0_i32_1 = arith.constant 0 : i32
    return %c0_i32, %c0_i32_0 : i32, i32
  }
  func.func @transform_18(%arg0: i32) -> (i32, i32) {
    %c0_i32 = arith.constant 0 : i32
    %c0_i32_0 = arith.constant 0 : i32
    %c0_i32_1 = arith.constant 0 : i32
    return %c0_i32, %c0_i32_0 : i32, i32
  }
  func.func @transform_19(%arg0: i32) -> (i32, i32) {
    %c0_i32 = arith.constant 0 : i32
    %c0_i32_0 = arith.constant 0 : i32
    %c0_i32_1 = arith.constant 0 : i32
    return %c0_i32, %c0_i32_0 : i32, i32
  }
  func.func @transform_20(%arg0: i32) -> (i32, i32) {
    %c0_i32 = arith.constant 0 : i32
    %c0_i32_0 = arith.constant 0 : i32
    return %c0_i32, %arg0 : i32, i32
  }
  func.func @transform_21(%arg0: i32) -> (i32, i32) {
    %c0_i32 = arith.constant 0 : i32
    %c0_i32_0 = arith.constant 0 : i32
    return %c0_i32, %arg0 : i32, i32
  }
}

</mosaic_0001>

<bundles_post_ra>
// kernel: residual_block_forward.13
= control target key start
LH: loop header
LB: loop body
LE: loop exit
PB: predicated region body
PF: predicated region fallthrough
CT: control target
= control target key end

     0   :  { %v95_v0 = vmov 0.0   ;;  %vm96_vm0 = vmmov 0   ;;  %v97_v2 = vmov 0   ;;  %vm30_vm1 = vcmask 130048   ;;  %s130_s0 = inlined_call_operand.vmem [shape: bf16[16,2], index: 0, kind: input, shape index: {}]   ;;  %s131_s1 = inlined_call_operand.vmem [shape: bf16[4,16], index: 1, kind: input, shape index: {}]   ;;  %s132_s2 = inlined_call_operand.vmem [shape: f32[4,1], index: 2, kind: input, shape index: {}]   ;;  %s133_s3 = inlined_call_operand.vmem [shape: f32[4,2], index: 3, kind: output, shape index: {}]  }
   0x1   :  { %84 = vmatprep.subr.bf16.mxu0 %v95_v0  ;;  %v94_v1 = vld [vmem:[%s130_s0] sm:$0xff]   ;;  %86 = vmatprep.mubr.msk.bf16.mxu0 %vm96_vm0, %v95_v0  ;;  %vm74_vm2 = vcmask 11264  }
   0x2   :  { %93 = vset.pattern.permute.xlu0 %v97_v2  ;;  %v18_v3 = vld [vmem:[%s132_s2] sm:$0xf]  ;;  %85 = vmatpush3.bf16.msra.mxu0 %v94_v1 }
   0x3   :  { %v15_v4 = vld [vmem:[%s131_s1] sm:$0x3]  ;;  %21 = vperm.xlu0 %93, %v18_v3  }
   0x5   :  { %87 = vmatmul.mubr.msk.bf16.vlgmr.msra.gmra.mxu0 %vm30_vm1, %v15_v4 }
  0x7e   :  { %v22_v5 = vpop.permute.xlu0 %21 }
  0xc5   :  { %v68_v6 = vpop.f32.mrf.mxu0 }
  0xc6   :  { %v69_v7 = vadd.f32 %v68_v6, %v22_v5 }
  0xc7   :  { %v88_v8 = vpop.f32.mrf.mxu0 }
  0xc8   :  { %75 = vst.msk [vmem:[%s133_s3] sm:$0xf] %vm74_vm2, %v69_v7 }
  0xc9   :  { %v71_v9 = vpop.f32.mrf.mxu0 }
  0xcb   :  { %v89_v10 = vpop.f32.mrf.mxu0 }

// kernel: residual_block_forward.14
= control target key start
LH: loop header
LB: loop body
LE: loop exit
PB: predicated region body
PF: predicated region fallthrough
CT: control target
= control target key end

     0   :  { %vm27_vm0 = vcmask 1043456   ;;  %v90_v0 = vmov 0.0   ;;  %vm91_vm1 = vmmov 0   ;;  %v92_v3 = vmov 0   ;;  %s125_s0 = inlined_call_operand.vmem [shape: bf16[8,2], index: 0, kind: input, shape index: {}]   ;;  %s126_s1 = inlined_call_operand.vmem [shape: bf16[4,8], index: 1, kind: input, shape index: {}]   ;;  %s127_s2 = inlined_call_operand.vmem [shape: f32[4,1], index: 2, kind: input, shape index: {}]   ;;  %s128_s3 = inlined_call_operand.vmem [shape: f32[4,2], index: 3, kind: output, shape index: {}]  }
   0x1   :  { %80 = vmatprep.subr.bf16.mxu0 %v90_v0  ;;  %v16_v1 = vld [vmem:[%s125_s0] sm:$0xf]  ;;  %82 = vmatprep.mubr.msk.bf16.mxu0 %vm91_vm1, %v90_v0  ;;  %vm23_vm2 = vcmask 64512   ;;  %vm71_vm3 = vcmask 11264  }
   0x2   :  { %v29_v2 = vsel %vm27_vm0, %v16_v1, 0  ;;  %89 = vset.pattern.permute.xlu0 %v92_v3  ;;  %v17_v4 = vld [vmem:[%s127_s2] sm:$0xf] }
   0x3   :  { %81 = vmatpush3.bf16.msra.mxu0 %v29_v2  ;;  %v15_v5 = vld [vmem:[%s126_s1] sm:$0x3]  ;;  %20 = vperm.xlu0 %89, %v17_v4  }
   0x6   :  { %83 = vmatmul.mubr.msk.bf16.vlgmr.msra.gmra.mxu0 %vm23_vm2, %v15_v5 }
  0x7e   :  { %v21_v6 = vpop.permute.xlu0 %20 }
  0xc6   :  { %v65_v7 = vpop.f32.mrf.mxu0 }
  0xc7   :  { %v66_v8 = vadd.f32 %v65_v7, %v21_v6 }
  0xc8   :  { %v84_v9 = vpop.f32.mrf.mxu0 }
  0xc9   :  { %72 = vst.msk [vmem:[%s128_s3] sm:$0xf] %vm71_vm3, %v66_v8 }
  0xca   :  { %v68_v10 = vpop.f32.mrf.mxu0 }
  0xcc   :  { %v85_v11 = vpop.f32.mrf.mxu0 }

// kernel: residual_block_forward.15
= control target key start
LH: loop header
LB: loop body
LE: loop exit
PB: predicated region body
PF: predicated region fallthrough
CT: control target
= control target key end

     0   :  { %vm39_vm0 = vcmask 1041408   ;;  %v119_v0 = vmov 0.0   ;;  %vm120_vm1 = vmmov 0   ;;  %vm35_vm2 = vcmask 31744   ;;  %s160_s0 = inlined_call_operand.vmem [shape: bf16[4,64], index: 0, kind: input, shape index: {}]   ;;  %s161_s1 = inlined_call_operand.vmem [shape: bf16[12,4], index: 1, kind: input, shape index: {}]   ;;  %s162_s2 = inlined_call_operand.vmem [shape: f32[12,1], index: 2, kind: input, shape index: {}]   ;;  %s163_s3 = inlined_call_operand.vmem [shape: bf16[12,64], index: 3, kind: output, shape index: {}]  }
   0x1   :  { %108 = vmatprep.subr.bf16.mxu0 %v119_v0  ;;  %v17_v1 = vld [vmem:[%s160_s0] sm:$0x3]  ;;  %110 = vmatprep.mubr.msk.bf16.mxu0 %vm120_vm1, %v119_v0  ;;  %v121_v5 = vmov 0   ;;  %v19_v6 = vld [vmem:[%s162_s2 + $0x8] sm:$0xf]  ;;  %vm92_vm3 = vcmask 519168  }
   0x2   :  { %v41_v2 = vsel %vm39_vm0, %v17_v1, 0  ;;  %v118_v3 = vld [vmem:[%s161_s1] sm:$0x3f]   ;;  %117 = vset.pattern.permute.xlu0 %v121_v5  ;;  %vm94_vm4 = vcmask 517120  }
   0x3   :  { %v18_v4 = vld [vmem:[%s162_s2] sm:$0xff]  ;;  %109 = vmatpush3.bf16.msra.mxu0 %v41_v2 }
   0x4   :  { %22 = vperm.xlu0 %117, %v18_v4  }
   0x6   :  { %111 = vmatmul.mubr.msk.bf16.vlgmr.msra.gmra.mxu0 %vm35_vm2, %v118_v3 }
   0x8   :  { %27 = vperm.xlu0 %117, %v19_v6  }
  0x7f   :  { %v23_v7 = vpop.permute.xlu0 %22 }
  0x83   :  { %v28_v12 = vpop.permute.xlu0 %27 }
  0xc6   :  { %v77_v8 = vpop.f32.mrf.mxu0 }
  0xc7   :  { %v78_v9 = vadd.f32 %v77_v8, %v23_v7 }
  0xc8   :  { %v112_v10 = vpop.f32.mrf.mxu0 }
  0xc9   :  { %v104_v11 = vpack.c.bf16 %v78_v9, %v78_v9 }
  0xca   :  { %v80_v13 = vpop.f32.mrf.mxu0 }
  0xcb   :  { %93 = vst.msk [vmem:[%s163_s3] sm:$0xf] %vm92_vm3, %v104_v11  ;;  %v81_v14 = vadd.f32 %v80_v13, %v28_v12 }
  0xcc   :  { %v113_v15 = vpop.f32.mrf.mxu0 }
  0xcd   :  { %v105_v16 = vpack.c.bf16 %v81_v14, %v81_v14 }
  0xcf   :  { %95 = vst.msk [vmem:[%s163_s3 + $0x4] sm:$0x3] %vm94_vm4, %v105_v16 }

// kernel: residual_block_forward.17
= control target key start
LH: loop header
LB: loop body
LE: loop exit
PB: predicated region body
PF: predicated region fallthrough
CT: control target
= control target key end

     0   :  { %vm31_vm0 = vcmask 1041408   ;;  %v141_v0 = vmov 0.0   ;;  %vm142_vm1 = vmmov 0   ;;  %v143_v3 = vmov 0   ;;  %s203_s1 = inlined_call_operand.vmem [shape: bf16[4,64], index: 1, kind: input, shape index: {}]   ;;  %s204_s2 = inlined_call_operand.vmem [shape: bf16[4,4], index: 2, kind: input, shape index: {}]   ;;  %s205_s3 = inlined_call_operand.vmem [shape: f32[4,1], index: 3, kind: input, shape index: {}]   ;;  %s206_s5 = inlined_call_operand.vmem [shape: f32[4,1], index: 5, kind: input, shape index: {}]   ;;  %s207_s4 = inlined_call_operand.vmem [shape: f32[4,1], index: 4, kind: input, shape index: {}]   ;;  %s208_s0 = inlined_call_operand.vmem [shape: f32[4,64], index: 0, kind: input, shape index: {}]   ;;  %s209_s6 = inlined_call_operand.vmem [shape: f32[4,64], index: 6, kind: output, shape index: {}]  }
   0x1   :  { %128 = vmatprep.subr.bf16.mxu0 %v141_v0  ;;  %v26_v1 = vld [vmem:[%s203_s1] sm:$0x3]  ;;  %130 = vmatprep.mubr.msk.bf16.mxu0 %vm142_vm1, %v141_v0  ;;  %vm27_vm2 = vcmask 31744   ;;  %vm83_vm3 = vcmask 519168  }
   0x2   :  { %v33_v2 = vsel %vm31_vm0, %v26_v1, 0  ;;  %137 = vset.pattern.permute.xlu0 %v143_v3  ;;  %v76_v4 = vld [vmem:[%s205_s3] sm:$0xf]  ;;  %138 = vset.pattern.permute.xlu1 %v143_v3 }
   0x3   :  { %129 = vmatpush3.bf16.msra.mxu0 %v33_v2  ;;  %v25_v5 = vld [vmem:[%s204_s2] sm:$0x3]  ;;  %79 = vperm.xlu0 %137, %v76_v4  }
   0x4   :  { %v113_v6 = vld [vmem:[%s206_s5] sm:$0xf] }
   0x5   :  { %v106_v7 = vld [vmem:[%s207_s4] sm:$0xf]  ;;  %116 = vperm.xlu1 %138, %v113_v6  }
   0x6   :  { %131 = vmatmul.mubr.msk.bf16.vlgmr.msra.gmra.mxu0 %vm27_vm2, %v25_v5  ;;  %v24_v8 = vld [vmem:[%s208_s0] sm:$0xf] }
   0x7   :  { %109 = vperm.xlu0 %137, %v106_v7  }
  0x7e   :  { %v80_v11 = vpop.permute.xlu0 %79 }
  0x80   :  { %v117_v38 = vpop.permute.xlu1 %116 }
  0x82   :  { %v110_v37 = vpop.permute.xlu0 %109 }
  0xc6   :  { %v69_v9 = vpop.f32.mrf.mxu0 }
  0xc7   :  { %v75_v10 = vadd.f32 %v69_v9, %v24_v8 }
  0xc8   :  { %v132_v12 = vpop.f32.mrf.mxu0 }
  0xc9   :  { %v82_v13 = vadd.f32 %v80_v11, %v75_v10 }
  0xca   :  { %v72_v14 = vpop.f32.mrf.mxu0 }
  0xcb   :  { %v84_v15 = vsel %vm83_vm3, %v82_v13, 0.0 }
  0xcc   :  { %v85_v16 = vrot.slane %v84_v15, 4  ;;  %v133_v17 = vpop.f32.mrf.mxu0 }
  0xce   :  { %v86_v18 = vadd.f32 %v85_v16, %v84_v15 }
  0xd0   :  { %v87_v19 = vrot.slane %v86_v18, 2 }
  0xd2   :  { %v88_v20 = vadd.f32 %v87_v19, %v86_v18 }
  0xd4   :  { %v89_v21 = vrot.slane %v88_v20, 1 }
  0xd6   :  { %v90_v22 = vadd.f32 %v89_v21, %v88_v20 }
  0xd8   :  { %v92_v23 = vmul.f32 0.25, %v90_v22 }
  0xda   :  { %v93_v24 = vsub.f32 %v82_v13, %v92_v23 }
  0xdc   :  { %v94_v25 = vmul.f32 %v93_v24, %v93_v24 }
  0xde   :  { %v95_v26 = vsel %vm83_vm3, %v94_v25, 0.0 }
  0xdf   :  { %v96_v27 = vrot.slane %v95_v26, 4 }
  0xe1   :  { %v97_v28 = vadd.f32 %v96_v27, %v95_v26 }
  0xe3   :  { %v98_v29 = vrot.slane %v97_v28, 2 }
  0xe5   :  { %v99_v30 = vadd.f32 %v98_v29, %v97_v28 }
  0xe7   :  { %v100_v31 = vrot.slane %v99_v30, 1 }
  0xe9   :  { %v101_v32 = vadd.f32 %v100_v31, %v99_v30 }
  0xeb   :  { %v102_v33 = vmul.f32 0.25, %v101_v32 }
  0xed   :  { %v103_v34 = vadd.f32 1e-05, %v102_v33 }
  0xef   :  { %139 = vrsqrt.f32 %v103_v34 }
  0xfc   :  { %v140_v35 = vpop.eup %139 }
  0xfd   :  { %v105_v36 = vmul.f32 %v140_v35, %v93_v24 }
  0xff   :  { %v112_v39 = vmul.f32 %v110_v37, %v105_v36 }
 0x101   :  { %v119_v40 = vadd.f32 %v117_v38, %v112_v39 }
 0x103   :  { %120 = vst.msk [vmem:[%s209_s6] sm:$0xf] %vm83_vm3, %v119_v40 }

// kernel: residual_block_forward.16
= control target key start
LH: loop header
LB: loop body
LE: loop exit
PB: predicated region body
PF: predicated region fallthrough
CT: control target
= control target key end

     0   :  { %vm46_vm0 = vcmask 1040384   ;;  %vm39_vm1 = vcmask 15360   ;;  %vm321_vm2 = vcmask 261120   ;;  %vm883_vm3 = vmmov 0   ;;  %s1136_s0 = inlined_call_operand.vmem [shape: bf16[4,2,32], index: 0, kind: input, shape index: {}]   ;;  %s1137_s1 = inlined_call_operand.vmem [shape: bf16[4,2,32], index: 1, kind: input, shape index: {}]   ;;  %s1138_s2 = inlined_call_operand.vmem [shape: bf16[4,2,32], index: 2, kind: input, shape index: {}]   ;;  %s1139_s3 = inlined_call_operand.vmem [shape: bf16[4,2,32], index: 3, kind: output, shape index: {}]  }
   0x1   :  { %v15_v0 = vld [vmem:[%s1136_s0] sm:$0x1]  ;;  %v17_v1 = vld [vmem:[%s1136_s0 + $0x2] sm:$0x1]  ;;  %v16_v2 = vld [vmem:[%s1136_s0 + $0x1] sm:$0x1] }
   0x2   :  { %23 = vxpose.xlu0.c.b16.start.end [1/1] (short) (narrow) %v15_v0, 32  ;;  %173 = vxpose.xlu1.c.b16.start.end [1/1] (short) (narrow) %v17_v1, 32  ;;  %v19_v3 = vld [vmem:[%s1137_s1] sm:$0x1]  ;;  %v20_v5 = vld [vmem:[%s1137_s1 + $0x1] sm:$0x1] }
   0x3   :  { %811 = vmatprep.subr.msk.bf16.mxu0 %vm46_vm0, %v19_v3  ;;  %v48_v4 = vsel %vm46_vm0, %v19_v3, 0  ;;  %v21_v6 = vld [vmem:[%s1137_s1 + $0x2] sm:$0x1]  ;;  %v18_v7 = vld [vmem:[%s1136_s0 + $0x3] sm:$0x1]  ;;  %812 = vmatprep.subr.msk.bf16.mxu1 %vm46_vm0, %v20_v5  ;;  %v122_v8 = vsel %vm46_vm0, %v20_v5, 0 }
   0x4   :  { %756 = vmatpush3.bf16.msra.mxu0 %v48_v4  ;;  %v196_v9 = vsel %vm46_vm0, %v21_v6, 0  ;;  %v22_v10 = vld [vmem:[%s1137_s1 + $0x3] sm:$0x1]  ;;  %762 = vmatpush3.bf16.msra.mxu1 %v122_v8  ;;  %vm710_vm4 = vcmask 253952  }
   0x5   :  { %813 = vmatprep.subr.msk.bf16.mxu0 %vm46_vm0, %v21_v6  ;;  %v270_v11 = vsel %vm46_vm0, %v22_v10, 0  ;;  %814 = vmatprep.subr.msk.bf16.mxu1 %vm46_vm0, %v22_v10 }
   0x7   :  { %99 = vxpose.xlu0.c.b16.start.end [1/1] (short) (narrow) %v16_v2, 32  ;;  %247 = vxpose.xlu1.c.b16.start.end [1/1] (short) (narrow) %v18_v7, 32 }
  0x64   :  { %v31_v12 = vpop.trf.xlu0  ;;  %v181_v13 = vpop.trf.xlu1 }
  0x65   :  { %757 = vmatprep.mubr.msk.bf16.mxu0 %vm39_vm1, %v31_v12 }
  0x68   :  { %v32_v14 = vpop.trf.xlu0  ;;  %v182_v15 = vpop.trf.xlu1 }
  0x69   :  { %758 = vmatmul.mubr.msk.bf16.vlgmr.msra.gmra.mxu0 %vm39_vm1, %v32_v14 }
  0x6a   :  { %768 = vmatpush3.bf16.msra.mxu0 %v196_v9  ;;  %769 = vmatprep.mubr.msk.bf16.mxu0 %vm39_vm1, %v181_v13 }
  0x6c   :  { %v107_v16 = vpop.trf.xlu0  ;;  %v255_v18 = vpop.trf.xlu1 }
  0x6d   :  { %763 = vmatprep.mubr.msk.bf16.mxu1 %vm39_vm1, %v107_v16 }
  0x70   :  { %v108_v17 = vpop.trf.xlu0  ;;  %v256_v19 = vpop.trf.xlu1 }
  0x71   :  { %764 = vmatmul.mubr.msk.bf16.vlgmr.msra.gmra.mxu1 %vm39_vm1, %v108_v17  ;;  %770 = vmatmul.mubr.msk.bf16.vlgmr.msra.gmra.mxu0 %vm39_vm1, %v182_v15 }
  0x72   :  { %774 = vmatpush3.bf16.msra.mxu1 %v270_v11  ;;  %775 = vmatprep.mubr.msk.bf16.mxu1 %vm39_vm1, %v255_v18 }
  0x79   :  { %776 = vmatmul.mubr.msk.bf16.vlgmr.msra.gmra.mxu1 %vm39_vm1, %v256_v19 }
 0x129   :  { %v759_v20 = vpop.f32.mrf.mxu0 }
 0x12a   :  { %v328_v21 = vsel %vm321_vm2, %v759_v20, -inf }
 0x12b   :  { %329 = vmax.xlane.f32.xlu0 %v328_v21  ;;  %v84_v22 = vpop.f32.mrf.mxu0 }
 0x12c   :  { %v322_v29 = vsel %vm321_vm2, %v84_v22, -inf }
 0x12d   :  { %v760_v23 = vpop.f32.mrf.mxu0 }
 0x12e   :  { %v331_v24 = vsel %vm321_vm2, %v760_v23, -inf }
 0x12f   :  { %332 = vmax.xlane.f32.xlu1 %v331_v24  ;;  %v87_v31 = vpop.f32.mrf.mxu0 }
 0x130   :  { %v325_v34 = vsel %vm321_vm2, %v87_v31, -inf }
 0x131   :  { %v765_v25 = vpop.f32.mrf.mxu1  ;;  %v951_v32 = vpop.f32.mrf.mxu0 }
 0x132   :  { %v340_v26 = vsel %vm321_vm2, %v765_v25, -inf  ;;  %v352_v38 = vsel %vm321_vm2, %v951_v32, -inf }
 0x133   :  { %341 = vmax.xlane.f32.xlu0 %v340_v26  ;;  %v947_v27 = vpop.f32.mrf.mxu1  ;;  %v958_v36 = vpop.f32.mrf.mxu0 }
 0x134   :  { %v334_v33 = vsel %vm321_vm2, %v947_v27, -inf  ;;  %v346_v45 = vsel %vm321_vm2, %v958_v36, -inf }
 0x135   :  { %v766_v28 = vpop.f32.mrf.mxu1  ;;  %v968_v41 = vpop.f32.mrf.mxu0 }
 0x136   :  { %v343_v30 = vsel %vm321_vm2, %v766_v28, -inf  ;;  %v355_v43 = vsel %vm321_vm2, %v968_v41, -inf }
 0x137   :  { %323 = vmax.xlane.f32.xlu0 %v322_v29  ;;  %344 = vmax.xlane.f32.xlu1 %v343_v30  ;;  %v956_v35 = vpop.f32.mrf.mxu1  ;;  %v980_v47 = vpop.f32.mrf.mxu0 }
 0x138   :  { %v337_v39 = vsel %vm321_vm2, %v956_v35, -inf  ;;  %v349_v49 = vsel %vm321_vm2, %v980_v47, -inf }
 0x139   :  { %v960_v37 = vpop.f32.mrf.mxu1 }
 0x13a   :  { %v364_v40 = vsel %vm321_vm2, %v960_v37, -inf }
 0x13b   :  { %335 = vmax.xlane.f32.xlu0 %v334_v33  ;;  %326 = vmax.xlane.f32.xlu1 %v325_v34  ;;  %v970_v42 = vpop.f32.mrf.mxu1 }
 0x13c   :  { %v358_v48 = vsel %vm321_vm2, %v970_v42, -inf }
 0x13d   :  { %v974_v44 = vpop.f32.mrf.mxu1 }
 0x13e   :  { %v367_v46 = vsel %vm321_vm2, %v974_v44, -inf }
 0x13f   :  { %353 = vmax.xlane.f32.xlu0 %v352_v38  ;;  %338 = vmax.xlane.f32.xlu1 %v337_v39  ;;  %v986_v50 = vpop.f32.mrf.mxu1 }
 0x140   :  { %v361_v51 = vsel %vm321_vm2, %v986_v50, -inf }
 0x143   :  { %356 = vmax.xlane.f32.xlu1 %v355_v43  ;;  %365 = vmax.xlane.f32.xlu0 %v364_v40 }
 0x147   :  { %347 = vmax.xlane.f32.xlu0 %v346_v45  ;;  %368 = vmax.xlane.f32.xlu1 %v367_v46 }
 0x14b   :  { %359 = vmax.xlane.f32.xlu0 %v358_v48  ;;  %350 = vmax.xlane.f32.xlu1 %v349_v49 }
 0x14f   :  { %362 = vmax.xlane.f32.xlu1 %v361_v51 }
 0x1b4   :  { %v330_v52 = vpop.xlane.xlu0 %329 }
 0x1b5   :  { %v372_v53 = vsub.f32 %v759_v20, %v330_v52 }
 0x1b7   :  { %v390_v54 = vmul.f32 1.442695, %v372_v53 }
 0x1b8   :  { %v333_v55 = vpop.xlane.xlu1 %332 }
 0x1b9   :  { %818 = vpow2.f32 %v390_v54  ;;  %v373_v56 = vsub.f32 %v760_v23, %v333_v55 }
 0x1bb   :  { %v392_v57 = vmul.f32 1.442695, %v373_v56 }
 0x1bc   :  { %v342_v58 = vpop.xlane.xlu0 %341 }
 0x1bd   :  { %820 = vpow2.f32 %v392_v57  ;;  %v376_v59 = vsub.f32 %v765_v25, %v342_v58 }
 0x1bf   :  { %v398_v60 = vmul.f32 1.442695, %v376_v59 }
 0x1c0   :  { %v345_v61 = vpop.xlane.xlu1 %344  ;;  %v324_v62 = vpop.xlane.xlu0 %323 }
 0x1c1   :  { %822 = vpow2.f32 %v398_v60  ;;  %v377_v63 = vsub.f32 %v766_v28, %v345_v61  ;;  %v370_v0 = vsub.f32 %v84_v22, %v324_v62 }
 0x1c3   :  { %v400_v1 = vmul.f32 1.442695, %v377_v63  ;;  %v386_v2 = vmul.f32 1.442695, %v370_v0 }
 0x1c4   :  { %v327_v3 = vpop.xlane.xlu1 %326  ;;  %v336_v4 = vpop.xlane.xlu0 %335 }
 0x1c5   :  { %824 = vpow2.f32 %v400_v1  ;;  %v371_v5 = vsub.f32 %v87_v31, %v327_v3  ;;  %v374_v6 = vsub.f32 %v947_v27, %v336_v4 }
 0x1c6   :  { %v991_v7 = vpop.eup %818  ;;  %826 = vpow2.f32 %v386_v2  ;;  %v882_v2 = vmov 0.0  }
 0x1c7   :  { %v388_v8 = vmul.f32 1.442695, %v371_v5  ;;  %v394_v9 = vmul.f32 1.442695, %v374_v6  ;;  %v424_v10 = vsel %vm321_vm2, %v991_v7, 0.0  ;;  %779 = vmatprep.subr.bf16.mxu0 %v882_v2  ;;  %787 = vmatprep.subr.bf16.mxu1 %v882_v2 }
 0x1c8   :  { %v339_v11 = vpop.xlane.xlu1 %338  ;;  %425 = vadd.xlane.f32.xlu0 %v424_v10  ;;  %v354_v12 = vpop.xlane.xlu0 %353  ;;  %783 = vmatprep.mubr.msk.bf16.mxu0 %vm883_vm3, %v882_v2 }
 0x1c9   :  { %828 = vpow2.f32 %v388_v8  ;;  %v375_v13 = vsub.f32 %v956_v35, %v339_v11  ;;  %v380_v14 = vsub.f32 %v951_v32, %v354_v12  ;;  %791 = vmatprep.mubr.msk.bf16.mxu1 %vm883_vm3, %v882_v2 }
 0x1ca   :  { %v997_v15 = vpop.eup %820  ;;  %830 = vpow2.f32 %v394_v9 }
 0x1cb   :  { %v396_v16 = vmul.f32 1.442695, %v375_v13  ;;  %v406_v17 = vmul.f32 1.442695, %v380_v14  ;;  %v427_v18 = vsel %vm321_vm2, %v997_v15, 0.0 }
 0x1cc   :  { %v357_v19 = vpop.xlane.xlu1 %356  ;;  %428 = vadd.xlane.f32.xlu1 %v427_v18  ;;  %v366_v20 = vpop.xlane.xlu0 %365 }
 0x1cd   :  { %832 = vpow2.f32 %v396_v16  ;;  %v381_v21 = vsub.f32 %v968_v41, %v357_v19  ;;  %v384_v22 = vsub.f32 %v960_v37, %v366_v20 }
 0x1ce   :  { %v1003_v23 = vpop.eup %822  ;;  %834 = vpow2.f32 %v406_v17 }
 0x1cf   :  { %v408_v24 = vmul.f32 1.442695, %v381_v21  ;;  %v414_v25 = vmul.f32 1.442695, %v384_v22  ;;  %v436_v26 = vsel %vm321_vm2, %v1003_v23, 0.0 }
 0x1d0   :  { %v369_v27 = vpop.xlane.xlu1 %368  ;;  %437 = vadd.xlane.f32.xlu0 %v436_v26  ;;  %v348_v28 = vpop.xlane.xlu0 %347 }
 0x1d1   :  { %836 = vpow2.f32 %v408_v24  ;;  %v385_v29 = vsub.f32 %v974_v44, %v369_v27  ;;  %v378_v30 = vsub.f32 %v958_v36, %v348_v28 }
 0x1d2   :  { %v1009_v31 = vpop.eup %824  ;;  %838 = vpow2.f32 %v414_v25 }
 0x1d3   :  { %v1011_v32 = vpop.eup %826  ;;  %v416_v33 = vmul.f32 1.442695, %v385_v29  ;;  %v402_v34 = vmul.f32 1.442695, %v378_v30  ;;  %v439_v35 = vsel %vm321_vm2, %v1009_v31, 0.0 }
 0x1d4   :  { %v351_v37 = vpop.xlane.xlu1 %350  ;;  %440 = vadd.xlane.f32.xlu1 %v439_v35  ;;  %v418_v38 = vsel %vm321_vm2, %v1011_v32, 0.0  ;;  %v360_v39 = vpop.xlane.xlu0 %359 }
 0x1d5   :  { %840 = vpow2.f32 %v416_v33  ;;  %v379_v40 = vsub.f32 %v980_v47, %v351_v37  ;;  %419 = vadd.xlane.f32.xlu0 %v418_v38  ;;  %v382_v36 = vsub.f32 %v970_v42, %v360_v39 }
 0x1d6   :  { %v1019_v41 = vpop.eup %828  ;;  %842 = vpow2.f32 %v402_v34 }
 0x1d7   :  { %v1021_v43 = vpop.eup %830  ;;  %v404_v44 = vmul.f32 1.442695, %v379_v40  ;;  %v410_v45 = vmul.f32 1.442695, %v382_v36  ;;  %v421_v46 = vsel %vm321_vm2, %v1019_v41, 0.0 }
 0x1d8   :  { %422 = vadd.xlane.f32.xlu1 %v421_v46  ;;  %v363_v48 = vpop.xlane.xlu1 %362  ;;  %v430_v49 = vsel %vm321_vm2, %v1021_v43, 0.0 }
 0x1d9   :  { %844 = vpow2.f32 %v404_v44  ;;  %v383_v47 = vsub.f32 %v986_v50, %v363_v48  ;;  %431 = vadd.xlane.f32.xlu0 %v430_v49 }
 0x1da   :  { %v1028_v42 = vpop.eup %832  ;;  %846 = vpow2.f32 %v410_v45 }
 0x1db   :  { %v1030_v51 = vpop.eup %834  ;;  %v412_v52 = vmul.f32 1.442695, %v383_v47  ;;  %v433_v53 = vsel %vm321_vm2, %v1028_v42, 0.0 }
 0x1dc   :  { %434 = vadd.xlane.f32.xlu1 %v433_v53  ;;  %v448_v54 = vsel %vm321_vm2, %v1030_v51, 0.0 }
 0x1dd   :  { %848 = vpow2.f32 %v412_v52  ;;  %449 = vadd.xlane.f32.xlu0 %v448_v54 }
 0x1de   :  { %v1036_v55 = vpop.eup %836 }
 0x1df   :  { %v1038_v56 = vpop.eup %838  ;;  %v451_v50 = vsel %vm321_vm2, %v1036_v55, 0.0 }
 0x1e0   :  { %452 = vadd.xlane.f32.xlu1 %v451_v50  ;;  %v460_v57 = vsel %vm321_vm2, %v1038_v56, 0.0 }
 0x1e1   :  { %461 = vadd.xlane.f32.xlu0 %v460_v57 }
 0x1e2   :  { %v1044_v58 = vpop.eup %840 }
 0x1e3   :  { %v1046_v59 = vpop.eup %842  ;;  %v463_v60 = vsel %vm321_vm2, %v1044_v58, 0.0 }
 0x1e4   :  { %464 = vadd.xlane.f32.xlu1 %v463_v60  ;;  %v442_v61 = vsel %vm321_vm2, %v1046_v59, 0.0 }
 0x1e5   :  { %443 = vadd.xlane.f32.xlu0 %v442_v61 }
 0x1e6   :  { %v1052_v62 = vpop.eup %844 }
 0x1e7   :  { %v1054_v63 = vpop.eup %846  ;;  %v445_v0 = vsel %vm321_vm2, %v1052_v62, 0.0 }
 0x1e8   :  { %446 = vadd.xlane.f32.xlu1 %v445_v0  ;;  %v454_v1 = vsel %vm321_vm2, %v1054_v63, 0.0 }
 0x1e9   :  { %455 = vadd.xlane.f32.xlu0 %v454_v1 }
 0x1ea   :  { %v1062_v3 = vpop.eup %848 }
 0x1eb   :  { %v457_v4 = vsel %vm321_vm2, %v1062_v3, 0.0 }
 0x1ec   :  { %458 = vadd.xlane.f32.xlu1 %v457_v4 }
 0x251   :  { %v426_v5 = vpop.xlane.xlu0 %425 }
 0x252   :  { %850 = vrcp.f32 %v426_v5 }
 0x255   :  { %v429_v6 = vpop.xlane.xlu1 %428 }
 0x256   :  { %852 = vrcp.f32 %v429_v6 }
 0x259   :  { %v438_v8 = vpop.xlane.xlu0 %437 }
 0x25a   :  { %854 = vrcp.f32 %v438_v8 }
 0x25d   :  { %v441_v9 = vpop.xlane.xlu1 %440 }
 0x25e   :  { %856 = vrcp.f32 %v441_v9  ;;  %v420_v10 = vpop.xlane.xlu0 %419 }
 0x25f   :  { %858 = vrcp.f32 %v420_v10  ;;  %v851_v11 = vpop.eup %850 }
 0x260   :  { %v484_v16 = vmul.f32 %v851_v11, %v991_v7 }
 0x261   :  { %v423_v12 = vpop.xlane.xlu1 %422 }
 0x262   :  { %860 = vrcp.f32 %v423_v12  ;;  %v432_v13 = vpop.xlane.xlu0 %431 }
 0x263   :  { %v853_v14 = vpop.eup %852  ;;  %862 = vrcp.f32 %v432_v13 }
 0x264   :  { %v485_v17 = vmul.f32 %v853_v14, %v997_v15 }
 0x265   :  { %v435_v18 = vpop.xlane.xlu1 %434 }
 0x266   :  { %864 = vrcp.f32 %v435_v18  ;;  %v450_v19 = vpop.xlane.xlu0 %449  ;;  %v503_v20 = vpack.c.bf16 %v485_v17, %v484_v16 }
 0x267   :  { %866 = vrcp.f32 %v450_v19  ;;  %v855_v22 = vpop.eup %854 }
 0x268   :  { %v517_v21 = vsel %vm321_vm2, %v503_v20, 0  ;;  %v488_v7 = vmul.f32 %v855_v22, %v1003_v23 }
 0x269   :  { %v453_v24 = vpop.xlane.xlu1 %452  ;;  %780 = vmatpush3.bf16.xpose.msra.mxu0 %v517_v21 }
 0x26a   :  { %868 = vrcp.f32 %v453_v24  ;;  %v462_v25 = vpop.xlane.xlu0 %461  ;;  %781 = vmatprep.subr.bf16.mxu0 %v882_v2 }
 0x26b   :  { %v857_v26 = vpop.eup %856  ;;  %870 = vrcp.f32 %v462_v25 }
 0x26c   :  { %v489_v15 = vmul.f32 %v857_v26, %v1009_v31  ;;  %v859_v27 = vpop.eup %858 }
 0x26d   :  { %v465_v28 = vpop.xlane.xlu1 %464  ;;  %v482_v35 = vmul.f32 %v859_v27, %v1011_v32 }
 0x26e   :  { %872 = vrcp.f32 %v465_v28  ;;  %v444_v29 = vpop.xlane.xlu0 %443  ;;  %v505_v30 = vpack.c.bf16 %v489_v15, %v488_v7 }
 0x26f   :  { %v861_v33 = vpop.eup %860  ;;  %874 = vrcp.f32 %v444_v29 }
 0x270   :  { %v566_v34 = vsel %vm321_vm2, %v505_v30, 0  ;;  %v483_v37 = vmul.f32 %v861_v33, %v1019_v41  ;;  %v863_v38 = vpop.eup %862 }
 0x271   :  { %v447_v39 = vpop.xlane.xlu1 %446  ;;  %788 = vmatpush3.bf16.xpose.msra.mxu1 %v566_v34  ;;  %v486_v44 = vmul.f32 %v863_v38, %v1021_v43  ;;  %v498_v43 = vld [vmem:[%s1138_s2] sm:$0x1] }
 0x272   :  { %876 = vrcp.f32 %v447_v39  ;;  %v456_v23 = vpop.xlane.xlu0 %455  ;;  %v502_v40 = vpack.c.bf16 %v483_v37, %v482_v35  ;;  %789 = vmatprep.subr.bf16.mxu1 %v882_v2 }
 0x273   :  { %v865_v31 = vpop.eup %864  ;;  %878 = vrcp.f32 %v456_v23 }
 0x274   :  { %v514_v36 = vsel %vm321_vm2, %v502_v40, 0  ;;  %v487_v45 = vmul.f32 %v865_v31, %v1028_v42  ;;  %v867_v46 = vpop.eup %866 }
 0x275   :  { %v459_v32 = vpop.xlane.xlu1 %458  ;;  %782 = vmatpush3.bf16.xpose.msra.mxu0 %v514_v36  ;;  %v492_v47 = vmul.f32 %v867_v46, %v1030_v51 }
 0x276   :  { %880 = vrcp.f32 %v459_v32  ;;  %v504_v41 = vpack.c.bf16 %v487_v45, %v486_v44  ;;  %795 = vmatprep.subr.bf16.mxu0 %v882_v2 }
 0x277   :  { %v869_v48 = vpop.eup %868 }
 0x278   :  { %v563_v49 = vsel %vm321_vm2, %v504_v41, 0  ;;  %v493_v52 = vmul.f32 %v869_v48, %v1036_v55  ;;  %v871_v53 = vpop.eup %870  ;;  %v499_v55 = vld [vmem:[%s1138_s2 + $0x1] sm:$0x1] }
 0x279   :  { %790 = vmatpush3.bf16.xpose.msra.mxu1 %v563_v49  ;;  %v496_v57 = vmul.f32 %v871_v53, %v1038_v56 }
 0x27a   :  { %v507_v42 = vpack.c.bf16 %v493_v52, %v492_v47  ;;  %803 = vmatprep.subr.bf16.mxu1 %v882_v2 }
 0x27b   :  { %v873_v54 = vpop.eup %872 }
 0x27c   :  { %784 = vmatmul.mubr.msk.bf16.vlgmr.msra.gmra.mxu0 %vm321_vm2, %v498_v43  ;;  %v615_v50 = vsel %vm321_vm2, %v507_v42, 0  ;;  %v497_v51 = vmul.f32 %v873_v54, %v1044_v58  ;;  %v875_v60 = vpop.eup %874 }
 0x27d   :  { %796 = vmatpush3.bf16.xpose.msra.mxu0 %v615_v50  ;;  %799 = vmatprep.mubr.msk.bf16.mxu0 %vm883_vm3, %v882_v2  ;;  %v490_v56 = vmul.f32 %v875_v60, %v1046_v59 }
 0x27e   :  { %v509_v61 = vpack.c.bf16 %v497_v51, %v496_v57  ;;  %797 = vmatprep.subr.bf16.mxu0 %v882_v2 }
 0x27f   :  { %v877_v0 = vpop.eup %876 }
 0x280   :  { %792 = vmatmul.mubr.msk.bf16.vlgmr.msra.gmra.mxu1 %vm321_vm2, %v499_v55  ;;  %v664_v1 = vsel %vm321_vm2, %v509_v61, 0  ;;  %v491_v58 = vmul.f32 %v877_v0, %v1052_v62  ;;  %v879_v4 = vpop.eup %878  ;;  %v500_v62 = vld [vmem:[%s1138_s2 + $0x2] sm:$0x1] }
 0x281   :  { %804 = vmatpush3.bf16.xpose.msra.mxu1 %v664_v1  ;;  %807 = vmatprep.mubr.msk.bf16.mxu1 %vm883_vm3, %v882_v2  ;;  %v494_v9 = vmul.f32 %v879_v4, %v1054_v63 }
 0x282   :  { %v506_v5 = vpack.c.bf16 %v491_v58, %v490_v56  ;;  %805 = vmatprep.subr.bf16.mxu1 %v882_v2  ;;  %v501_v2 = vld [vmem:[%s1138_s2 + $0x3] sm:$0x1] }
 0x283   :  { %v881_v6 = vpop.eup %880 }
 0x284   :  { %v612_v8 = vsel %vm321_vm2, %v506_v5, 0  ;;  %v495_v10 = vmul.f32 %v881_v6, %v1062_v3 }
 0x285   :  { %798 = vmatpush3.bf16.xpose.msra.mxu0 %v612_v8 }
 0x286   :  { %v508_v11 = vpack.c.bf16 %v495_v10, %v494_v9 }
 0x288   :  { %v661_v59 = vsel %vm321_vm2, %v508_v11, 0 }
 0x289   :  { %806 = vmatpush3.bf16.xpose.msra.mxu1 %v661_v59 }
 0x28c   :  { %800 = vmatmul.mubr.msk.bf16.vlgmr.msra.gmra.mxu0 %vm321_vm2, %v500_v62 }
 0x290   :  { %808 = vmatmul.mubr.msk.bf16.vlgmr.msra.gmra.mxu1 %vm321_vm2, %v501_v2 }
 0x33c   :  { %v553_v63 = vpop.f32.mrf.mxu0 }
 0x33d   :  { %v706_v3 = vpack.c.bf16 %v553_v63, %v553_v63 }
 0x33e   :  { %v785_v12 = vpop.f32.mrf.mxu0 }
 0x33f   :  { %711 = vst.msk [vmem:[%s1139_s3] sm:$0x1] %vm710_vm4, %v706_v3 }
 0x340   :  { %v556_v13 = vpop.f32.mrf.mxu0  ;;  %v602_v14 = vpop.f32.mrf.mxu1 }
 0x341   :  { %v707_v16 = vpack.c.bf16 %v602_v14, %v602_v14 }
 0x342   :  { %v786_v17 = vpop.f32.mrf.mxu0  ;;  %v793_v18 = vpop.f32.mrf.mxu1 }
 0x343   :  { %712 = vst.msk [vmem:[%s1139_s3 + $0x1] sm:$0x1] %vm710_vm4, %v707_v16 }
 0x344   :  { %v605_v19 = vpop.f32.mrf.mxu1 }
 0x346   :  { %v794_v20 = vpop.f32.mrf.mxu1 }
 0x34c   :  { %v651_v21 = vpop.f32.mrf.mxu0 }
 0x34d   :  { %v708_v22 = vpack.c.bf16 %v651_v21, %v651_v21 }
 0x34e   :  { %v801_v24 = vpop.f32.mrf.mxu0 }
 0x34f   :  { %713 = vst.msk [vmem:[%s1139_s3 + $0x2] sm:$0x1] %vm710_vm4, %v708_v22 }
 0x350   :  { %v654_v25 = vpop.f32.mrf.mxu0  ;;  %v700_v26 = vpop.f32.mrf.mxu1 }
 0x351   :  { %v709_v7 = vpack.c.bf16 %v700_v26, %v700_v26 }
 0x352   :  { %v802_v15 = vpop.f32.mrf.mxu0  ;;  %v809_v27 = vpop.f32.mrf.mxu1 }
 0x353   :  { %714 = vst.msk [vmem:[%s1139_s3 + $0x3] sm:$0x1] %vm710_vm4, %v709_v7 }
 0x354   :  { %v703_v28 = vpop.f32.mrf.mxu1 }
 0x356   :  { %v810_v29 = vpop.f32.mrf.mxu1 }

// kernel: residual_block_forward.18
= control target key start
LH: loop header
LB: loop body
LE: loop exit
PB: predicated region body
PF: predicated region fallthrough
CT: control target
= control target key end

     0   :  { %vm118_vm0 = vcmask 1041408   ;;  %vm105_vm1 = vcmask 31744   ;;  %v426_v1 = vmov 0   ;;  %v427_v19 = vmov 0.0   ;;  %s582_s0 = inlined_call_operand.vmem [shape: f32[4,64], index: 0, kind: input, shape index: {}]   ;;  %s583_s1 = inlined_call_operand.vmem [shape: bf16[64,4], index: 1, kind: input, shape index: {}]   ;;  %s584_s2 = inlined_call_operand.vmem [shape: f32[64,1], index: 2, kind: input, shape index: {}]   ;;  %s585_s4 = inlined_call_operand.vmem [shape: f32[4,1], index: 4, kind: input, shape index: {}]   ;;  %s586_s5 = inlined_call_operand.vmem [shape: f32[4,1], index: 5, kind: input, shape index: {}]   ;;  %s587_s6 = inlined_call_operand.vmem [shape: f32[4,1], index: 6, kind: input, shape index: {}]   ;;  %s588_s3 = inlined_call_operand.vmem [shape: bf16[4,64], index: 3, kind: input, shape index: {}]   ;;  %s589_s7 = inlined_call_operand.vmem [shape: f32[4,64], index: 7, kind: output, shape index: {}]  }
   0x1   :  { %v472_v0 = vld [vmem:[%s582_s0] sm:$0xf]  ;;  %402 = vset.pattern.permute.xlu0 %v426_v1  ;;  %403 = vset.pattern.permute.xlu1 %v426_v1  ;;  %v405_v5 = vld [vmem:[%s583_s1 + $0x8] sm:$0xff]   ;;  %v406_v6 = vld [vmem:[%s583_s1 + $0x10] sm:$0xff]   ;;  %vm428_vm2 = vmmov 0   ;;  %vm270_vm3 = vcmask 523264  }
   0x2   :  { %v36_v2 = vpack.c.bf16 %v472_v0, %v472_v0  ;;  %v404_v3 = vld [vmem:[%s583_s1] sm:$0xff]   ;;  %v43_v7 = vld [vmem:[%s584_s2 + $0x30] sm:$0xff]  ;;  %v44_v9 = vld [vmem:[%s584_s2 + $0x38] sm:$0xff]  ;;  %386 = vmatprep.subr.bf16.mxu1 %v427_v19  ;;  %394 = vmatprep.mubr.msk.bf16.mxu1 %vm428_vm2, %v427_v19  ;;  %vm315_vm4 = vcmask 519168  }
   0x3   :  { %378 = vmatprep.mubr.msk.bf16.mxu0 %vm105_vm1, %v404_v3  ;;  %77 = vperm.xlu0 %402, %v43_v7   ;;  %v41_v8 = vld [vmem:[%s584_s2 + $0x20] sm:$0xff]  ;;  %v42_v10 = vld [vmem:[%s584_s2 + $0x28] sm:$0xff]  ;;  %v39_v11 = vld [vmem:[%s584_s2 + $0x10] sm:$0xff] }
   0x4   :  { %398 = vmatprep.subr.msk.bf16.mxu0 %vm118_vm0, %v36_v2  ;;  %v120_v4 = vsel %vm118_vm0, %v36_v2, 0  ;;  %67 = vperm.xlu1 %403, %v41_v8   ;;  %v407_v12 = vld [vmem:[%s583_s1 + $0x18] sm:$0xff]   ;;  %v37_v14 = vld [vmem:[%s584_s2] sm:$0xff]  ;;  %v38_v15 = vld [vmem:[%s584_s2 + $0x8] sm:$0xff] }
   0x5   :  { %377 = vmatpush3.bf16.msra.mxu0 %v120_v4  ;;  %v40_v13 = vld [vmem:[%s584_s2 + $0x18] sm:$0xff]  ;;  %v264_v16 = vld [vmem:[%s585_s4] sm:$0xf] }
   0x6   :  { %v338_v17 = vld [vmem:[%s586_s5] sm:$0xf] }
   0x7   :  { %82 = vperm.xlu0 %402, %v44_v9   ;;  %v345_v18 = vld [vmem:[%s587_s6] sm:$0xf] }
   0x8   :  { %379 = vmatmul.mubr.msk.bf16.vlgmr.msra.gmra.mxu0 %vm105_vm1, %v405_v5  ;;  %72 = vperm.xlu1 %403, %v42_v10  }
   0x9   :  { %382 = vmatprep.mubr.msk.bf16.mxu0 %vm105_vm1, %v406_v6 }
   0xb   :  { %57 = vperm.xlu0 %402, %v39_v11  }
   0xc   :  { %62 = vperm.xlu1 %403, %v40_v13  }
   0xf   :  { %47 = vperm.xlu0 %402, %v37_v14  }
  0x10   :  { %383 = vmatmul.mubr.msk.bf16.gmra.mxu0 %vm105_vm1, %v407_v12  ;;  %52 = vperm.xlu1 %403, %v38_v15  }
  0x13   :  { %267 = vperm.xlu0 %402, %v264_v16  }
  0x14   :  { %341 = vperm.xlu1 %403, %v338_v17  }
  0x17   :  { %348 = vperm.xlu0 %402, %v345_v18  }
  0x7e   :  { %v78_v21 = vpop.permute.xlu0 %77 }
  0x7f   :  { %v68_v20 = vpop.permute.xlu1 %67 }
  0x82   :  { %v83_v23 = vpop.permute.xlu0 %82 }
  0x83   :  { %v73_v22 = vpop.permute.xlu1 %72 }
  0x86   :  { %v58_v26 = vpop.permute.xlu0 %57 }
  0x87   :  { %v63_v24 = vpop.permute.xlu1 %62 }
  0x8a   :  { %v48_v33 = vpop.permute.xlu0 %47 }
  0x8b   :  { %v53_v30 = vpop.permute.xlu1 %52 }
  0xc8   :  { %v380_v25 = vpop.f32.mrf.mxu0 }
  0xc9   :  { %v527_v28 = vadd.f32 %v380_v25, %v58_v26 }
  0xca   :  { %v156_v27 = vpop.f32.mrf.mxu0 }
  0xcb   :  { %v189_v34 = vmul.f32 %v527_v28, %v527_v28  ;;  %v537_v37 = vadd.f32 %v156_v27, %v48_v33 }
  0xcc   :  { %v381_v29 = vpop.f32.mrf.mxu0 }
  0xcd   :  { %v529_v31 = vadd.f32 %v381_v29, %v63_v24  ;;  %v197_v43 = vmul.f32 %v189_v34, %v527_v28  ;;  %v187_v44 = vmul.f32 %v537_v37, %v537_v37 }
  0xce   :  { %v159_v32 = vpop.f32.mrf.mxu0 }
  0xcf   :  { %v190_v35 = vmul.f32 %v529_v31, %v529_v31  ;;  %v535_v36 = vadd.f32 %v159_v32, %v53_v30  ;;  %v205_v54 = vmul.f32 0.044715, %v197_v43  ;;  %v195_v56 = vmul.f32 %v187_v44, %v537_v37 }
  0xd0   :  { %v384_v38 = vpop.f32.mrf.mxu0 }
  0xd1   :  { %v198_v39 = vmul.f32 %v190_v35, %v529_v31  ;;  %v188_v40 = vmul.f32 %v535_v36, %v535_v36  ;;  %v542_v41 = vadd.f32 %v384_v38, %v78_v21  ;;  %v213_v3 = vadd.f32 %v205_v54, %v527_v28 }
  0xd2   :  { %v172_v42 = vpop.f32.mrf.mxu0  ;;  %v203_v5 = vmul.f32 0.044715, %v195_v56 }
  0xd3   :  { %v193_v45 = vmul.f32 %v542_v41, %v542_v41  ;;  %v549_v46 = vadd.f32 %v172_v42, %v68_v20  ;;  %v206_v48 = vmul.f32 0.044715, %v198_v39  ;;  %v196_v49 = vmul.f32 %v188_v40, %v535_v36 }
  0xd4   :  { %v385_v47 = vpop.f32.mrf.mxu0  ;;  %v221_v15 = vmul.f32 0.7978846, %v213_v3  ;;  %v211_v16 = vadd.f32 %v203_v5, %v537_v37 }
  0xd5   :  { %v201_v50 = vmul.f32 %v193_v45, %v542_v41  ;;  %v191_v51 = vmul.f32 %v549_v46, %v549_v46  ;;  %v184_v52 = vadd.f32 %v385_v47, %v83_v23  ;;  %v214_v60 = vadd.f32 %v206_v48, %v529_v31 }
  0xd6   :  { %v175_v53 = vpop.f32.mrf.mxu0  ;;  %v204_v62 = vmul.f32 0.044715, %v196_v49  ;;  %v219_v21 = vmul.f32 0.7978846, %v211_v16 }
  0xd7   :  { %v176_v55 = vadd.f32 %v175_v53, %v73_v22  ;;  %v209_v57 = vmul.f32 0.044715, %v201_v50  ;;  %v199_v58 = vmul.f32 %v191_v51, %v549_v46  ;;  %v194_v59 = vmul.f32 %v184_v52, %v184_v52 }
  0xd8   :  { %v222_v9 = vmul.f32 0.7978846, %v214_v60  ;;  %v212_v11 = vadd.f32 %v204_v62, %v535_v36 }
  0xd9   :  { %v192_v61 = vmul.f32 %v176_v55, %v176_v55  ;;  %v217_v63 = vadd.f32 %v209_v57, %v542_v41  ;;  %v207_v1 = vmul.f32 0.044715, %v199_v58  ;;  %v202_v2 = vmul.f32 %v194_v59, %v184_v52 }
  0xda   :  { %v220_v20 = vmul.f32 0.7978846, %v212_v11 }
  0xdb   :  { %v200_v4 = vmul.f32 %v192_v61, %v176_v55  ;;  %v225_v6 = vmul.f32 0.7978846, %v217_v63  ;;  %v215_v7 = vadd.f32 %v207_v1, %v549_v46  ;;  %v210_v8 = vmul.f32 0.044715, %v202_v2 }
  0xdd   :  { %v208_v10 = vmul.f32 0.044715, %v200_v4  ;;  %v223_v12 = vmul.f32 0.7978846, %v215_v7  ;;  %v218_v13 = vadd.f32 %v210_v8, %v184_v52  ;;  %408 = vtanh.f32 %v225_v6 }
  0xdf   :  { %v216_v14 = vadd.f32 %v208_v10, %v176_v55  ;;  %410 = vtanh.f32 %v223_v12  ;;  %v226_v17 = vmul.f32 0.7978846, %v218_v13 }
  0xe0   :  { %412 = vtanh.f32 %v222_v9 }
  0xe1   :  { %v224_v18 = vmul.f32 0.7978846, %v216_v14  ;;  %414 = vtanh.f32 %v226_v17 }
  0xe3   :  { %416 = vtanh.f32 %v224_v18 }
  0xe4   :  { %418 = vtanh.f32 %v221_v15 }
  0xe5   :  { %420 = vtanh.f32 %v220_v20 }
  0xe6   :  { %422 = vtanh.f32 %v219_v21 }
  0xea   :  { %v409_v22 = vpop.eup %408 }
  0xeb   :  { %v241_v23 = vadd.f32 1.0, %v409_v22 }
  0xec   :  { %v411_v24 = vpop.eup %410 }
  0xed   :  { %v413_v25 = vpop.eup %412  ;;  %v249_v30 = vmul.f32 0.5, %v241_v23  ;;  %v239_v32 = vadd.f32 1.0, %v411_v24  ;;  %v342_v23 = vpop.permute.xlu1 %341 }
  0xee   :  { %v415_v26 = vpop.eup %414  ;;  %v238_v38 = vadd.f32 1.0, %v413_v25 }
  0xef   :  { %v242_v29 = vadd.f32 1.0, %v415_v26  ;;  %v257_v42 = vmul.f32 %v249_v30, %v542_v41  ;;  %v247_v44 = vmul.f32 0.5, %v239_v32 }
  0xf0   :  { %v417_v27 = vpop.eup %416  ;;  %v246_v50 = vmul.f32 0.5, %v238_v38 }
  0xf1   :  { %v419_v33 = vpop.eup %418  ;;  %v240_v34 = vadd.f32 1.0, %v417_v27  ;;  %v250_v35 = vmul.f32 0.5, %v242_v29  ;;  %v255_v53 = vmul.f32 %v247_v44, %v549_v46 }
  0xf2   :  { %v421_v39 = vpop.eup %420  ;;  %v237_v45 = vadd.f32 1.0, %v419_v33  ;;  %v254_v58 = vmul.f32 %v246_v50, %v529_v31  ;;  %v259_v31 = vld [vmem:[%s588_s3] sm:$0x3] }
  0xf3   :  { %v248_v40 = vmul.f32 0.5, %v240_v34  ;;  %v258_v43 = vmul.f32 %v250_v35, %v184_v52  ;;  %v423_v47 = vpop.eup %422  ;;  %v236_v51 = vadd.f32 1.0, %v421_v39 }
  0xf4   :  { %v245_v54 = vmul.f32 0.5, %v237_v45  ;;  %v235_v56 = vadd.f32 1.0, %v423_v47 }
  0xf5   :  { %v263_v48 = vpack.c.bf16 %v258_v43, %v257_v42  ;;  %v256_v49 = vmul.f32 %v248_v40, %v176_v55  ;;  %v244_v59 = vmul.f32 0.5, %v236_v51 }
  0xf6   :  { %v253_v41 = vmul.f32 %v245_v54, %v527_v28  ;;  %v243_v52 = vmul.f32 0.5, %v235_v56  ;;  %v268_v28 = vpop.permute.xlu0 %267 }
  0xf7   :  { %387 = vmatpush3.bf16.msra.mxu1 %v263_v48  ;;  %v262_v57 = vpack.c.bf16 %v256_v49, %v255_v53  ;;  %v252_v60 = vmul.f32 %v244_v59, %v535_v36 }
  0xf8   :  { %388 = vmatprep.subr.bf16.mxu1 %v427_v19  ;;  %v261_v55 = vpack.c.bf16 %v254_v58, %v253_v41  ;;  %v251_v46 = vmul.f32 %v243_v52, %v537_v37 }
  0xfa   :  { %v260_v61 = vpack.c.bf16 %v252_v60, %v251_v46  ;;  %v349_v25 = vpop.permute.xlu0 %348 }
  0xfb   :  { %389 = vmatpush3.bf16.msra.mxu1 %v262_v57 }
  0xfc   :  { %390 = vmatprep.subr.bf16.mxu1 %v427_v19 }
  0xff   :  { %391 = vmatpush3.bf16.msra.mxu1 %v261_v55 }
 0x100   :  { %392 = vmatprep.subr.bf16.mxu1 %v427_v19 }
 0x103   :  { %393 = vmatpush3.bf16.msra.mxu1 %v260_v61 }
 0x106   :  { %395 = vmatmul.mubr.msk.bf16.vlgmr.msra.gmra.mxu1 %vm270_vm3, %v259_v31 }
 0x1c6   :  { %v308_v62 = vpop.f32.mrf.mxu1 }
 0x1c7   :  { %v309_v63 = vadd.f32 %v308_v62, %v268_v28 }
 0x1c8   :  { %v396_v1 = vpop.f32.mrf.mxu1 }
 0x1c9   :  { %v314_v36 = vadd.f32 %v309_v63, %v472_v0 }
 0x1ca   :  { %v311_v2 = vpop.f32.mrf.mxu1 }
 0x1cb   :  { %v316_v37 = vsel %vm315_vm4, %v314_v36, 0.0 }
 0x1cc   :  { %v317_v3 = vrot.slane %v316_v37, 4  ;;  %v397_v19 = vpop.f32.mrf.mxu1 }
 0x1ce   :  { %v318_v4 = vadd.f32 %v317_v3, %v316_v37 }
 0x1d0   :  { %v319_v5 = vrot.slane %v318_v4, 2 }
 0x1d2   :  { %v320_v6 = vadd.f32 %v319_v5, %v318_v4 }
 0x1d4   :  { %v321_v7 = vrot.slane %v320_v6, 1 }
 0x1d6   :  { %v322_v8 = vadd.f32 %v321_v7, %v320_v6 }
 0x1d8   :  { %v324_v9 = vmul.f32 0.25, %v322_v8 }
 0x1da   :  { %v325_v10 = vsub.f32 %v314_v36, %v324_v9 }
 0x1dc   :  { %v326_v11 = vmul.f32 %v325_v10, %v325_v10 }
 0x1de   :  { %v327_v12 = vsel %vm315_vm4, %v326_v11, 0.0 }
 0x1df   :  { %v328_v13 = vrot.slane %v327_v12, 4 }
 0x1e1   :  { %v329_v14 = vadd.f32 %v328_v13, %v327_v12 }
 0x1e3   :  { %v330_v15 = vrot.slane %v329_v14, 2 }
 0x1e5   :  { %v331_v16 = vadd.f32 %v330_v15, %v329_v14 }
 0x1e7   :  { %v332_v0 = vrot.slane %v331_v16, 1 }
 0x1e9   :  { %v333_v17 = vadd.f32 %v332_v0, %v331_v16 }
 0x1eb   :  { %v334_v18 = vmul.f32 0.25, %v333_v17 }
 0x1ed   :  { %v335_v20 = vadd.f32 1e-05, %v334_v18 }
 0x1ef   :  { %424 = vrsqrt.f32 %v335_v20 }
 0x1fc   :  { %v425_v21 = vpop.eup %424 }
 0x1fd   :  { %v337_v22 = vmul.f32 %v425_v21, %v325_v10 }
 0x1ff   :  { %v344_v24 = vmul.f32 %v342_v23, %v337_v22 }
 0x201   :  { %v351_v26 = vadd.f32 %v349_v25, %v344_v24 }
 0x203   :  { %352 = vst.msk [vmem:[%s589_s7] sm:$0xf] %vm315_vm4, %v351_v26 }

// kernel: residual_block_forward.19
= control target key start
LH: loop header
LB: loop body
LE: loop exit
PB: predicated region body
PF: predicated region fallthrough
CT: control target
= control target key end

     0   :  { %v169_v0 = vmov 0.0   ;;  %vm170_vm0 = vmmov 0   ;;  %vm38_vm1 = vcmask 130048   ;;  %v171_v5 = vmov 0   ;;  %s228_s0 = inlined_call_operand.vmem [shape: bf16[16,80], index: 0, kind: input, shape index: {}]   ;;  %s229_s1 = inlined_call_operand.vmem [shape: bf16[4,16], index: 1, kind: input, shape index: {}]   ;;  %s230_s2 = inlined_call_operand.vmem [shape: bf16[4,16], index: 2, kind: input, shape index: {}]   ;;  %s231_s3 = inlined_call_operand.vmem [shape: f32[4,1], index: 3, kind: input, shape index: {}]   ;;  %s232_s4 = inlined_call_operand.vmem [shape: f32[4,1], index: 4, kind: input, shape index: {}]   ;;  %s233_s5 = inlined_call_operand.vmem [shape: bf16[4,80], index: 5, kind: output, shape index: {0}]   ;;  %s234_s6 = inlined_call_operand.vmem [shape: bf16[4,80], index: 6, kind: output, shape index: {1}]  }
   0x1   :  { %152 = vmatprep.subr.bf16.mxu0 %v169_v0  ;;  %158 = vmatprep.subr.bf16.mxu1 %v169_v0  ;;  %v168_v1 = vld [vmem:[%s228_s0] sm:$0xff]   ;;  %vm83_vm2 = vcmask 648192  }
   0x2   :  { %154 = vmatprep.mubr.msk.bf16.mxu0 %vm170_vm0, %v169_v0  ;;  %160 = vmatprep.mubr.msk.bf16.mxu1 %vm170_vm0, %v169_v0  ;;  %v26_v2 = vld [vmem:[%s231_s3] sm:$0xf] }
   0x3   :  { %153 = vmatpush3.bf16.msra.mxu0 %v168_v1  ;;  %159 = vmatpush3.bf16.msra.mxu1 %v168_v1  ;;  %v25_v3 = vld [vmem:[%s229_s1] sm:$0x3] }
   0x4   :  { %v85_v4 = vld [vmem:[%s230_s2] sm:$0x3]  ;;  %167 = vset.pattern.permute.xlu0 %v171_v5 }
   0x5   :  { %29 = vperm.xlu0 %167, %v26_v2   ;;  %v86_v6 = vld [vmem:[%s232_s4] sm:$0xf] }
   0x6   :  { %155 = vmatmul.mubr.msk.bf16.vlgmr.msra.gmra.mxu0 %vm38_vm1, %v25_v3  ;;  %161 = vmatmul.mubr.msk.bf16.vlgmr.msra.gmra.mxu1 %vm38_vm1, %v85_v4 }
   0x9   :  { %89 = vperm.xlu0 %167, %v86_v6  }
  0x80   :  { %v30_v7 = vpop.permute.xlu0 %29 }
  0x84   :  { %v90_v8 = vpop.permute.xlu0 %89 }
  0xc6   :  { %v76_v9 = vpop.f32.mrf.mxu0  ;;  %v129_v10 = vpop.f32.mrf.mxu1 }
  0xc7   :  { %v77_v11 = vadd.f32 %v76_v9, %v30_v7  ;;  %v130_v12 = vadd.f32 %v129_v10, %v90_v8 }
  0xc8   :  { %v156_v13 = vpop.f32.mrf.mxu0  ;;  %v162_v14 = vpop.f32.mrf.mxu1 }
  0xc9   :  { %v82_v15 = vpack.c.bf16 %v77_v11, %v77_v11  ;;  %v135_v16 = vpack.c.bf16 %v130_v12, %v130_v12 }
  0xca   :  { %v79_v17 = vpop.f32.mrf.mxu0  ;;  %v132_v18 = vpop.f32.mrf.mxu1 }
  0xcb   :  { %84 = vst.msk [vmem:[%s233_s5] sm:$0x3] %vm83_vm2, %v82_v15  ;;  %136 = vst.msk [vmem:[%s234_s6] sm:$0x3] %vm83_vm2, %v135_v16 }
  0xcc   :  { %v157_v19 = vpop.f32.mrf.mxu0  ;;  %v163_v20 = vpop.f32.mrf.mxu1 }

// kernel: residual_block_forward.20
= control target key start
LH: loop header
LB: loop body
LE: loop exit
PB: predicated region body
PF: predicated region fallthrough
CT: control target
= control target key end

     0   :  { %v169_v0 = vmov 0.0   ;;  %vm170_vm0 = vmmov 0   ;;  %vm38_vm1 = vcmask 130048   ;;  %v171_v5 = vmov 0   ;;  %s228_s0 = inlined_call_operand.vmem [shape: bf16[16,40], index: 0, kind: input, shape index: {}]   ;;  %s229_s1 = inlined_call_operand.vmem [shape: bf16[8,16], index: 1, kind: input, shape index: {}]   ;;  %s230_s2 = inlined_call_operand.vmem [shape: bf16[8,16], index: 2, kind: input, shape index: {}]   ;;  %s231_s3 = inlined_call_operand.vmem [shape: f32[8,1], index: 3, kind: input, shape index: {}]   ;;  %s232_s4 = inlined_call_operand.vmem [shape: f32[8,1], index: 4, kind: input, shape index: {}]   ;;  %s233_s5 = inlined_call_operand.vmem [shape: bf16[8,40], index: 5, kind: output, shape index: {0}]   ;;  %s234_s6 = inlined_call_operand.vmem [shape: bf16[8,40], index: 6, kind: output, shape index: {1}]  }
   0x1   :  { %152 = vmatprep.subr.bf16.mxu0 %v169_v0  ;;  %158 = vmatprep.subr.bf16.mxu1 %v169_v0  ;;  %v168_v1 = vld [vmem:[%s228_s0] sm:$0xff]   ;;  %vm83_vm2 = vcmask 322560  }
   0x2   :  { %154 = vmatprep.mubr.msk.bf16.mxu0 %vm170_vm0, %v169_v0  ;;  %160 = vmatprep.mubr.msk.bf16.mxu1 %vm170_vm0, %v169_v0  ;;  %v26_v2 = vld [vmem:[%s231_s3] sm:$0xff] }
   0x3   :  { %153 = vmatpush3.bf16.msra.mxu0 %v168_v1  ;;  %159 = vmatpush3.bf16.msra.mxu1 %v168_v1  ;;  %v25_v3 = vld [vmem:[%s229_s1] sm:$0xf] }
   0x4   :  { %v85_v4 = vld [vmem:[%s230_s2] sm:$0xf]  ;;  %167 = vset.pattern.permute.xlu0 %v171_v5 }
   0x5   :  { %29 = vperm.xlu0 %167, %v26_v2   ;;  %v86_v6 = vld [vmem:[%s232_s4] sm:$0xff] }
   0x6   :  { %155 = vmatmul.mubr.msk.bf16.vlgmr.msra.gmra.mxu0 %vm38_vm1, %v25_v3  ;;  %161 = vmatmul.mubr.msk.bf16.vlgmr.msra.gmra.mxu1 %vm38_vm1, %v85_v4 }
   0x9   :  { %89 = vperm.xlu0 %167, %v86_v6  }
  0x80   :  { %v30_v7 = vpop.permute.xlu0 %29 }
  0x84   :  { %v90_v8 = vpop.permute.xlu0 %89 }
  0xc6   :  { %v76_v9 = vpop.f32.mrf.mxu0  ;;  %v129_v10 = vpop.f32.mrf.mxu1 }
  0xc7   :  { %v77_v11 = vadd.f32 %v76_v9, %v30_v7  ;;  %v130_v12 = vadd.f32 %v129_v10, %v90_v8 }
  0xc8   :  { %v156_v13 = vpop.f32.mrf.mxu0  ;;  %v162_v14 = vpop.f32.mrf.mxu1 }
  0xc9   :  { %v82_v15 = vpack.c.bf16 %v77_v11, %v77_v11  ;;  %v135_v16 = vpack.c.bf16 %v130_v12, %v130_v12 }
  0xca   :  { %v79_v17 = vpop.f32.mrf.mxu0  ;;  %v132_v18 = vpop.f32.mrf.mxu1 }
  0xcb   :  { %84 = vst.msk [vmem:[%s233_s5] sm:$0xf] %vm83_vm2, %v82_v15  ;;  %136 = vst.msk [vmem:[%s234_s6] sm:$0xf] %vm83_vm2, %v135_v16 }
  0xcc   :  { %v157_v19 = vpop.f32.mrf.mxu0  ;;  %v163_v20 = vpop.f32.mrf.mxu1 }

// kernel: reverse.5
= control target key start
LH: loop header
LB: loop body
LE: loop exit
PB: predicated region body
PF: predicated region fallthrough
CT: control target
= control target key end

     0   :  { %v2_v0 = vlaneseq  ;;  %s354_s0 = inlined_call_operand.vmem [shape: f32[4,2,4,3], index: 0, kind: input, shape index: {}]   ;;  %s355_s1 = inlined_call_operand.vmem [shape: f32[4,2,4,3], index: 1, kind: output, shape index: {}]  }
   0x2   :  { %v3_v1 = vsub.s32 2, %v2_v0 }
   0x4   :  { %4 = vset.pattern.permute.xlu0 %v3_v1 }
   0x5   :  { %304 = vset.pattern.permute.xlu1 %v3_v1  ;;  %v25_v2 = vld [vmem:[%s354_s0 + $0x8] sm:$0xff]   ;;  %v21_v3 = vld [vmem:[%s354_s0] sm:$0xff]   ;;  %v31_v4 = vld [vmem:[%s354_s0 + $0x14] sm:$0xff]  }
   0x6   :  { %26 = vst [vmem:[#allocation1 + $0x8] sm:$0xff] %v25_v2   ;;  %22 = vst [vmem:[#allocation1] sm:$0xff] %v21_v3   ;;  %v29_v5 = vld [vmem:[%s354_s0 + $0x10] sm:$0xf]  ;;  %v35_v6 = vld [vmem:[%s354_s0 + $0x1c] sm:$0xf] }
   0x7   :  { %32 = vst [vmem:[#allocation1 + $0x14] sm:$0xff] %v31_v4   ;;  %30 = vst [vmem:[#allocation1 + $0x10] sm:$0xf] %v29_v5 }
   0x8   :  { %36 = vst [vmem:[#allocation1 + $0x1c] sm:$0xf] %v35_v6 }
   0xd   :  { %v104_v7 = vld [vmem:[#allocation1 + $0x8] sm:$0xf]  ;;  %v111_v8 = vld [vmem:[#allocation1] sm:$0xf]  ;;  %v99_v9 = vld [vmem:[#allocation1 + $0xc] sm:$0xf] }
   0xe   :  { %106 = vst [vmem:[#allocation0 + $0x18] sm:$0xf] %v104_v7  ;;  %112 = vst [vmem:[#allocation0] sm:$0xf] %v111_v8  ;;  %v108_v10 = vld [vmem:[#allocation1 + $0x4] sm:$0xf] }
   0xf   :  { %101 = vst [vmem:[#allocation0 + $0x30] sm:$0xf] %v99_v9  ;;  %v89_v11 = vld [vmem:[#allocation1 + $0x14] sm:$0xf]  ;;  %v94_v12 = vld [vmem:[#allocation1 + $0x10] sm:$0xf] }
  0x10   :  { %110 = vst [vmem:[#allocation0 + $0x10] sm:$0xf] %v108_v10  ;;  %91 = vst [vmem:[#allocation0 + $0x20] sm:$0xf] %v89_v11  ;;  %v79_v13 = vld [vmem:[#allocation1 + $0x1c] sm:$0xf] }
  0x11   :  { %96 = vst [vmem:[#allocation0 + $0x28] sm:$0xf] %v94_v12  ;;  %v84_v14 = vld [vmem:[#allocation1 + $0x18] sm:$0xf]  ;;  %81 = vst [vmem:[#allocation0 + $0x8] sm:$0xf] %v79_v13 }
  0x12   :  { %86 = vst [vmem:[#allocation0 + $0x38] sm:$0xf] %v84_v14 }
  0x15   :  { %v125_v15 = vld [vmem:[#allocation0 + $0x18] sm:$0xff]  ;;  %v113_v16 = vld [vmem:[#allocation0] sm:$0xff] }
  0x16   :  { %126 = vperm.xlu1 %304, %v125_v15   ;;  %114 = vperm.xlu0 %4, %v113_v16   ;;  %v131_v17 = vld [vmem:[#allocation0 + $0x30] sm:$0xff] }
  0x17   :  { %v119_v18 = vld [vmem:[#allocation0 + $0x10] sm:$0xff]  ;;  %v143_v19 = vld [vmem:[#allocation0 + $0x20] sm:$0xff] }
  0x18   :  { %v137_v20 = vld [vmem:[#allocation0 + $0x28] sm:$0xff] }
  0x19   :  { %v155_v21 = vld [vmem:[#allocation0 + $0x8] sm:$0xff]  ;;  %v149_v22 = vld [vmem:[#allocation0 + $0x38] sm:$0xff] }
  0x1a   :  { %132 = vperm.xlu1 %304, %v131_v17   ;;  %120 = vperm.xlu0 %4, %v119_v18  }
  0x1e   :  { %144 = vperm.xlu1 %304, %v143_v19   ;;  %138 = vperm.xlu0 %4, %v137_v20  }
  0x22   :  { %156 = vperm.xlu1 %304, %v155_v21   ;;  %150 = vperm.xlu0 %4, %v149_v22  }
  0x91   :  { %v127_v23 = vpop.permute.xlu1 %126  ;;  %v115_v24 = vpop.permute.xlu0 %114 }
  0x92   :  { %128 = vst [vmem:[#allocation2 + $0x10] sm:$0xff] %v127_v23  ;;  %116 = vst [vmem:[#allocation2] sm:$0xff] %v115_v24 }
  0x95   :  { %v133_v25 = vpop.permute.xlu1 %132  ;;  %v121_v26 = vpop.permute.xlu0 %120 }
  0x96   :  { %134 = vst [vmem:[#allocation2 + $0x20] sm:$0xff] %v133_v25  ;;  %122 = vst [vmem:[#allocation2 + $0x18] sm:$0xff] %v121_v26 }
  0x99   :  { %v174_v27 = vld [vmem:[#allocation2 + $0x10] sm:$0xf]  ;;  %v163_v28 = vld [vmem:[#allocation2] sm:$0xf]  ;;  %v145_v29 = vpop.permute.xlu1 %144  ;;  %v139_v30 = vpop.permute.xlu0 %138 }
  0x9a   :  { %179 = vst [vmem:[#allocation3 + $0x8] sm:$0xf] %v174_v27  ;;  %166 = vst [vmem:[#allocation3] sm:$0xf] %v163_v28 }
  0x9b   :  { %146 = vst [vmem:[#allocation2 + $0x8] sm:$0xff] %v145_v29  ;;  %140 = vst [vmem:[#allocation2 + $0x28] sm:$0xff] %v139_v30 }
  0x9d   :  { %v181_v31 = vld [vmem:[#allocation2 + $0x20] sm:$0xf]  ;;  %v168_v32 = vld [vmem:[#allocation2 + $0x18] sm:$0xf]  ;;  %v157_v33 = vpop.permute.xlu1 %156  ;;  %v151_v34 = vpop.permute.xlu0 %150 }
  0x9e   :  { %186 = vst [vmem:[#allocation3 + $0xc] sm:$0xf] %v181_v31  ;;  %172 = vst [vmem:[#allocation3 + $0x4] sm:$0xf] %v168_v32 }
  0x9f   :  { %158 = vst [vmem:[#allocation2 + $0x38] sm:$0xff] %v157_v33  ;;  %152 = vst [vmem:[#allocation2 + $0x30] sm:$0xff] %v151_v34 }
  0xa1   :  { %v235_v35 = vld [vmem:[#allocation3 + $0x8] sm:$0xf]  ;;  %v231_v36 = vld [vmem:[#allocation3] sm:$0xf] }
  0xa2   :  { %v195_v37 = vld [vmem:[#allocation2 + $0x8] sm:$0xf]  ;;  %236 = vst [vmem:[%s355_s1 + $0x8] sm:$0xf] %v235_v35  ;;  %232 = vst [vmem:[%s355_s1] sm:$0xf] %v231_v36 }
  0xa3   :  { %200 = vst [vmem:[#allocation3 + $0x14] sm:$0xf] %v195_v37  ;;  %v188_v38 = vld [vmem:[#allocation2 + $0x28] sm:$0xf] }
  0xa4   :  { %193 = vst [vmem:[#allocation3 + $0x10] sm:$0xf] %v188_v38 }
  0xa5   :  { %v237_v39 = vld [vmem:[#allocation3 + $0xc] sm:$0xf]  ;;  %v233_v40 = vld [vmem:[#allocation3 + $0x4] sm:$0xf] }
  0xa6   :  { %v209_v41 = vld [vmem:[#allocation2 + $0x38] sm:$0xf]  ;;  %238 = vst [vmem:[%s355_s1 + $0xc] sm:$0xf] %v237_v39  ;;  %234 = vst [vmem:[%s355_s1 + $0x4] sm:$0xf] %v233_v40 }
  0xa7   :  { %214 = vst [vmem:[#allocation3 + $0x1c] sm:$0xf] %v209_v41  ;;  %v202_v42 = vld [vmem:[#allocation2 + $0x30] sm:$0xf] }
  0xa8   :  { %207 = vst [vmem:[#allocation3 + $0x18] sm:$0xf] %v202_v42 }
  0xaa   :  { %v241_v43 = vld [vmem:[#allocation3 + $0x14] sm:$0xf] }
  0xab   :  { %242 = vst [vmem:[%s355_s1 + $0x14] sm:$0xf] %v241_v43  ;;  %v239_v44 = vld [vmem:[#allocation3 + $0x10] sm:$0xf] }
  0xac   :  { %240 = vst [vmem:[%s355_s1 + $0x10] sm:$0xf] %v239_v44 }
  0xae   :  { %v245_v45 = vld [vmem:[#allocation3 + $0x1c] sm:$0xf] }
  0xaf   :  { %246 = vst [vmem:[%s355_s1 + $0x1c] sm:$0xf] %v245_v45  ;;  %v243_v46 = vld [vmem:[#allocation3 + $0x18] sm:$0xf] }
  0xb0   :  { %244 = vst [vmem:[%s355_s1 + $0x18] sm:$0xf] %v243_v46 }

// kernel: residual_block_forward.22
= control target key start
LH: loop header
LB: loop body
LE: loop exit
PB: predicated region body
PF: predicated region fallthrough
CT: control target
= control target key end

     0   :  { %vm33_vm0 = vcmask 1041408   ;;  %v160_v0 = vmov 0.0   ;;  %vm161_vm1 = vmmov 0   ;;  %v162_v3 = vmov 0   ;;  %s215_s0 = inlined_call_operand.vmem [shape: bf16[4,40], index: 0, kind: input, shape index: {}]   ;;  %s216_s1 = inlined_call_operand.vmem [shape: bf16[4,4], index: 1, kind: input, shape index: {}]   ;;  %s217_s2 = inlined_call_operand.vmem [shape: f32[4,1], index: 2, kind: input, shape index: {}]   ;;  %s218_s4 = inlined_call_operand.vmem [shape: f32[4,1], index: 4, kind: input, shape index: {}]   ;;  %s219_s3 = inlined_call_operand.vmem [shape: bf16[4,4], index: 3, kind: input, shape index: {}]   ;;  %s220_s5 = inlined_call_operand.vmem [shape: f32[4,40], index: 5, kind: output, shape index: {}]  }
   0x1   :  { %144 = vmatprep.subr.bf16.mxu0 %v160_v0  ;;  %v22_v1 = vld [vmem:[%s215_s0] sm:$0x3]  ;;  %146 = vmatprep.mubr.msk.bf16.mxu0 %vm161_vm1, %v160_v0  ;;  %vm29_vm2 = vcmask 31744   ;;  %vm132_vm3 = vcmask 322560  }
   0x2   :  { %v35_v2 = vsel %vm33_vm0, %v22_v1, 0  ;;  %159 = vset.pattern.permute.xlu0 %v162_v3  ;;  %v23_v4 = vld [vmem:[%s217_s2] sm:$0xf]  ;;  %150 = vmatprep.subr.bf16.mxu1 %v160_v0 }
   0x3   :  { %145 = vmatpush3.bf16.msra.mxu0 %v35_v2  ;;  %v21_v5 = vld [vmem:[%s216_s1] sm:$0x3]  ;;  %26 = vperm.xlu0 %159, %v23_v4  }
   0x4   :  { %v80_v6 = vld [vmem:[%s218_s4] sm:$0xf]  ;;  %152 = vmatprep.mubr.msk.bf16.mxu1 %vm161_vm1, %v160_v0 }
   0x5   :  { %v78_v16 = vld [vmem:[%s219_s3] sm:$0x3] }
   0x6   :  { %147 = vmatmul.mubr.msk.bf16.vlgmr.msra.gmra.mxu0 %vm29_vm2, %v21_v5 }
   0x7   :  { %83 = vperm.xlu0 %159, %v80_v6  }
  0x7e   :  { %v27_v7 = vpop.permute.xlu0 %26 }
  0x82   :  { %v84_v17 = vpop.permute.xlu0 %83 }
  0xc6   :  { %v71_v8 = vpop.f32.mrf.mxu0 }
  0xc7   :  { %v72_v9 = vadd.f32 %v71_v8, %v27_v7 }
  0xc8   :  { %v148_v10 = vpop.f32.mrf.mxu0 }
  0xc9   :  { %v77_v11 = vmax.f32 %v72_v9, 0.0 }
  0xca   :  { %v74_v12 = vpop.f32.mrf.mxu0 }
  0xcb   :  { %v79_v13 = vpack.c.bf16 %v77_v11, %v77_v11 }
  0xcc   :  { %v149_v14 = vpop.f32.mrf.mxu0 }
  0xcd   :  { %v90_v15 = vsel %vm33_vm0, %v79_v13, 0 }
  0xce   :  { %151 = vmatpush3.bf16.msra.mxu1 %v90_v15 }
  0xd1   :  { %153 = vmatmul.mubr.msk.bf16.vlgmr.msra.gmra.mxu1 %vm29_vm2, %v78_v16 }
 0x191   :  { %v126_v18 = vpop.f32.mrf.mxu1 }
 0x192   :  { %v127_v19 = vadd.f32 %v126_v18, %v84_v17 }
 0x193   :  { %v154_v20 = vpop.f32.mrf.mxu1 }
 0x194   :  { %133 = vst.msk [vmem:[%s220_s5] sm:$0xf] %vm132_vm3, %v127_v19 }
 0x195   :  { %v129_v21 = vpop.f32.mrf.mxu1 }
 0x197   :  { %v155_v22 = vpop.f32.mrf.mxu1 }

// kernel: residual_block_forward.23
= control target key start
LH: loop header
LB: loop body
LE: loop exit
PB: predicated region body
PF: predicated region fallthrough
CT: control target
= control target key end

     0   :  { %vm29_vm0 = vcmask 1041408   ;;  %v154_v0 = vmov 0.0   ;;  %vm155_vm1 = vmmov 0   ;;  %vm25_vm2 = vcmask 31744   ;;  %s205_s1 = inlined_call_operand.vmem [shape: bf16[4,64], index: 1, kind: input, shape index: {}]   ;;  %s206_s0 = inlined_call_operand.vmem [shape: bf16[4,64], index: 0, kind: input, shape index: {}]   ;;  %s207_s3 = inlined_call_operand.vmem [shape: bf16[4,4], index: 3, kind: input, shape index: {}]   ;;  %s208_s2 = inlined_call_operand.vmem [shape: bf16[4,4], index: 2, kind: input, shape index: {}]   ;;  %s209_s4 = inlined_call_operand.vmem [shape: f32[4,1], index: 4, kind: input, shape index: {}]   ;;  %s210_s5 = inlined_call_operand.vmem [shape: f32[4,64], index: 5, kind: output, shape index: {}]  }
   0x1   :  { %138 = vmatprep.subr.bf16.mxu0 %v154_v0  ;;  %144 = vmatprep.subr.bf16.mxu1 %v154_v0  ;;  %v24_v1 = vld [vmem:[%s205_s1] sm:$0x3]  ;;  %v156_v8 = vmov 0   ;;  %vm126_vm3 = vcmask 519168  }
   0x2   :  { %v22_v2 = vld [vmem:[%s206_s0] sm:$0x3]  ;;  %v31_v3 = vsel %vm29_vm0, %v24_v1, 0  ;;  %140 = vmatprep.mubr.msk.bf16.mxu0 %vm155_vm1, %v154_v0  ;;  %146 = vmatprep.mubr.msk.bf16.mxu1 %vm155_vm1, %v154_v0 }
   0x3   :  { %v77_v4 = vsel %vm29_vm0, %v22_v2, 0  ;;  %139 = vmatpush3.bf16.msra.mxu0 %v31_v3  ;;  %v23_v5 = vld [vmem:[%s207_s3] sm:$0x3]  ;;  %153 = vset.pattern.permute.xlu0 %v156_v8 }
   0x4   :  { %145 = vmatpush3.bf16.msra.mxu1 %v77_v4  ;;  %v21_v6 = vld [vmem:[%s208_s2] sm:$0x3] }
   0x5   :  { %v119_v7 = vld [vmem:[%s209_s4] sm:$0xf] }
   0x6   :  { %122 = vperm.xlu0 %153, %v119_v7   ;;  %141 = vmatmul.mubr.msk.bf16.vlgmr.msra.gmra.mxu0 %vm25_vm2, %v23_v5 }
   0x7   :  { %147 = vmatmul.mubr.msk.bf16.vlgmr.msra.gmra.mxu1 %vm25_vm2, %v21_v6 }
  0x81   :  { %v123_v9 = vpop.permute.xlu0 %122 }
  0xc6   :  { %v67_v10 = vpop.f32.mrf.mxu0 }
  0xc7   :  { %v113_v11 = vpop.f32.mrf.mxu1 }
  0xc8   :  { %v114_v12 = vadd.f32 %v113_v11, %v67_v10  ;;  %v142_v13 = vpop.f32.mrf.mxu0 }
  0xc9   :  { %v148_v14 = vpop.f32.mrf.mxu1 }
  0xca   :  { %v125_v15 = vadd.f32 %v123_v9, %v114_v12  ;;  %v70_v16 = vpop.f32.mrf.mxu0 }
  0xcb   :  { %v116_v17 = vpop.f32.mrf.mxu1 }
  0xcc   :  { %127 = vst.msk [vmem:[%s210_s5] sm:$0xf] %vm126_vm3, %v125_v15  ;;  %v143_v18 = vpop.f32.mrf.mxu0 }
  0xcd   :  { %v149_v19 = vpop.f32.mrf.mxu1 }

// kernel: residual_block_forward.24
= control target key start
LH: loop header
LB: loop body
LE: loop exit
PB: predicated region body
PF: predicated region fallthrough
CT: control target
= control target key end

     0   :  { %vm27_vm0 = vcmask 1041408   ;;  %v90_v0 = vmov 0.0   ;;  %vm91_vm1 = vmmov 0   ;;  %v92_v3 = vmov 0   ;;  %s125_s0 = inlined_call_operand.vmem [shape: bf16[4,64], index: 0, kind: input, shape index: {}]   ;;  %s126_s1 = inlined_call_operand.vmem [shape: bf16[4,4], index: 1, kind: input, shape index: {}]   ;;  %s127_s2 = inlined_call_operand.vmem [shape: f32[4,1], index: 2, kind: input, shape index: {}]   ;;  %s128_s3 = inlined_call_operand.vmem [shape: f32[4,64], index: 3, kind: output, shape index: {}]  }
   0x1   :  { %80 = vmatprep.subr.bf16.mxu0 %v90_v0  ;;  %v16_v1 = vld [vmem:[%s125_s0] sm:$0x3]  ;;  %82 = vmatprep.mubr.msk.bf16.mxu0 %vm91_vm1, %v90_v0  ;;  %vm23_vm2 = vcmask 31744   ;;  %vm71_vm3 = vcmask 519168  }
   0x2   :  { %v29_v2 = vsel %vm27_vm0, %v16_v1, 0  ;;  %89 = vset.pattern.permute.xlu0 %v92_v3  ;;  %v17_v4 = vld [vmem:[%s127_s2] sm:$0xf] }
   0x3   :  { %81 = vmatpush3.bf16.msra.mxu0 %v29_v2  ;;  %v15_v5 = vld [vmem:[%s126_s1] sm:$0x3]  ;;  %20 = vperm.xlu0 %89, %v17_v4  }
   0x6   :  { %83 = vmatmul.mubr.msk.bf16.vlgmr.msra.gmra.mxu0 %vm23_vm2, %v15_v5 }
  0x7e   :  { %v21_v6 = vpop.permute.xlu0 %20 }
  0xc6   :  { %v65_v7 = vpop.f32.mrf.mxu0 }
  0xc7   :  { %v66_v8 = vadd.f32 %v65_v7, %v21_v6 }
  0xc8   :  { %v84_v9 = vpop.f32.mrf.mxu0 }
  0xc9   :  { %72 = vst.msk [vmem:[%s128_s3] sm:$0xf] %vm71_vm3, %v66_v8 }
  0xca   :  { %v68_v10 = vpop.f32.mrf.mxu0 }
  0xcc   :  { %v85_v11 = vpop.f32.mrf.mxu0 }

// kernel: residual_block_forward.21
= control target key start
LH: loop header
LB: loop body
LE: loop exit
PB: predicated region body
PF: predicated region fallthrough
CT: control target
= control target key end

     0   :  { %vm74_vm0 = vcmask 31744   ;;  %v5567_v0 = vmov 0.0   ;;  %vm5568_vm1 = vmmov 0   ;;  %vm1547_vm6 = vcmask 36864   ;;  %s6924_s2 = inlined_call_operand.vmem [shape: bf16[8,5,4], index: 2, kind: input, shape index: {}]   ;;  %s6925_s0 = inlined_call_operand.vmem [shape: bf16[2,8,5,4], index: 0, kind: input, shape index: {}]   ;;  %s6926_s3 = inlined_call_operand.vmem [shape: bf16[8,5,4], index: 3, kind: input, shape index: {}]   ;;  %s6927_s1 = inlined_call_operand.vmem [shape: bf16[2,8,5,4], index: 1, kind: input, shape index: {}]   ;;  %s6928_s4 = inlined_call_operand.vmem [shape: bf16[8,5,4], index: 4, kind: input, shape index: {}]   ;;  %s6929_s5 = inlined_call_operand.vmem [shape: bf16[8,5,4], index: 5, kind: input, shape index: {}]   ;;  %s6930_s6 = inlined_call_operand.vmem [shape: f32[8,5,4], index: 6, kind: output, shape index: {0}]   ;;  %s6931_s7 = inlined_call_operand.vmem [shape: f32[8,5,4], index: 7, kind: output, shape index: {1}]  }
   0x1   :  { %4892 = vmatprep.subr.bf16.mxu0 %v5567_v0  ;;  %4898 = vmatprep.subr.bf16.mxu1 %v5567_v0  ;;  %v26_v1 = vld [vmem:[%s6924_s2] sm:$0x7]  ;;  %v27_v2 = vld [vmem:[%s6924_s2 + $0x4] sm:$0x7]  ;;  %v28_v5 = vld [vmem:[%s6924_s2 + $0x8] sm:$0x7] }
   0x2   :  { %v5619_v3 = vsel %vm74_vm0, %v26_v1, 0  ;;  %v5622_v4 = vsel %vm74_vm0, %v27_v2, 0  ;;  %4894 = vmatprep.mubr.msk.bf16.mxu0 %vm5568_vm1, %v5567_v0  ;;  %4900 = vmatprep.mubr.msk.bf16.mxu1 %vm5568_vm1, %v5567_v0  ;;  %v29_v6 = vld [vmem:[%s6924_s2 + $0xc] sm:$0x7]  ;;  %v5641_v7 = vld [vmem:[%s6925_s0] sm:$0x7] }
   0x3   :  { %4893 = vmatpush3.bf16.xpose.msra.mxu0 %v5619_v3  ;;  %4899 = vmatpush3.bf16.xpose.msra.mxu1 %v5622_v4  ;;  %v5646_v8 = vld [vmem:[%s6925_s0 + $0x4] sm:$0x7]  ;;  %v5649_v9 = vsel %vm74_vm0, %v28_v5, 0  ;;  %v5652_v10 = vsel %vm74_vm0, %v29_v6, 0  ;;  %v30_v11 = vld [vmem:[%s6924_s2 + $0x10] sm:$0x7] }
   0x4   :  { %4904 = vmatprep.subr.bf16.mxu0 %v5567_v0  ;;  %4910 = vmatprep.subr.bf16.mxu1 %v5567_v0  ;;  %v31_v12 = vld [vmem:[%s6924_s2 + $0x14] sm:$0x7]  ;;  %v5675_v13 = vld [vmem:[%s6925_s0 + $0x8] sm:$0x7]  ;;  %v5680_v14 = vld [vmem:[%s6925_s0 + $0xc] sm:$0x7] }
   0x5   :  { %v5683_v15 = vsel %vm74_vm0, %v30_v11, 0  ;;  %v5686_v16 = vsel %vm74_vm0, %v31_v12, 0  ;;  %v32_v17 = vld [vmem:[%s6924_s2 + $0x18] sm:$0x7]  ;;  %v33_v18 = vld [vmem:[%s6924_s2 + $0x1c] sm:$0x7] }
   0x6   :  { %v5709_v19 = vld [vmem:[%s6925_s0 + $0x10] sm:$0x7]  ;;  %v5714_v20 = vld [vmem:[%s6925_s0 + $0x14] sm:$0x7]  ;;  %v5717_v21 = vsel %vm74_vm0, %v32_v17, 0  ;;  %v5720_v22 = vsel %vm74_vm0, %v33_v18, 0 }
   0x7   :  { %v34_v23 = vld [vmem:[%s6926_s3] sm:$0x7]  ;;  %v35_v24 = vld [vmem:[%s6926_s3 + $0x4] sm:$0x7]  ;;  %v5743_v25 = vld [vmem:[%s6925_s0 + $0x18] sm:$0x7] }
   0x8   :  { %v5748_v26 = vld [vmem:[%s6925_s0 + $0x1c] sm:$0x7]  ;;  %v5751_v27 = vsel %vm74_vm0, %v34_v23, 0  ;;  %v5754_v28 = vsel %vm74_vm0, %v35_v24, 0  ;;  %v36_v29 = vld [vmem:[%s6926_s3 + $0x8] sm:$0x7] }
   0x9   :  { %v37_v30 = vld [vmem:[%s6926_s3 + $0xc] sm:$0x7]  ;;  %v66_v31 = vld [vmem:[%s6927_s1] sm:$0x7]  ;;  %v67_v32 = vld [vmem:[%s6927_s1 + $0x4] sm:$0x7] }
   0xa   :  { %4895 = vmatmul.mubr.msk.bf16.vlgmr.msra.gmra.mxu0 %vm74_vm0, %v5641_v7  ;;  %4901 = vmatmul.mubr.msk.bf16.vlgmr.msra.gmra.mxu1 %vm74_vm0, %v5646_v8  ;;  %v5781_v33 = vsel %vm74_vm0, %v36_v29, 0  ;;  %v5784_v34 = vsel %vm74_vm0, %v37_v30, 0  ;;  %v38_v35 = vld [vmem:[%s6926_s3 + $0x10] sm:$0x7]  ;;  %v39_v36 = vld [vmem:[%s6926_s3 + $0x14] sm:$0x7] }
   0xb   :  { %4905 = vmatpush3.bf16.xpose.msra.mxu0 %v5649_v9  ;;  %4911 = vmatpush3.bf16.xpose.msra.mxu1 %v5652_v10  ;;  %v68_v37 = vld [vmem:[%s6927_s1 + $0x8] sm:$0x7]  ;;  %v69_v38 = vld [vmem:[%s6927_s1 + $0xc] sm:$0x7]  ;;  %v5809_v39 = vsel %vm74_vm0, %v38_v35, 0  ;;  %v5812_v40 = vsel %vm74_vm0, %v39_v36, 0 }
   0xc   :  { %4906 = vmatprep.mubr.msk.bf16.mxu0 %vm5568_vm1, %v5567_v0  ;;  %4912 = vmatprep.mubr.msk.bf16.mxu1 %vm5568_vm1, %v5567_v0  ;;  %v40_v41 = vld [vmem:[%s6926_s3 + $0x18] sm:$0x7]  ;;  %v41_v42 = vld [vmem:[%s6926_s3 + $0x1c] sm:$0x7]  ;;  %v70_v43 = vld [vmem:[%s6927_s1 + $0x10] sm:$0x7] }
   0xd   :  { %4916 = vmatprep.subr.bf16.mxu0 %v5567_v0  ;;  %4922 = vmatprep.subr.bf16.mxu1 %v5567_v0  ;;  %v71_v44 = vld [vmem:[%s6927_s1 + $0x14] sm:$0x7]  ;;  %v5837_v45 = vsel %vm74_vm0, %v40_v41, 0  ;;  %v5840_v46 = vsel %vm74_vm0, %v41_v42, 0  ;;  %v72_v47 = vld [vmem:[%s6927_s1 + $0x18] sm:$0x7] }
   0xe   :  { %v73_v48 = vld [vmem:[%s6927_s1 + $0x1c] sm:$0x7]  ;;  %v5959_v49 = vld [vmem:[%s6925_s0 + $0x20] sm:$0x7]  ;;  %v5964_v50 = vld [vmem:[%s6925_s0 + $0x24] sm:$0x7] }
   0xf   :  { %v5981_v51 = vld [vmem:[%s6925_s0 + $0x28] sm:$0x7]  ;;  %v5986_v52 = vld [vmem:[%s6925_s0 + $0x2c] sm:$0x7]  ;;  %v6003_v53 = vld [vmem:[%s6925_s0 + $0x30] sm:$0x7] }
  0x10   :  { %v6008_v54 = vld [vmem:[%s6925_s0 + $0x34] sm:$0x7]  ;;  %v6025_v55 = vld [vmem:[%s6925_s0 + $0x38] sm:$0x7]  ;;  %v6030_v56 = vld [vmem:[%s6925_s0 + $0x3c] sm:$0x7] }
  0x11   :  { %v4628_v57 = vld [vmem:[%s6927_s1 + $0x20] sm:$0x7]  ;;  %v4629_v58 = vld [vmem:[%s6927_s1 + $0x24] sm:$0x7]  ;;  %v4630_v59 = vld [vmem:[%s6927_s1 + $0x28] sm:$0x7] }
  0x12   :  { %4907 = vmatmul.mubr.msk.bf16.vlgmr.msra.gmra.mxu0 %vm74_vm0, %v5675_v13  ;;  %4913 = vmatmul.mubr.msk.bf16.vlgmr.msra.gmra.mxu1 %vm74_vm0, %v5680_v14  ;;  %v4631_v60 = vld [vmem:[%s6927_s1 + $0x2c] sm:$0x7]  ;;  %v4632_v61 = vld [vmem:[%s6927_s1 + $0x30] sm:$0x7]  ;;  %v4633_v62 = vld [vmem:[%s6927_s1 + $0x34] sm:$0x7] }
  0x13   :  { %4917 = vmatpush3.bf16.xpose.msra.mxu0 %v5683_v15  ;;  %4923 = vmatpush3.bf16.xpose.msra.mxu1 %v5686_v16  ;;  %v4634_v63 = vld [vmem:[%s6927_s1 + $0x38] sm:$0x7]  ;;  %v4635_v1 = vld [vmem:[%s6927_s1 + $0x3c] sm:$0x7] }
  0x14   :  { %4918 = vmatprep.mubr.msk.bf16.mxu0 %vm5568_vm1, %v5567_v0  ;;  %4924 = vmatprep.mubr.msk.bf16.mxu1 %vm5568_vm1, %v5567_v0 }
  0x15   :  { %4928 = vmatprep.subr.bf16.mxu0 %v5567_v0  ;;  %4934 = vmatprep.subr.bf16.mxu1 %v5567_v0 }
  0x1a   :  { %4919 = vmatmul.mubr.msk.bf16.vlgmr.msra.gmra.mxu0 %vm74_vm0, %v5709_v19  ;;  %4925 = vmatmul.mubr.msk.bf16.vlgmr.msra.gmra.mxu1 %vm74_vm0, %v5714_v20 }
  0x1b   :  { %4929 = vmatpush3.bf16.xpose.msra.mxu0 %v5717_v21  ;;  %4935 = vmatpush3.bf16.xpose.msra.mxu1 %v5720_v22 }
  0x1c   :  { %4930 = vmatprep.mubr.msk.bf16.mxu0 %vm5568_vm1, %v5567_v0  ;;  %4936 = vmatprep.mubr.msk.bf16.mxu1 %vm5568_vm1, %v5567_v0 }
  0x1d   :  { %4940 = vmatprep.subr.bf16.mxu0 %v5567_v0  ;;  %4946 = vmatprep.subr.bf16.mxu1 %v5567_v0 }
  0x22   :  { %4931 = vmatmul.mubr.msk.bf16.vlgmr.msra.gmra.mxu0 %vm74_vm0, %v5743_v25  ;;  %4937 = vmatmul.mubr.msk.bf16.vlgmr.msra.gmra.mxu1 %vm74_vm0, %v5748_v26 }
  0x23   :  { %4941 = vmatpush3.bf16.xpose.msra.mxu0 %v5751_v27  ;;  %4947 = vmatpush3.bf16.xpose.msra.mxu1 %v5754_v28 }
  0x24   :  { %4942 = vmatprep.mubr.msk.bf16.mxu0 %vm5568_vm1, %v5567_v0  ;;  %4948 = vmatprep.mubr.msk.bf16.mxu1 %vm5568_vm1, %v5567_v0 }
  0x25   :  { %4952 = vmatprep.subr.bf16.mxu0 %v5567_v0  ;;  %4958 = vmatprep.subr.bf16.mxu1 %v5567_v0 }
  0x2a   :  { %4943 = vmatmul.mubr.msk.bf16.vlgmr.msra.gmra.mxu0 %vm74_vm0, %v66_v31  ;;  %4949 = vmatmul.mubr.msk.bf16.vlgmr.msra.gmra.mxu1 %vm74_vm0, %v67_v32 }
  0x2b   :  { %4953 = vmatpush3.bf16.xpose.msra.mxu0 %v5781_v33  ;;  %4959 = vmatpush3.bf16.xpose.msra.mxu1 %v5784_v34 }
  0x2c   :  { %4954 = vmatprep.mubr.msk.bf16.mxu0 %vm5568_vm1, %v5567_v0  ;;  %4960 = vmatprep.mubr.msk.bf16.mxu1 %vm5568_vm1, %v5567_v0 }
  0x2d   :  { %4964 = vmatprep.subr.bf16.mxu0 %v5567_v0  ;;  %4970 = vmatprep.subr.bf16.mxu1 %v5567_v0 }
  0x32   :  { %4955 = vmatmul.mubr.msk.bf16.vlgmr.msra.gmra.mxu0 %vm74_vm0, %v68_v37  ;;  %4961 = vmatmul.mubr.msk.bf16.vlgmr.msra.gmra.mxu1 %vm74_vm0, %v69_v38 }
  0x33   :  { %4965 = vmatpush3.bf16.xpose.msra.mxu0 %v5809_v39  ;;  %4971 = vmatpush3.bf16.xpose.msra.mxu1 %v5812_v40 }
  0x34   :  { %4966 = vmatprep.mubr.msk.bf16.mxu0 %vm5568_vm1, %v5567_v0  ;;  %4972 = vmatprep.mubr.msk.bf16.mxu1 %vm5568_vm1, %v5567_v0 }
  0x35   :  { %4976 = vmatprep.subr.bf16.mxu0 %v5567_v0  ;;  %4982 = vmatprep.subr.bf16.mxu1 %v5567_v0 }
  0x3a   :  { %4967 = vmatmul.mubr.msk.bf16.vlgmr.msra.gmra.mxu0 %vm74_vm0, %v70_v43  ;;  %4973 = vmatmul.mubr.msk.bf16.vlgmr.msra.gmra.mxu1 %vm74_vm0, %v71_v44 }
  0x3b   :  { %4977 = vmatpush3.bf16.xpose.msra.mxu0 %v5837_v45  ;;  %4983 = vmatpush3.bf16.xpose.msra.mxu1 %v5840_v46 }
  0x3c   :  { %4978 = vmatprep.mubr.msk.bf16.mxu0 %vm5568_vm1, %v5567_v0  ;;  %4984 = vmatprep.mubr.msk.bf16.mxu1 %vm5568_vm1, %v5567_v0 }
  0x3d   :  { %4988 = vmatprep.subr.bf16.mxu0 %v5567_v0  ;;  %4994 = vmatprep.subr.bf16.mxu1 %v5567_v0 }
  0x42   :  { %4979 = vmatmul.mubr.msk.bf16.vlgmr.msra.gmra.mxu0 %vm74_vm0, %v72_v47  ;;  %4985 = vmatmul.mubr.msk.bf16.vlgmr.msra.gmra.mxu1 %vm74_vm0, %v73_v48 }
  0x43   :  { %4989 = vmatpush3.bf16.xpose.msra.mxu0 %v5619_v3  ;;  %4995 = vmatpush3.bf16.xpose.msra.mxu1 %v5622_v4 }
  0x44   :  { %4990 = vmatprep.mubr.msk.bf16.mxu0 %vm5568_vm1, %v5567_v0  ;;  %4996 = vmatprep.mubr.msk.bf16.mxu1 %vm5568_vm1, %v5567_v0 }
  0x45   :  { %5000 = vmatprep.subr.bf16.mxu0 %v5567_v0  ;;  %5006 = vmatprep.subr.bf16.mxu1 %v5567_v0 }
  0x4a   :  { %4991 = vmatmul.mubr.msk.bf16.vlgmr.msra.gmra.mxu0 %vm74_vm0, %v66_v31  ;;  %4997 = vmatmul.mubr.msk.bf16.vlgmr.msra.gmra.mxu1 %vm74_vm0, %v67_v32 }
  0x4b   :  { %5001 = vmatpush3.bf16.xpose.msra.mxu0 %v5649_v9  ;;  %5007 = vmatpush3.bf16.xpose.msra.mxu1 %v5652_v10 }
  0x4c   :  { %5002 = vmatprep.mubr.msk.bf16.mxu0 %vm5568_vm1, %v5567_v0  ;;  %5008 = vmatprep.mubr.msk.bf16.mxu1 %vm5568_vm1, %v5567_v0 }
  0x4d   :  { %5012 = vmatprep.subr.bf16.mxu0 %v5567_v0  ;;  %5018 = vmatprep.subr.bf16.mxu1 %v5567_v0 }
  0x52   :  { %5003 = vmatmul.mubr.msk.bf16.vlgmr.msra.gmra.mxu0 %vm74_vm0, %v68_v37  ;;  %5009 = vmatmul.mubr.msk.bf16.vlgmr.msra.gmra.mxu1 %vm74_vm0, %v69_v38 }
  0x53   :  { %5013 = vmatpush3.bf16.xpose.msra.mxu0 %v5683_v15  ;;  %5019 = vmatpush3.bf16.xpose.msra.mxu1 %v5686_v16 }
  0x54   :  { %5014 = vmatprep.mubr.msk.bf16.mxu0 %vm5568_vm1, %v5567_v0  ;;  %5020 = vmatprep.mubr.msk.bf16.mxu1 %vm5568_vm1, %v5567_v0 }
  0x55   :  { %5024 = vmatprep.subr.bf16.mxu0 %v5567_v0  ;;  %5030 = vmatprep.subr.bf16.mxu1 %v5567_v0 }
  0x5a   :  { %5015 = vmatmul.mubr.msk.bf16.vlgmr.msra.gmra.mxu0 %vm74_vm0, %v70_v43  ;;  %5021 = vmatmul.mubr.msk.bf16.vlgmr.msra.gmra.mxu1 %vm74_vm0, %v71_v44 }
  0x5b   :  { %5025 = vmatpush3.bf16.xpose.msra.mxu0 %v5717_v21  ;;  %5031 = vmatpush3.bf16.xpose.msra.mxu1 %v5720_v22 }
  0x5c   :  { %5026 = vmatprep.mubr.msk.bf16.mxu0 %vm5568_vm1, %v5567_v0  ;;  %5032 = vmatprep.mubr.msk.bf16.mxu1 %vm5568_vm1, %v5567_v0 }
  0x5d   :  { %5036 = vmatprep.subr.bf16.mxu0 %v5567_v0  ;;  %5042 = vmatprep.subr.bf16.mxu1 %v5567_v0 }
  0x62   :  { %5027 = vmatmul.mubr.msk.bf16.vlgmr.msra.gmra.mxu0 %vm74_vm0, %v72_v47  ;;  %5033 = vmatmul.mubr.msk.bf16.vlgmr.msra.gmra.mxu1 %vm74_vm0, %v73_v48 }
  0x63   :  { %5037 = vmatpush3.bf16.xpose.msra.mxu0 %v5751_v27  ;;  %5043 = vmatpush3.bf16.xpose.msra.mxu1 %v5754_v28 }
  0x64   :  { %5038 = vmatprep.mubr.msk.bf16.mxu0 %vm5568_vm1, %v5567_v0  ;;  %5044 = vmatprep.mubr.msk.bf16.mxu1 %vm5568_vm1, %v5567_v0 }
  0x65   :  { %5048 = vmatprep.subr.bf16.mxu0 %v5567_v0  ;;  %5054 = vmatprep.subr.bf16.mxu1 %v5567_v0 }
  0x6a   :  { %5039 = vmatmul.mubr.msk.bf16.vlgmr.msra.gmra.mxu0 %vm74_vm0, %v5641_v7  ;;  %5045 = vmatmul.mubr.msk.bf16.vlgmr.msra.gmra.mxu1 %vm74_vm0, %v5646_v8 }
  0x6b   :  { %5049 = vmatpush3.bf16.xpose.msra.mxu0 %v5781_v33  ;;  %5055 = vmatpush3.bf16.xpose.msra.mxu1 %v5784_v34 }
  0x6c   :  { %5050 = vmatprep.mubr.msk.bf16.mxu0 %vm5568_vm1, %v5567_v0  ;;  %5056 = vmatprep.mubr.msk.bf16.mxu1 %vm5568_vm1, %v5567_v0 }
  0x6d   :  { %5060 = vmatprep.subr.bf16.mxu0 %v5567_v0  ;;  %5066 = vmatprep.subr.bf16.mxu1 %v5567_v0 }
  0x72   :  { %5051 = vmatmul.mubr.msk.bf16.vlgmr.msra.gmra.mxu0 %vm74_vm0, %v5675_v13  ;;  %5057 = vmatmul.mubr.msk.bf16.vlgmr.msra.gmra.mxu1 %vm74_vm0, %v5680_v14 }
  0x73   :  { %5061 = vmatpush3.bf16.xpose.msra.mxu0 %v5809_v39  ;;  %5067 = vmatpush3.bf16.xpose.msra.mxu1 %v5812_v40 }
  0x74   :  { %5062 = vmatprep.mubr.msk.bf16.mxu0 %vm5568_vm1, %v5567_v0  ;;  %5068 = vmatprep.mubr.msk.bf16.mxu1 %vm5568_vm1, %v5567_v0 }
  0x75   :  { %5072 = vmatprep.subr.bf16.mxu0 %v5567_v0  ;;  %5078 = vmatprep.subr.bf16.mxu1 %v5567_v0 }
  0x7a   :  { %5063 = vmatmul.mubr.msk.bf16.vlgmr.msra.gmra.mxu0 %vm74_vm0, %v5709_v19  ;;  %5069 = vmatmul.mubr.msk.bf16.vlgmr.msra.gmra.mxu1 %vm74_vm0, %v5714_v20 }
  0x7b   :  { %5073 = vmatpush3.bf16.xpose.msra.mxu0 %v5837_v45  ;;  %5079 = vmatpush3.bf16.xpose.msra.mxu1 %v5840_v46 }
  0x7c   :  { %5074 = vmatprep.mubr.msk.bf16.mxu0 %vm5568_vm1, %v5567_v0  ;;  %5080 = vmatprep.mubr.msk.bf16.mxu1 %vm5568_vm1, %v5567_v0 }
  0x7d   :  { %5084 = vmatprep.subr.bf16.mxu0 %v5567_v0  ;;  %5090 = vmatprep.subr.bf16.mxu1 %v5567_v0 }
  0x82   :  { %5075 = vmatmul.mubr.msk.bf16.vlgmr.msra.gmra.mxu0 %vm74_vm0, %v5743_v25  ;;  %5081 = vmatmul.mubr.msk.bf16.vlgmr.msra.gmra.mxu1 %vm74_vm0, %v5748_v26 }
  0x83   :  { %5085 = vmatpush3.bf16.xpose.msra.mxu0 %v5619_v3  ;;  %5091 = vmatpush3.bf16.xpose.msra.mxu1 %v5622_v4 }
  0x84   :  { %5086 = vmatprep.mubr.msk.bf16.mxu0 %vm5568_vm1, %v5567_v0  ;;  %5092 = vmatprep.mubr.msk.bf16.mxu1 %vm5568_vm1, %v5567_v0 }
  0x85   :  { %5096 = vmatprep.subr.bf16.mxu0 %v5567_v0  ;;  %5102 = vmatprep.subr.bf16.mxu1 %v5567_v0 }
  0x8a   :  { %5087 = vmatmul.mubr.msk.bf16.vlgmr.msra.gmra.mxu0 %vm74_vm0, %v5959_v49  ;;  %5093 = vmatmul.mubr.msk.bf16.vlgmr.msra.gmra.mxu1 %vm74_vm0, %v5964_v50 }
  0x8b   :  { %5097 = vmatpush3.bf16.xpose.msra.mxu0 %v5649_v9  ;;  %5103 = vmatpush3.bf16.xpose.msra.mxu1 %v5652_v10 }
  0x8c   :  { %5098 = vmatprep.mubr.msk.bf16.mxu0 %vm5568_vm1, %v5567_v0  ;;  %5104 = vmatprep.mubr.msk.bf16.mxu1 %vm5568_vm1, %v5567_v0 }
  0x8d   :  { %5108 = vmatprep.subr.bf16.mxu0 %v5567_v0  ;;  %5114 = vmatprep.subr.bf16.mxu1 %v5567_v0 }
  0x92   :  { %5099 = vmatmul.mubr.msk.bf16.vlgmr.msra.gmra.mxu0 %vm74_vm0, %v5981_v51  ;;  %5105 = vmatmul.mubr.msk.bf16.vlgmr.msra.gmra.mxu1 %vm74_vm0, %v5986_v52 }
  0x93   :  { %5109 = vmatpush3.bf16.xpose.msra.mxu0 %v5683_v15  ;;  %5115 = vmatpush3.bf16.xpose.msra.mxu1 %v5686_v16 }
  0x94   :  { %5110 = vmatprep.mubr.msk.bf16.mxu0 %vm5568_vm1, %v5567_v0  ;;  %5116 = vmatprep.mubr.msk.bf16.mxu1 %vm5568_vm1, %v5567_v0 }
  0x95   :  { %5120 = vmatprep.subr.bf16.mxu0 %v5567_v0  ;;  %5126 = vmatprep.subr.bf16.mxu1 %v5567_v0 }
  0x9a   :  { %5111 = vmatmul.mubr.msk.bf16.vlgmr.msra.gmra.mxu0 %vm74_vm0, %v6003_v53  ;;  %5117 = vmatmul.mubr.msk.bf16.vlgmr.msra.gmra.mxu1 %vm74_vm0, %v6008_v54 }
  0x9b   :  { %5121 = vmatpush3.bf16.xpose.msra.mxu0 %v5717_v21  ;;  %5127 = vmatpush3.bf16.xpose.msra.mxu1 %v5720_v22 }
  0x9c   :  { %5122 = vmatprep.mubr.msk.bf16.mxu0 %vm5568_vm1, %v5567_v0  ;;  %5128 = vmatprep.mubr.msk.bf16.mxu1 %vm5568_vm1, %v5567_v0 }
  0x9d   :  { %5132 = vmatprep.subr.bf16.mxu0 %v5567_v0  ;;  %5138 = vmatprep.subr.bf16.mxu1 %v5567_v0 }
  0xa2   :  { %5123 = vmatmul.mubr.msk.bf16.vlgmr.msra.gmra.mxu0 %vm74_vm0, %v6025_v55  ;;  %5129 = vmatmul.mubr.msk.bf16.vlgmr.msra.gmra.mxu1 %vm74_vm0, %v6030_v56 }
  0xa3   :  { %5133 = vmatpush3.bf16.xpose.msra.mxu0 %v5751_v27  ;;  %5139 = vmatpush3.bf16.xpose.msra.mxu1 %v5754_v28 }
  0xa4   :  { %5134 = vmatprep.mubr.msk.bf16.mxu0 %vm5568_vm1, %v5567_v0  ;;  %5140 = vmatprep.mubr.msk.bf16.mxu1 %vm5568_vm1, %v5567_v0 }
  0xa5   :  { %5144 = vmatprep.subr.bf16.mxu0 %v5567_v0  ;;  %5150 = vmatprep.subr.bf16.mxu1 %v5567_v0 }
  0xaa   :  { %5135 = vmatmul.mubr.msk.bf16.vlgmr.msra.gmra.mxu0 %vm74_vm0, %v4628_v57  ;;  %5141 = vmatmul.mubr.msk.bf16.vlgmr.msra.gmra.mxu1 %vm74_vm0, %v4629_v58 }
  0xab   :  { %5145 = vmatpush3.bf16.xpose.msra.mxu0 %v5781_v33  ;;  %5151 = vmatpush3.bf16.xpose.msra.mxu1 %v5784_v34 }
  0xac   :  { %5146 = vmatprep.mubr.msk.bf16.mxu0 %vm5568_vm1, %v5567_v0  ;;  %5152 = vmatprep.mubr.msk.bf16.mxu1 %vm5568_vm1, %v5567_v0 }
  0xad   :  { %5156 = vmatprep.subr.bf16.mxu0 %v5567_v0  ;;  %5162 = vmatprep.subr.bf16.mxu1 %v5567_v0 }
  0xb2   :  { %5147 = vmatmul.mubr.msk.bf16.vlgmr.msra.gmra.mxu0 %vm74_vm0, %v4630_v59  ;;  %5153 = vmatmul.mubr.msk.bf16.vlgmr.msra.gmra.mxu1 %vm74_vm0, %v4631_v60 }
  0xb3   :  { %5157 = vmatpush3.bf16.xpose.msra.mxu0 %v5809_v39  ;;  %5163 = vmatpush3.bf16.xpose.msra.mxu1 %v5812_v40 }
  0xb4   :  { %5158 = vmatprep.mubr.msk.bf16.mxu0 %vm5568_vm1, %v5567_v0  ;;  %5164 = vmatprep.mubr.msk.bf16.mxu1 %vm5568_vm1, %v5567_v0 }
  0xb5   :  { %5168 = vmatprep.subr.bf16.mxu0 %v5567_v0  ;;  %5174 = vmatprep.subr.bf16.mxu1 %v5567_v0 }
  0xba   :  { %5159 = vmatmul.mubr.msk.bf16.vlgmr.msra.gmra.mxu0 %vm74_vm0, %v4632_v61  ;;  %5165 = vmatmul.mubr.msk.bf16.vlgmr.msra.gmra.mxu1 %vm74_vm0, %v4633_v62 }
  0xbb   :  { %5169 = vmatpush3.bf16.xpose.msra.mxu0 %v5837_v45  ;;  %5175 = vmatpush3.bf16.xpose.msra.mxu1 %v5840_v46 }
  0xbc   :  { %5170 = vmatprep.mubr.msk.bf16.mxu0 %vm5568_vm1, %v5567_v0  ;;  %5176 = vmatprep.mubr.msk.bf16.mxu1 %vm5568_vm1, %v5567_v0 }
  0xbd   :  { %5180 = vmatprep.subr.bf16.mxu0 %v5567_v0  ;;  %5186 = vmatprep.subr.bf16.mxu1 %v5567_v0 }
  0xc2   :  { %5171 = vmatmul.mubr.msk.bf16.vlgmr.msra.gmra.mxu0 %vm74_vm0, %v4634_v63  ;;  %5177 = vmatmul.mubr.msk.bf16.vlgmr.msra.gmra.mxu1 %vm74_vm0, %v4635_v1 }
  0xc3   :  { %5181 = vmatpush3.bf16.xpose.msra.mxu0 %v5619_v3  ;;  %5187 = vmatpush3.bf16.xpose.msra.mxu1 %v5622_v4 }
  0xc4   :  { %5182 = vmatprep.mubr.msk.bf16.mxu0 %vm5568_vm1, %v5567_v0  ;;  %5188 = vmatprep.mubr.msk.bf16.mxu1 %vm5568_vm1, %v5567_v0 }
  0xc5   :  { %5192 = vmatprep.subr.bf16.mxu0 %v5567_v0  ;;  %5198 = vmatprep.subr.bf16.mxu1 %v5567_v0 }
  0xca   :  { %v6108_v2 = vpop.f32.mrf.mxu0  ;;  %v6110_v5 = vpop.f32.mrf.mxu1  ;;  %5183 = vmatmul.mubr.msk.bf16.vlgmr.msra.gmra.mxu0 %vm74_vm0, %v4628_v57  ;;  %5189 = vmatmul.mubr.msk.bf16.vlgmr.msra.gmra.mxu1 %vm74_vm0, %v4629_v58 }
  0xcb   :  { %5193 = vmatpush3.bf16.xpose.msra.mxu0 %v5649_v9  ;;  %5199 = vmatpush3.bf16.xpose.msra.mxu1 %v5652_v10 }
  0xcc   :  { %v4896_v3 = vpop.f32.mrf.mxu0  ;;  %v4902_v4 = vpop.f32.mrf.mxu1  ;;  %5194 = vmatprep.mubr.msk.bf16.mxu0 %vm5568_vm1, %v5567_v0  ;;  %5200 = vmatprep.mubr.msk.bf16.mxu1 %vm5568_vm1, %v5567_v0 }
  0xcd   :  { %5204 = vmatprep.subr.bf16.mxu0 %v5567_v0  ;;  %5210 = vmatprep.subr.bf16.mxu1 %v5567_v0 }
  0xce   :  { %v118_v6 = vpop.f32.mrf.mxu0  ;;  %v164_v7 = vpop.f32.mrf.mxu1 }
  0xd0   :  { %v4897_v8 = vpop.f32.mrf.mxu0  ;;  %v4903_v11 = vpop.f32.mrf.mxu1 }
  0xd2   :  { %v6122_v12 = vpop.f32.mrf.mxu0  ;;  %v6124_v9 = vpop.f32.mrf.mxu1  ;;  %5195 = vmatmul.mubr.msk.bf16.vlgmr.msra.gmra.mxu0 %vm74_vm0, %v4630_v59  ;;  %5201 = vmatmul.mubr.msk.bf16.vlgmr.msra.gmra.mxu1 %vm74_vm0, %v4631_v60 }
  0xd3   :  { %5205 = vmatpush3.bf16.xpose.msra.mxu0 %v5683_v15  ;;  %5211 = vmatpush3.bf16.xpose.msra.mxu1 %v5686_v16 }
  0xd4   :  { %v4908_v10 = vpop.f32.mrf.mxu0  ;;  %v4914_v13 = vpop.f32.mrf.mxu1  ;;  %5206 = vmatprep.mubr.msk.bf16.mxu0 %vm5568_vm1, %v5567_v0  ;;  %5212 = vmatprep.mubr.msk.bf16.mxu1 %vm5568_vm1, %v5567_v0 }
  0xd5   :  { %5216 = vmatprep.subr.bf16.mxu0 %v5567_v0  ;;  %5222 = vmatprep.subr.bf16.mxu1 %v5567_v0 }
  0xd6   :  { %v210_v14 = vpop.f32.mrf.mxu0  ;;  %v256_v17 = vpop.f32.mrf.mxu1 }
  0xd8   :  { %v4909_v18 = vpop.f32.mrf.mxu0  ;;  %v4915_v19 = vpop.f32.mrf.mxu1 }
  0xda   :  { %v6136_v20 = vpop.f32.mrf.mxu0  ;;  %v6138_v15 = vpop.f32.mrf.mxu1  ;;  %5207 = vmatmul.mubr.msk.bf16.vlgmr.msra.gmra.mxu0 %vm74_vm0, %v4632_v61  ;;  %5213 = vmatmul.mubr.msk.bf16.vlgmr.msra.gmra.mxu1 %vm74_vm0, %v4633_v62 }
  0xdb   :  { %5217 = vmatpush3.bf16.xpose.msra.mxu0 %v5717_v21  ;;  %5223 = vmatpush3.bf16.xpose.msra.mxu1 %v5720_v22 }
  0xdc   :  { %v4920_v16 = vpop.f32.mrf.mxu0  ;;  %v4926_v23 = vpop.f32.mrf.mxu1  ;;  %5218 = vmatprep.mubr.msk.bf16.mxu0 %vm5568_vm1, %v5567_v0  ;;  %5224 = vmatprep.mubr.msk.bf16.mxu1 %vm5568_vm1, %v5567_v0 }
  0xdd   :  { %5228 = vmatprep.subr.bf16.mxu0 %v5567_v0  ;;  %5234 = vmatprep.subr.bf16.mxu1 %v5567_v0 }
  0xde   :  { %v302_v24 = vpop.f32.mrf.mxu0  ;;  %v348_v25 = vpop.f32.mrf.mxu1 }
  0xe0   :  { %v4921_v26 = vpop.f32.mrf.mxu0  ;;  %v4927_v29 = vpop.f32.mrf.mxu1 }
  0xe2   :  { %v6150_v30 = vpop.f32.mrf.mxu0  ;;  %v6152_v21 = vpop.f32.mrf.mxu1  ;;  %5219 = vmatmul.mubr.msk.bf16.vlgmr.msra.gmra.mxu0 %vm74_vm0, %v4634_v63  ;;  %5225 = vmatmul.mubr.msk.bf16.vlgmr.msra.gmra.mxu1 %vm74_vm0, %v4635_v1 }
  0xe3   :  { %5229 = vmatpush3.bf16.xpose.msra.mxu0 %v5751_v27  ;;  %5235 = vmatpush3.bf16.xpose.msra.mxu1 %v5754_v28 }
  0xe4   :  { %v4932_v22 = vpop.f32.mrf.mxu0  ;;  %v4938_v31 = vpop.f32.mrf.mxu1  ;;  %5230 = vmatprep.mubr.msk.bf16.mxu0 %vm5568_vm1, %v5567_v0  ;;  %5236 = vmatprep.mubr.msk.bf16.mxu1 %vm5568_vm1, %v5567_v0 }
  0xe5   :  { %5240 = vmatprep.subr.bf16.mxu0 %v5567_v0  ;;  %5246 = vmatprep.subr.bf16.mxu1 %v5567_v0 }
  0xe6   :  { %v394_v32 = vpop.f32.mrf.mxu0  ;;  %v440_v35 = vpop.f32.mrf.mxu1 }
  0xe8   :  { %v4933_v36 = vpop.f32.mrf.mxu0  ;;  %v4939_v37 = vpop.f32.mrf.mxu1 }
  0xea   :  { %v483_v38 = vpop.f32.mrf.mxu0  ;;  %v529_v27 = vpop.f32.mrf.mxu1  ;;  %5231 = vmatmul.mubr.msk.bf16.vlgmr.msra.gmra.mxu0 %vm74_vm0, %v5959_v49  ;;  %5237 = vmatmul.mubr.msk.bf16.vlgmr.msra.gmra.mxu1 %vm74_vm0, %v5964_v50 }
  0xeb   :  { %v6169_v28 = vsub.f32 %v6108_v2, %v483_v38  ;;  %v6172_v41 = vsub.f32 %v6110_v5, %v529_v27  ;;  %5241 = vmatpush3.bf16.xpose.msra.mxu0 %v5781_v33  ;;  %5247 = vmatpush3.bf16.xpose.msra.mxu1 %v5784_v34 }
  0xec   :  { %v4944_v42 = vpop.f32.mrf.mxu0  ;;  %v4950_v43 = vpop.f32.mrf.mxu1  ;;  %5242 = vmatprep.mubr.msk.bf16.mxu0 %vm5568_vm1, %v5567_v0  ;;  %5248 = vmatprep.mubr.msk.bf16.mxu1 %vm5568_vm1, %v5567_v0 }
  0xed   :  { %5252 = vmatprep.subr.bf16.mxu0 %v5567_v0  ;;  %5258 = vmatprep.subr.bf16.mxu1 %v5567_v0 }
  0xee   :  { %v486_v44 = vpop.f32.mrf.mxu0  ;;  %v532_v47 = vpop.f32.mrf.mxu1 }
  0xf0   :  { %v4945_v48 = vpop.f32.mrf.mxu0  ;;  %v4951_v49 = vpop.f32.mrf.mxu1 }
  0xf2   :  { %v575_v50 = vpop.f32.mrf.mxu0  ;;  %v621_v33 = vpop.f32.mrf.mxu1  ;;  %5243 = vmatmul.mubr.msk.bf16.vlgmr.msra.gmra.mxu0 %vm74_vm0, %v5981_v51  ;;  %5249 = vmatmul.mubr.msk.bf16.vlgmr.msra.gmra.mxu1 %vm74_vm0, %v5986_v52 }
  0xf3   :  { %v6187_v34 = vsub.f32 %v6122_v12, %v575_v50  ;;  %v6190_v57 = vsub.f32 %v6124_v9, %v621_v33  ;;  %5253 = vmatpush3.bf16.xpose.msra.mxu0 %v5809_v39  ;;  %5259 = vmatpush3.bf16.xpose.msra.mxu1 %v5812_v40 }
  0xf4   :  { %v4956_v58 = vpop.f32.mrf.mxu0  ;;  %v4962_v59 = vpop.f32.mrf.mxu1  ;;  %5254 = vmatprep.mubr.msk.bf16.mxu0 %vm5568_vm1, %v5567_v0  ;;  %5260 = vmatprep.mubr.msk.bf16.mxu1 %vm5568_vm1, %v5567_v0 }
  0xf5   :  { %5264 = vmatprep.subr.bf16.mxu0 %v5567_v0  ;;  %5270 = vmatprep.subr.bf16.mxu1 %v5567_v0 }
  0xf6   :  { %v578_v51 = vpop.f32.mrf.mxu0  ;;  %v624_v52 = vpop.f32.mrf.mxu1 }
  0xf8   :  { %v4957_v60 = vpop.f32.mrf.mxu0  ;;  %v4963_v61 = vpop.f32.mrf.mxu1 }
  0xf9   :  { %v1459_v61 = vmul.f32 %v6169_v28, %v6169_v28  ;;  %v1461_v28 = vmul.f32 %v6187_v34, %v6187_v34 }
  0xfa   :  { %v667_v62 = vpop.f32.mrf.mxu0  ;;  %v713_v39 = vpop.f32.mrf.mxu1  ;;  %5255 = vmatmul.mubr.msk.bf16.vlgmr.msra.gmra.mxu0 %vm74_vm0, %v6003_v53  ;;  %5261 = vmatmul.mubr.msk.bf16.vlgmr.msra.gmra.mxu1 %vm74_vm0, %v6008_v54 }
  0xfb   :  { %v6205_v40 = vsub.f32 %v6136_v20, %v667_v62  ;;  %v6208_v63 = vsub.f32 %v6138_v15, %v713_v39  ;;  %5265 = vmatpush3.bf16.xpose.msra.mxu0 %v5837_v45  ;;  %5271 = vmatpush3.bf16.xpose.msra.mxu1 %v5840_v46  ;;  %v1460_v62 = vmul.f32 %v6172_v41, %v6172_v41 }
  0xfc   :  { %v4968_v1 = vpop.f32.mrf.mxu0  ;;  %v4974_v2 = vpop.f32.mrf.mxu1  ;;  %5266 = vmatprep.mubr.msk.bf16.mxu0 %vm5568_vm1, %v5567_v0  ;;  %5272 = vmatprep.mubr.msk.bf16.mxu1 %vm5568_vm1, %v5567_v0  ;;  %v1462_v41 = vmul.f32 %v6190_v57, %v6190_v57 }
  0xfd   :  { %5276 = vmatprep.subr.bf16.mxu0 %v5567_v0  ;;  %5282 = vmatprep.subr.bf16.mxu1 %v5567_v0  ;;  %v1463_v34 = vmul.f32 %v6205_v40, %v6205_v40  ;;  %v1464_v57 = vmul.f32 %v6208_v63, %v6208_v63 }
  0xfe   :  { %v670_v53 = vpop.f32.mrf.mxu0  ;;  %v716_v54 = vpop.f32.mrf.mxu1 }
 0x100   :  { %v4969_v5 = vpop.f32.mrf.mxu0  ;;  %v4975_v3 = vpop.f32.mrf.mxu1 }
 0x102   :  { %v759_v4 = vpop.f32.mrf.mxu0  ;;  %v805_v45 = vpop.f32.mrf.mxu1  ;;  %5267 = vmatmul.mubr.msk.bf16.vlgmr.msra.gmra.mxu0 %vm74_vm0, %v6025_v55  ;;  %5273 = vmatmul.mubr.msk.bf16.vlgmr.msra.gmra.mxu1 %vm74_vm0, %v6030_v56 }
 0x103   :  { %v6223_v46 = vsub.f32 %v6150_v30, %v759_v4  ;;  %v6226_v6 = vsub.f32 %v6152_v21, %v805_v45  ;;  %5278 = vmatprep.mubr.msk.bf16.mxu0 %vm5568_vm1, %v5567_v0  ;;  %5284 = vmatprep.mubr.msk.bf16.mxu1 %vm5568_vm1, %v5567_v0 }
 0x104   :  { %v4980_v7 = vpop.f32.mrf.mxu0  ;;  %v4986_v8 = vpop.f32.mrf.mxu1 }
 0x105   :  { %v1465_v40 = vmul.f32 %v6223_v46, %v6223_v46  ;;  %v1466_v63 = vmul.f32 %v6226_v6, %v6226_v6 }
 0x106   :  { %v762_v11 = vpop.f32.mrf.mxu0  ;;  %v808_v12 = vpop.f32.mrf.mxu1 }
 0x108   :  { %v4981_v55 = vpop.f32.mrf.mxu0  ;;  %v4987_v9 = vpop.f32.mrf.mxu1 }
 0x10a   :  { %v853_v10 = vpop.f32.mrf.mxu0  ;;  %v893_v56 = vpop.f32.mrf.mxu1 }
 0x10c   :  { %v4992_v13 = vpop.f32.mrf.mxu0  ;;  %v4998_v14 = vpop.f32.mrf.mxu1 }
 0x10e   :  { %v856_v17 = vpop.f32.mrf.mxu0  ;;  %v896_v18 = vpop.f32.mrf.mxu1 }
 0x110   :  { %v4993_v19 = vpop.f32.mrf.mxu0  ;;  %v4999_v20 = vpop.f32.mrf.mxu1 }
 0x112   :  { %v933_v15 = vpop.f32.mrf.mxu0  ;;  %v973_v16 = vpop.f32.mrf.mxu1 }
 0x114   :  { %v5004_v23 = vpop.f32.mrf.mxu0  ;;  %v5010_v24 = vpop.f32.mrf.mxu1 }
 0x116   :  { %v936_v25 = vpop.f32.mrf.mxu0  ;;  %v976_v26 = vpop.f32.mrf.mxu1 }
 0x118   :  { %v5005_v29 = vpop.f32.mrf.mxu0  ;;  %v5011_v30 = vpop.f32.mrf.mxu1 }
 0x11a   :  { %v1013_v21 = vpop.f32.mrf.mxu0  ;;  %v1053_v22 = vpop.f32.mrf.mxu1 }
 0x11c   :  { %v5016_v31 = vpop.f32.mrf.mxu0  ;;  %v5022_v32 = vpop.f32.mrf.mxu1 }
 0x11e   :  { %v1016_v35 = vpop.f32.mrf.mxu0  ;;  %v1056_v36 = vpop.f32.mrf.mxu1 }
 0x120   :  { %v5017_v37 = vpop.f32.mrf.mxu0  ;;  %v5023_v38 = vpop.f32.mrf.mxu1 }
 0x122   :  { %v1093_v27 = vpop.f32.mrf.mxu0  ;;  %v1133_v42 = vpop.f32.mrf.mxu1 }
 0x124   :  { %v5028_v43 = vpop.f32.mrf.mxu0  ;;  %v5034_v44 = vpop.f32.mrf.mxu1 }
 0x126   :  { %v1096_v47 = vpop.f32.mrf.mxu0  ;;  %v1136_v48 = vpop.f32.mrf.mxu1 }
 0x128   :  { %v5029_v49 = vpop.f32.mrf.mxu0  ;;  %v5035_v50 = vpop.f32.mrf.mxu1 }
 0x12a   :  { %v1173_v33 = vpop.f32.mrf.mxu0  ;;  %v1213_v58 = vpop.f32.mrf.mxu1 }
 0x12b   :  { %v1174_v59 = vadd.f32 %v1173_v33, %v853_v10  ;;  %v1214_v51 = vadd.f32 %v1213_v58, %v893_v56 }
 0x12c   :  { %v5040_v52 = vpop.f32.mrf.mxu0  ;;  %v5046_v60 = vpop.f32.mrf.mxu1 }
 0x12d   :  { %v1467_v39 = vmul.f32 %v1174_v59, %v1174_v59  ;;  %v1468_v1 = vmul.f32 %v1214_v51, %v1214_v51 }
 0x12e   :  { %v1176_v2 = vpop.f32.mrf.mxu0  ;;  %v1216_v53 = vpop.f32.mrf.mxu1 }
 0x12f   :  { %v6236_v54 = vadd.f32 %v1467_v39, %v1459_v61  ;;  %v6238_v5 = vadd.f32 %v1468_v1, %v1460_v62 }
 0x130   :  { %v5041_v3 = vpop.f32.mrf.mxu0  ;;  %v5047_v4 = vpop.f32.mrf.mxu1 }
 0x131   :  { %vm1485_vm15 = vcmp.eq.f32.partialorder %v6236_v54, inf  ;;  %vm1492_vm0 = vcmp.eq.f32.partialorder %v6238_v5, inf }
 0x132   :  { %v1253_v45 = vpop.f32.mrf.mxu0  ;;  %v1293_v7 = vpop.f32.mrf.mxu1 }
 0x133   :  { %v1254_v8 = vadd.f32 %v1253_v45, %v933_v15  ;;  %v1294_v11 = vadd.f32 %v1293_v7, %v973_v16 }
 0x134   :  { %v5052_v12 = vpop.f32.mrf.mxu0  ;;  %v5058_v55 = vpop.f32.mrf.mxu1 }
 0x135   :  { %v1469_v9 = vmul.f32 %v1254_v8, %v1254_v8  ;;  %v1470_v10 = vmul.f32 %v1294_v11, %v1294_v11 }
 0x136   :  { %v1256_v56 = vpop.f32.mrf.mxu0  ;;  %v1296_v13 = vpop.f32.mrf.mxu1 }
 0x137   :  { %v6244_v14 = vadd.f32 %v1469_v9, %v1461_v28  ;;  %v6246_v17 = vadd.f32 %v1470_v10, %v1462_v41 }
 0x138   :  { %v5053_v18 = vpop.f32.mrf.mxu0  ;;  %v5059_v19 = vpop.f32.mrf.mxu1 }
 0x13a   :  { %v1333_v20 = vpop.f32.mrf.mxu0  ;;  %v1373_v15 = vpop.f32.mrf.mxu1 }
 0x13b   :  { %v1334_v16 = vadd.f32 %v1333_v20, %v1013_v21  ;;  %v1374_v23 = vadd.f32 %v1373_v15, %v1053_v22 }
 0x13c   :  { %v5064_v24 = vpop.f32.mrf.mxu0  ;;  %v5070_v25 = vpop.f32.mrf.mxu1 }
 0x13d   :  { %v1471_v26 = vmul.f32 %v1334_v16, %v1334_v16  ;;  %v1472_v29 = vmul.f32 %v1374_v23, %v1374_v23 }
 0x13e   :  { %v1336_v30 = vpop.f32.mrf.mxu0  ;;  %v1376_v31 = vpop.f32.mrf.mxu1 }
 0x13f   :  { %v6252_v32 = vadd.f32 %v1471_v26, %v1463_v34  ;;  %v6254_v35 = vadd.f32 %v1472_v29, %v1464_v57 }
 0x140   :  { %v5065_v36 = vpop.f32.mrf.mxu0  ;;  %v5071_v37 = vpop.f32.mrf.mxu1 }
 0x142   :  { %v1413_v21 = vpop.f32.mrf.mxu0  ;;  %v1453_v22 = vpop.f32.mrf.mxu1 }
 0x143   :  { %v1414_v38 = vadd.f32 %v1413_v21, %v1093_v27  ;;  %v1454_v43 = vadd.f32 %v1453_v22, %v1133_v42 }
 0x144   :  { %v5076_v44 = vpop.f32.mrf.mxu0  ;;  %v5082_v47 = vpop.f32.mrf.mxu1 }
 0x145   :  { %v1473_v48 = vmul.f32 %v1414_v38, %v1414_v38  ;;  %v1474_v49 = vmul.f32 %v1454_v43, %v1454_v43 }
 0x146   :  { %v1416_v50 = vpop.f32.mrf.mxu0  ;;  %v1456_v33 = vpop.f32.mrf.mxu1 }
 0x147   :  { %v6260_v58 = vadd.f32 %v1473_v48, %v1465_v40  ;;  %v6262_v59 = vadd.f32 %v1474_v49, %v1466_v63 }
 0x148   :  { %v5077_v51 = vpop.f32.mrf.mxu0  ;;  %v5083_v52 = vpop.f32.mrf.mxu1 }
 0x14a   :  { %v1699_v27 = vpop.f32.mrf.mxu0  ;;  %v1742_v42 = vpop.f32.mrf.mxu1 }
 0x14c   :  { %v5088_v60 = vpop.f32.mrf.mxu0  ;;  %v5094_v61 = vpop.f32.mrf.mxu1 }
 0x14e   :  { %v1702_v62 = vpop.f32.mrf.mxu0  ;;  %v1745_v39 = vpop.f32.mrf.mxu1 }
 0x150   :  { %v5089_v46 = vpop.f32.mrf.mxu0  ;;  %v5095_v1 = vpop.f32.mrf.mxu1 }
 0x152   :  { %v1785_v2 = vpop.f32.mrf.mxu0  ;;  %v1828_v6 = vpop.f32.mrf.mxu1 }
 0x154   :  { %v5100_v53 = vpop.f32.mrf.mxu0  ;;  %v5106_v3 = vpop.f32.mrf.mxu1 }
 0x156   :  { %v1788_v4 = vpop.f32.mrf.mxu0  ;;  %v1831_v45 = vpop.f32.mrf.mxu1 }
 0x158   :  { %v5101_v7 = vpop.f32.mrf.mxu0  ;;  %v5107_v8 = vpop.f32.mrf.mxu1 }
 0x15a   :  { %v1871_v11 = vpop.f32.mrf.mxu0  ;;  %v1914_v12 = vpop.f32.mrf.mxu1 }
 0x15c   :  { %v5112_v55 = vpop.f32.mrf.mxu0  ;;  %v5118_v28 = vpop.f32.mrf.mxu1 }
 0x15e   :  { %v1874_v41 = vpop.f32.mrf.mxu0  ;;  %v1917_v9 = vpop.f32.mrf.mxu1 }
 0x160   :  { %v5113_v10 = vpop.f32.mrf.mxu0  ;;  %v5119_v56 = vpop.f32.mrf.mxu1 }
 0x162   :  { %v1957_v13 = vpop.f32.mrf.mxu0  ;;  %v2000_v18 = vpop.f32.mrf.mxu1 }
 0x164   :  { %v5124_v19 = vpop.f32.mrf.mxu0  ;;  %v5130_v20 = vpop.f32.mrf.mxu1 }
 0x166   :  { %v1960_v15 = vpop.f32.mrf.mxu0  ;;  %v2003_v16 = vpop.f32.mrf.mxu1 }
 0x168   :  { %v5125_v23 = vpop.f32.mrf.mxu0  ;;  %v5131_v24 = vpop.f32.mrf.mxu1 }
 0x16a   :  { %v2043_v25 = vpop.f32.mrf.mxu0  ;;  %v2086_v34 = vpop.f32.mrf.mxu1 }
 0x16b   :  { %v6264_v57 = vsub.f32 %v1699_v27, %v2043_v25  ;;  %v6266_v26 = vsub.f32 %v1742_v42, %v2086_v34 }
 0x16c   :  { %v5136_v29 = vpop.f32.mrf.mxu0  ;;  %v5142_v30 = vpop.f32.mrf.mxu1 }
 0x16e   :  { %v2046_v31 = vpop.f32.mrf.mxu0  ;;  %v2089_v36 = vpop.f32.mrf.mxu1 }
 0x170   :  { %v5137_v37 = vpop.f32.mrf.mxu0  ;;  %v5143_v21 = vpop.f32.mrf.mxu1 }
 0x172   :  { %v2129_v22 = vpop.f32.mrf.mxu0  ;;  %v2172_v38 = vpop.f32.mrf.mxu1 }
 0x173   :  { %v6268_v43 = vsub.f32 %v1785_v2, %v2129_v22  ;;  %v6270_v44 = vsub.f32 %v1828_v6, %v2172_v38 }
 0x174   :  { %v5148_v47 = vpop.f32.mrf.mxu0  ;;  %v5154_v40 = vpop.f32.mrf.mxu1 }
 0x176   :  { %v2132_v63 = vpop.f32.mrf.mxu0  ;;  %v2175_v48 = vpop.f32.mrf.mxu1 }
 0x178   :  { %v5149_v49 = vpop.f32.mrf.mxu0  ;;  %v5155_v50 = vpop.f32.mrf.mxu1 }
 0x17a   :  { %v2215_v33 = vpop.f32.mrf.mxu0  ;;  %v2258_v51 = vpop.f32.mrf.mxu1 }
 0x17b   :  { %v6272_v52 = vsub.f32 %v1871_v11, %v2215_v33  ;;  %v6274_v27 = vsub.f32 %v1914_v12, %v2258_v51 }
 0x17c   :  { %v5160_v42 = vpop.f32.mrf.mxu0  ;;  %v5166_v60 = vpop.f32.mrf.mxu1 }
 0x17e   :  { %v2218_v61 = vpop.f32.mrf.mxu0  ;;  %v2261_v62 = vpop.f32.mrf.mxu1 }
 0x180   :  { %v5161_v39 = vpop.f32.mrf.mxu0  ;;  %v5167_v46 = vpop.f32.mrf.mxu1 }
 0x181   :  { %v2998_v46 = vmul.f32 %v6264_v57, %v6264_v57 }
 0x182   :  { %v2301_v1 = vpop.f32.mrf.mxu0  ;;  %v2344_v2 = vpop.f32.mrf.mxu1 }
 0x183   :  { %v6276_v6 = vsub.f32 %v1957_v13, %v2301_v1  ;;  %v6278_v53 = vsub.f32 %v2000_v18, %v2344_v2  ;;  %v2999_v1 = vmul.f32 %v6266_v26, %v6266_v26  ;;  %v3000_v26 = vmul.f32 %v6268_v43, %v6268_v43 }
 0x184   :  { %v5172_v3 = vpop.f32.mrf.mxu0  ;;  %v5178_v4 = vpop.f32.mrf.mxu1 }
 0x186   :  { %v2304_v45 = vpop.f32.mrf.mxu0  ;;  %v2347_v7 = vpop.f32.mrf.mxu1 }
 0x188   :  { %v5173_v8 = vpop.f32.mrf.mxu0  ;;  %v5179_v11 = vpop.f32.mrf.mxu1 }
 0x18a   :  { %v2392_v12 = vpop.f32.mrf.mxu0  ;;  %v2432_v55 = vpop.f32.mrf.mxu1 }
 0x18c   :  { %v5184_v28 = vpop.f32.mrf.mxu0  ;;  %v5190_v41 = vpop.f32.mrf.mxu1 }
 0x18e   :  { %v2395_v9 = vpop.f32.mrf.mxu0  ;;  %v2435_v10 = vpop.f32.mrf.mxu1 }
 0x190   :  { %v5185_v56 = vpop.f32.mrf.mxu0  ;;  %v5191_v19 = vpop.f32.mrf.mxu1 }
 0x191   :  { %v3001_v56 = vmul.f32 %v6270_v44, %v6270_v44 }
 0x192   :  { %v2472_v20 = vpop.f32.mrf.mxu0  ;;  %v2512_v15 = vpop.f32.mrf.mxu1 }
 0x194   :  { %v5196_v13 = vpop.f32.mrf.mxu0  ;;  %v5202_v16 = vpop.f32.mrf.mxu1 }
 0x196   :  { %v2475_v18 = vpop.f32.mrf.mxu0  ;;  %v2515_v23 = vpop.f32.mrf.mxu1 }
 0x198   :  { %v5197_v24 = vpop.f32.mrf.mxu0  ;;  %v5203_v25 = vpop.f32.mrf.mxu1 }
 0x19a   :  { %v2552_v34 = vpop.f32.mrf.mxu0  ;;  %v2592_v29 = vpop.f32.mrf.mxu1 }
 0x19c   :  { %v5208_v30 = vpop.f32.mrf.mxu0  ;;  %v5214_v31 = vpop.f32.mrf.mxu1 }
 0x19e   :  { %v2555_v36 = vpop.f32.mrf.mxu0  ;;  %v2595_v37 = vpop.f32.mrf.mxu1 }
 0x19f   :  { %v3002_v37 = vmul.f32 %v6272_v52, %v6272_v52 }
 0x1a0   :  { %v5209_v21 = vpop.f32.mrf.mxu0  ;;  %v5215_v22 = vpop.f32.mrf.mxu1 }
 0x1a1   :  { %v3003_v21 = vmul.f32 %v6274_v27, %v6274_v27 }
 0x1a2   :  { %v6280_v38 = vpop.f32.mrf.mxu0  ;;  %v6282_v47 = vpop.f32.mrf.mxu1 }
 0x1a4   :  { %v5220_v40 = vpop.f32.mrf.mxu0  ;;  %v5226_v63 = vpop.f32.mrf.mxu1 }
 0x1a6   :  { %v2635_v48 = vpop.f32.mrf.mxu0  ;;  %v2675_v49 = vpop.f32.mrf.mxu1 }
 0x1a8   :  { %v5221_v50 = vpop.f32.mrf.mxu0  ;;  %v5227_v33 = vpop.f32.mrf.mxu1 }
 0x1aa   :  { %v2712_v51 = vpop.f32.mrf.mxu0  ;;  %v2752_v42 = vpop.f32.mrf.mxu1 }
 0x1ab   :  { %v2713_v60 = vadd.f32 %v2712_v51, %v2392_v12  ;;  %v2753_v61 = vadd.f32 %v2752_v42, %v2432_v55 }
 0x1ac   :  { %v5232_v62 = vpop.f32.mrf.mxu0  ;;  %v5238_v39 = vpop.f32.mrf.mxu1 }
 0x1ad   :  { %v3006_v2 = vmul.f32 %v2713_v60, %v2713_v60  ;;  %v3007_v3 = vmul.f32 %v2753_v61, %v2753_v61 }
 0x1ae   :  { %v2715_v4 = vpop.f32.mrf.mxu0  ;;  %v2755_v45 = vpop.f32.mrf.mxu1 }
 0x1af   :  { %v3014_v7 = vadd.f32 %v3006_v2, %v2998_v46  ;;  %v6288_v8 = vadd.f32 %v3007_v3, %v2999_v1 }
 0x1b0   :  { %v5233_v11 = vpop.f32.mrf.mxu0  ;;  %v5239_v28 = vpop.f32.mrf.mxu1 }
 0x1b1   :  { %5471 = vrsqrt.f32 %v3014_v7  ;;  %vm3024_vm2 = vcmp.eq.f32.partialorder %v3014_v7, inf  ;;  %vm3026_vm3 = vcmp.eq.f32.partialorder %v3014_v7, 0.0  ;;  %v3027_v27 = vand.u32 2147483648, %v3014_v7 }
 0x1b2   :  { %5473 = vrsqrt.f32 %v6288_v8  ;;  %v2792_v12 = vpop.f32.mrf.mxu0  ;;  %v2832_v55 = vpop.f32.mrf.mxu1  ;;  %vm3031_vm4 = vcmp.eq.f32.partialorder %v6288_v8, inf  ;;  %v3034_v61 = vand.u32 2147483648, %v6288_v8  ;;  %vm3033_vm5 = vcmp.eq.f32.partialorder %v6288_v8, 0.0 }
 0x1b3   :  { %v2793_v41 = vadd.f32 %v2792_v12, %v2472_v20  ;;  %v2833_v9 = vadd.f32 %v2832_v55, %v2512_v15  ;;  %v3005_v11 = vmul.f32 %v6278_v53, %v6278_v53 }
 0x1b4   :  { %v5244_v57 = vpop.f32.mrf.mxu0  ;;  %v5250_v10 = vpop.f32.mrf.mxu1 }
 0x1b5   :  { %v3008_v19 = vmul.f32 %v2793_v41, %v2793_v41  ;;  %v3009_v13 = vmul.f32 %v2833_v9, %v2833_v9 }
 0x1b6   :  { %v2795_v16 = vpop.f32.mrf.mxu0  ;;  %v2835_v18 = vpop.f32.mrf.mxu1 }
 0x1b7   :  { %v6295_v23 = vadd.f32 %v3008_v19, %v3000_v26  ;;  %v6297_v24 = vadd.f32 %v3009_v13, %v3001_v56 }
 0x1b8   :  { %v5245_v25 = vpop.f32.mrf.mxu0  ;;  %v5251_v30 = vpop.f32.mrf.mxu1 }
 0x1b9   :  { %5475 = vrsqrt.f32 %v6295_v23  ;;  %vm3038_vm7 = vcmp.eq.f32.partialorder %v6295_v23, inf  ;;  %vm3040_vm8 = vcmp.eq.f32.partialorder %v6295_v23, 0.0  ;;  %v3041_v13 = vand.u32 2147483648, %v6295_v23 }
 0x1ba   :  { %5477 = vrsqrt.f32 %v6297_v24  ;;  %v2872_v20 = vpop.f32.mrf.mxu0  ;;  %v2912_v15 = vpop.f32.mrf.mxu1  ;;  %vm3045_vm9 = vcmp.eq.f32.partialorder %v6297_v24, inf  ;;  %v3048_v30 = vand.u32 2147483648, %v6297_v24  ;;  %vm3047_vm10 = vcmp.eq.f32.partialorder %v6297_v24, 0.0 }
 0x1bb   :  { %v2873_v43 = vadd.f32 %v2872_v20, %v2552_v34  ;;  %v2913_v31 = vadd.f32 %v2912_v15, %v2592_v29  ;;  %5479 = vrsqrt.f32 %v6236_v54 }
 0x1bc   :  { %v5256_v36 = vpop.f32.mrf.mxu0  ;;  %v5262_v44 = vpop.f32.mrf.mxu1  ;;  %5481 = vrsqrt.f32 %v6238_v5 }
 0x1bd   :  { %v3010_v22 = vmul.f32 %v2873_v43, %v2873_v43  ;;  %v3011_v40 = vmul.f32 %v2913_v31, %v2913_v31 }
 0x1be   :  { %v5472_v63 = vpop.eup %5471  ;;  %v2875_v48 = vpop.f32.mrf.mxu0 }
 0x1bf   :  { %v2915_v49 = vpop.f32.mrf.mxu1  ;;  %v5474_v50 = vpop.eup %5473  ;;  %v6307_v34 = vadd.f32 %v3010_v22, %v3002_v37  ;;  %v6309_v29 = vadd.f32 %v3011_v40, %v3003_v21  ;;  %v3023_v33 = vmul.f32 %v5472_v63, %v3014_v7 }
 0x1c0   :  { %v5257_v51 = vpop.f32.mrf.mxu0  ;;  %v3030_v42 = vmul.f32 %v5474_v50, %v6288_v8 }
 0x1c1   :  { %v5263_v52 = vpop.f32.mrf.mxu1  ;;  %5483 = vrsqrt.f32 %v6307_v34  ;;  %v3025_v60 = vsel %vm3024_vm2, %v3014_v7, %v3023_v33  ;;  %v3004_v7 = vmul.f32 %v6276_v6, %v6276_v6  ;;  %vm3059_vm11 = vcmp.eq.f32.partialorder %v6309_v29, inf }
 0x1c2   :  { %5485 = vrsqrt.f32 %v6309_v29  ;;  %v2952_v62 = vpop.f32.mrf.mxu0  ;;  %v3028_v46 = vsel %vm3026_vm3, %v3027_v27, %v3025_v60  ;;  %v3032_v1 = vsel %vm3031_vm4, %v6288_v8, %v3030_v42  ;;  %vm3052_vm12 = vcmp.eq.f32.partialorder %v6307_v34, inf }
 0x1c3   :  { %v2992_v39 = vpop.f32.mrf.mxu1  ;;  %v2953_v2 = vadd.f32 %v2952_v62, %v6280_v38  ;;  %v6320_v4 = vmul.f32 0.4472136, %v3028_v46  ;;  %v3035_v45 = vsel %vm3033_vm5, %v3034_v61, %v3032_v1  ;;  %5487 = vrsqrt.f32 %v6244_v14 }
 0x1c4   :  { %v2993_v3 = vadd.f32 %v2992_v39, %v6282_v47  ;;  %v5268_v28 = vpop.f32.mrf.mxu0  ;;  %v6329_v47 = vmul.f32 0.4472136, %v3035_v45  ;;  %5489 = vrsqrt.f32 %v6246_v17  ;;  %v3055_v48 = vand.u32 2147483648, %v6307_v34 }
 0x1c5   :  { %v5274_v12 = vpop.f32.mrf.mxu1  ;;  %v3012_v55 = vmul.f32 %v2953_v2, %v2953_v2  ;;  %v3086_v38 = vsel %vm1547_vm6, %v6320_v4, -inf  ;;  %v3062_v33 = vand.u32 2147483648, %v6309_v29  ;;  %vm3054_vm13 = vcmp.eq.f32.partialorder %v6307_v34, 0.0 }
 0x1c6   :  { %v3013_v8 = vmul.f32 %v2993_v3, %v2993_v3  ;;  %v5476_v41 = vpop.eup %5475  ;;  %3087 = vmax.xlane.f32.xlu0 %v3086_v38  ;;  %v2955_v57 = vpop.f32.mrf.mxu0  ;;  %v3089_v18 = vsel %vm1547_vm6, %v6329_v47, -inf  ;;  %vm3061_vm14 = vcmp.eq.f32.partialorder %v6309_v29, 0.0  ;;  %vm1494_vm2 = vcmp.eq.f32.partialorder %v6238_v5, 0.0 }
 0x1c7   :  { %v2995_v9 = vpop.f32.mrf.mxu1  ;;  %v5478_v6 = vpop.eup %5477  ;;  %v6332_v10 = vadd.f32 %v3012_v55, %v3004_v7  ;;  %v3037_v26 = vmul.f32 %v5476_v41, %v6295_v23  ;;  %v1495_v46 = vand.u32 2147483648, %v6238_v5  ;;  %vm1487_vm3 = vcmp.eq.f32.partialorder %v6236_v54, 0.0 }
 0x1c8   :  { %v6334_v53 = vadd.f32 %v3013_v8, %v3005_v11  ;;  %v5269_v56 = vpop.f32.mrf.mxu0  ;;  %v3044_v16 = vmul.f32 %v5478_v6, %v6297_v24  ;;  %v5480_v43 = vpop.eup %5479  ;;  %v1488_v1 = vand.u32 2147483648, %v6236_v54  ;;  %vm1506_vm4 = vcmp.eq.f32.partialorder %v6246_v17, inf }
 0x1c9   :  { %v5275_v19 = vpop.f32.mrf.mxu1  ;;  %5491 = vrsqrt.f32 %v6332_v10  ;;  %v3039_v25 = vsel %vm3038_vm7, %v6295_v23, %v3037_v26  ;;  %v5482_v44 = vpop.eup %5481  ;;  %v1484_v40 = vmul.f32 %v5480_v43, %v6236_v54  ;;  %vm1508_vm5 = vcmp.eq.f32.partialorder %v6246_v17, 0.0 }
 0x1ca   :  { %5493 = vrsqrt.f32 %v6334_v53  ;;  %3090 = vmax.xlane.f32.xlu0 %v3089_v18  ;;  %v3042_v20 = vsel %vm3040_vm8, %v3041_v13, %v3039_v25  ;;  %v3046_v15 = vsel %vm3045_vm9, %v6297_v24, %v3044_v16  ;;  %v1491_v62 = vmul.f32 %v5482_v44, %v6238_v5 }
 0x1cb   :  { %5495 = vrsqrt.f32 %v6252_v32  ;;  %v6351_v31 = vmul.f32 0.4472136, %v3042_v20  ;;  %v3049_v36 = vsel %vm3047_vm10, %v3048_v30, %v3046_v15  ;;  %vm1499_vm7 = vcmp.eq.f32.partialorder %v6244_v14, inf }
 0x1cc   :  { %5497 = vrsqrt.f32 %v6254_v35  ;;  %v6356_v37 = vmul.f32 0.4472136, %v3049_v36  ;;  %v1493_v11 = vsel %vm1492_vm0, %v6238_v5, %v1491_v62  ;;  %vm3066_vm8 = vcmp.eq.f32.partialorder %v6332_v10, inf }
 0x1cd   :  { %v3092_v23 = vsel %vm1547_vm6, %v6351_v31, -inf  ;;  %5499 = vrsqrt.f32 %v6260_v58  ;;  %v3069_v8 = vand.u32 2147483648, %v6332_v10  ;;  %vm3073_vm9 = vcmp.eq.f32.partialorder %v6334_v53, inf }
 0x1ce   :  { %v5484_v21 = vpop.eup %5483  ;;  %3093 = vmax.xlane.f32.xlu1 %v3092_v23  ;;  %5501 = vrsqrt.f32 %v6262_v59  ;;  %v3095_v50 = vsel %vm1547_vm6, %v6356_v37, -inf  ;;  %v3076_v9 = vand.u32 2147483648, %v6334_v53  ;;  %vm3068_vm10 = vcmp.eq.f32.partialorder %v6332_v10, 0.0 }
 0x1cf   :  { %v5486_v22 = vpop.eup %5485  ;;  %v3051_v24 = vmul.f32 %v5484_v21, %v6307_v34  ;;  %v1496_v56 = vsel %vm1494_vm2, %v1495_v46, %v1493_v11  ;;  %v1502_v5 = vand.u32 2147483648, %v6244_v14  ;;  %v1509_v36 = vand.u32 2147483648, %v6246_v17 }
 0x1d0   :  { %v3058_v63 = vmul.f32 %v5486_v22, %v6309_v29  ;;  %v5488_v49 = vpop.eup %5487  ;;  %v6430_v23 = vmul.f32 0.4472136, %v1496_v56  ;;  %vm1515_vm0 = vcmp.eq.f32.partialorder %v6252_v32, 0.0  ;;  %vm1527_vm2 = vcmp.eq.f32.partialorder %v6260_v58, inf }
 0x1d1   :  { %v3053_v51 = vsel %vm3052_vm12, %v6307_v34, %v3051_v24  ;;  %v5490_v42 = vpop.eup %5489  ;;  %v1486_v34 = vsel %vm1485_vm15, %v6236_v54, %v1484_v40  ;;  %v1498_v28 = vmul.f32 %v5488_v49, %v6244_v14  ;;  %vm1501_vm12 = vcmp.eq.f32.partialorder %v6244_v14, 0.0 }
 0x1d2   :  { %3096 = vmax.xlane.f32.xlu1 %v3095_v50  ;;  %v3060_v52 = vsel %vm3059_vm11, %v6309_v29, %v3058_v63  ;;  %v3056_v27 = vsel %vm3054_vm13, %v3055_v48, %v3053_v51  ;;  %v1489_v54 = vsel %vm1487_vm3, %v1488_v1, %v1486_v34  ;;  %v1505_v38 = vmul.f32 %v5490_v42, %v6246_v17 }
 0x1d3   :  { %v3063_v60 = vsel %vm3061_vm14, %v3062_v33, %v3060_v52  ;;  %v6373_v61 = vmul.f32 0.4472136, %v3056_v27  ;;  %vm3075_vm11 = vcmp.eq.f32.partialorder %v6334_v53, 0.0  ;;  %v1500_v18 = vsel %vm1499_vm7, %v6244_v14, %v1498_v28 }
 0x1d4   :  { %v6377_v39 = vmul.f32 0.4472136, %v3063_v60  ;;  %v6424_v43 = vmul.f32 0.4472136, %v1489_v54  ;;  %v1503_v21 = vsel %vm1501_vm12, %v1502_v5, %v1500_v18  ;;  %vm1513_vm13 = vcmp.eq.f32.partialorder %v6252_v32, inf }
 0x1d5   :  { %v3098_v29 = vsel %vm1547_vm6, %v6373_v61, -inf  ;;  %vm1520_vm14 = vcmp.eq.f32.partialorder %v6254_v35, inf  ;;  %vm1522_vm15 = vcmp.eq.f32.partialorder %v6254_v35, 0.0  ;;  %v1516_v63 = vand.u32 2147483648, %v6252_v32 }
 0x1d6   :  { %v5492_v2 = vpop.eup %5491  ;;  %v3101_v3 = vsel %vm1547_vm6, %v6377_v39, -inf  ;;  %3099 = vmax.xlane.f32.xlu0 %v3098_v29  ;;  %v1548_v49 = vsel %vm1547_vm6, %v6424_v43, -inf  ;;  %v6444_v50 = vmul.f32 0.4472136, %v1503_v21  ;;  %v1551_v33 = vsel %vm1547_vm6, %v6430_v23, -inf }
 0x1d7   :  { %v5494_v45 = vpop.eup %5493  ;;  %3102 = vmax.xlane.f32.xlu1 %v3101_v3  ;;  %v3065_v7 = vmul.f32 %v5492_v2, %v6332_v10  ;;  %vm1534_vm3 = vcmp.eq.f32.partialorder %v6262_v59, inf  ;;  %v1537_v34 = vand.u32 2147483648, %v6262_v59  ;;  %vm3186_vm7 = vcmask 1041408  }
 0x1d8   :  { %v5496_v12 = vpop.eup %5495  ;;  %v3072_v55 = vmul.f32 %v5494_v45, %v6334_v53 }
 0x1d9   :  { %v5498_v41 = vpop.eup %5497  ;;  %v3067_v57 = vsel %vm3066_vm8, %v6332_v10, %v3065_v7  ;;  %v1512_v25 = vmul.f32 %v5496_v12, %v6252_v32  ;;  %vm3187_vm8 = vcmask 1042432  }
 0x1da   :  { %v3074_v6 = vsel %vm3073_vm9, %v6334_v53, %v3072_v55  ;;  %v3070_v26 = vsel %vm3068_vm10, %v3069_v8, %v3067_v57  ;;  %v5500_v19 = vpop.eup %5499  ;;  %v1507_v53 = vsel %vm1506_vm4, %v6246_v17, %v1505_v38  ;;  %v1519_v20 = vmul.f32 %v5498_v41, %v6254_v35 }
 0x1db   :  { %v3077_v13 = vsel %vm3075_vm11, %v3076_v9, %v3074_v6  ;;  %v6409_v16 = vmul.f32 0.4472136, %v3070_v26  ;;  %v5502_v30 = vpop.eup %5501  ;;  %v1510_v22 = vsel %vm1508_vm5, %v1509_v36, %v1507_v53  ;;  %v1514_v24 = vsel %vm1513_vm13, %v6252_v32, %v1512_v25 }
 0x1dc   :  { %v6415_v10 = vmul.f32 0.4472136, %v3077_v13  ;;  %v1526_v40 = vmul.f32 %v5500_v19, %v6260_v58  ;;  %v1521_v14 = vsel %vm1520_vm14, %v6254_v35, %v1519_v20  ;;  %v1533_v48 = vmul.f32 %v5502_v30, %v6262_v59 }
 0x1dd   :  { %v3104_v15 = vsel %vm1547_vm6, %v6409_v16, -inf  ;;  %v1523_v17 = vand.u32 2147483648, %v6254_v35  ;;  %v6450_v51 = vmul.f32 0.4472136, %v1510_v22  ;;  %v1517_v52 = vsel %vm1515_vm0, %v1516_v63, %v1514_v24 }
 0x1de   :  { %v3107_v44 = vsel %vm1547_vm6, %v6415_v10, -inf  ;;  %3105 = vmax.xlane.f32.xlu0 %v3104_v15  ;;  %v1528_v42 = vsel %vm1527_vm2, %v6260_v58, %v1526_v40  ;;  %v1535_v60 = vsel %vm1534_vm3, %v6262_v59, %v1533_v48  ;;  %v1530_v35 = vand.u32 2147483648, %v6260_v58 }
 0x1df   :  { %3108 = vmax.xlane.f32.xlu1 %v3107_v44  ;;  %v1524_v27 = vsel %vm1522_vm15, %v1523_v17, %v1521_v14  ;;  %v1554_v32 = vsel %vm1547_vm6, %v6444_v50, -inf  ;;  %v6459_v62 = vmul.f32 0.4472136, %v1517_v52  ;;  %vm1529_vm4 = vcmp.eq.f32.partialorder %v6260_v58, 0.0 }
 0x1e0   :  { %v1557_v29 = vsel %vm1547_vm6, %v6450_v51, -inf  ;;  %v6465_v46 = vmul.f32 0.4472136, %v1524_v27  ;;  %vm1536_vm5 = vcmp.eq.f32.partialorder %v6262_v59, 0.0  ;;  %v1531_v1 = vsel %vm1529_vm4, %v1530_v35, %v1528_v42 }
 0x1e1   :  { %v1538_v2 = vsel %vm1536_vm5, %v1537_v34, %v1535_v60  ;;  %v1560_v3 = vsel %vm1547_vm6, %v6459_v62, -inf  ;;  %v6470_v45 = vmul.f32 0.4472136, %v1531_v1  ;;  %vm3182_vm9 = vcmask 39936  }
 0x1e2   :  { %1549 = vmax.xlane.f32.xlu0 %v1548_v49  ;;  %v1563_v7 = vsel %vm1547_vm6, %v6465_v46, -inf  ;;  %v6474_v58 = vmul.f32 0.4472136, %v1538_v2 }
 0x1e3   :  { %1552 = vmax.xlane.f32.xlu1 %v1551_v33  ;;  %v1566_v11 = vsel %vm1547_vm6, %v6470_v45, -inf }
 0x1e4   :  { %v1569_v59 = vsel %vm1547_vm6, %v6474_v58, -inf }
 0x1e6   :  { %1555 = vmax.xlane.f32.xlu0 %v1554_v32 }
 0x1e7   :  { %1558 = vmax.xlane.f32.xlu1 %v1557_v29 }
 0x1ea   :  { %1561 = vmax.xlane.f32.xlu0 %v1560_v3 }
 0x1eb   :  { %1564 = vmax.xlane.f32.xlu1 %v1563_v7 }
 0x1ee   :  { %1567 = vmax.xlane.f32.xlu0 %v1566_v11 }
 0x1ef   :  { %1570 = vmax.xlane.f32.xlu1 %v1569_v59 }
 0x24f   :  { %v3088_v54 = vpop.xlane.xlu0 %3087 }
 0x250   :  { %v3110_v28 = vsub.f32 %v6320_v4, %v3088_v54 }
 0x252   :  { %v3118_v12 = vmul.f32 1.442695, %v3110_v28 }
 0x253   :  { %v3091_v55 = vpop.xlane.xlu0 %3090 }
 0x254   :  { %5503 = vpow2.f32 %v3118_v12  ;;  %v3111_v8 = vsub.f32 %v6329_v47, %v3091_v55  ;;  %v5569_v55 = vmov 65535  }
 0x256   :  { %v3120_v38 = vmul.f32 1.442695, %v3111_v8 }
 0x257   :  { %v3094_v41 = vpop.xlane.xlu1 %3093 }
 0x258   :  { %5505 = vpow2.f32 %v3120_v38  ;;  %v3112_v9 = vsub.f32 %v6351_v31, %v3094_v41 }
 0x25a   :  { %v3122_v57 = vmul.f32 1.442695, %v3112_v9 }
 0x25b   :  { %v3097_v6 = vpop.xlane.xlu1 %3096 }
 0x25c   :  { %5507 = vpow2.f32 %v3122_v57  ;;  %v3113_v26 = vsub.f32 %v6356_v37, %v3097_v6 }
 0x25e   :  { %v3124_v56 = vmul.f32 1.442695, %v3113_v26  ;;  %v43_v26 = vld [vmem:[%s6928_s4 + $0x4] sm:$0x7] }
 0x25f   :  { %v3100_v19 = vpop.xlane.xlu0 %3099 }
 0x260   :  { %5509 = vpow2.f32 %v3124_v56  ;;  %v3103_v13 = vpop.xlane.xlu1 %3102  ;;  %v3114_v4 = vsub.f32 %v6373_v61, %v3100_v19 }
 0x261   :  { %v6485_v18 = vpop.eup %5503  ;;  %v3115_v47 = vsub.f32 %v6377_v39, %v3103_v13 }
 0x262   :  { %v3126_v25 = vmul.f32 1.442695, %v3114_v4  ;;  %v3134_v30 = vsel %vm1547_vm6, %v6485_v18, 0.0 }
 0x263   :  { %v3128_v31 = vmul.f32 1.442695, %v3115_v47  ;;  %3135 = vadd.xlane.f32.xlu0 %v3134_v30 }
 0x264   :  { %5511 = vpow2.f32 %v3126_v25 }
 0x265   :  { %v6490_v53 = vpop.eup %5505  ;;  %5513 = vpow2.f32 %v3128_v31 }
 0x266   :  { %v3137_v37 = vsel %vm1547_vm6, %v6490_v53, 0.0 }
 0x267   :  { %3138 = vadd.xlane.f32.xlu1 %v3137_v37  ;;  %v3106_v5 = vpop.xlane.xlu0 %3105 }
 0x268   :  { %v3109_v61 = vpop.xlane.xlu1 %3108  ;;  %v3116_v20 = vsub.f32 %v6409_v16, %v3106_v5 }
 0x269   :  { %v6495_v15 = vpop.eup %5507  ;;  %v3117_v39 = vsub.f32 %v6415_v10, %v3109_v61 }
 0x26a   :  { %v3130_v36 = vmul.f32 1.442695, %v3116_v20  ;;  %v3140_v44 = vsel %vm1547_vm6, %v6495_v15, 0.0 }
 0x26b   :  { %v3132_v21 = vmul.f32 1.442695, %v3117_v39  ;;  %3141 = vadd.xlane.f32.xlu0 %v3140_v44  ;;  %v1550_v22 = vpop.xlane.xlu0 %1549 }
 0x26c   :  { %5515 = vpow2.f32 %v3130_v36  ;;  %v1553_v24 = vpop.xlane.xlu1 %1552  ;;  %v1572_v40 = vsub.f32 %v6424_v43, %v1550_v22 }
 0x26d   :  { %v6501_v14 = vpop.eup %5509  ;;  %5517 = vpow2.f32 %v3132_v21  ;;  %v1573_v16 = vsub.f32 %v6430_v23, %v1553_v24  ;;  %v44_v24 = vld [vmem:[%s6928_s4 + $0x8] sm:$0x7] }
 0x26e   :  { %v1580_v63 = vmul.f32 1.442695, %v1572_v40  ;;  %v3143_v10 = vsel %vm1547_vm6, %v6501_v14, 0.0 }
 0x26f   :  { %v1582_v48 = vmul.f32 1.442695, %v1573_v16  ;;  %3144 = vadd.xlane.f32.xlu1 %v3143_v10  ;;  %v1556_v49 = vpop.xlane.xlu0 %1555 }
 0x270   :  { %5519 = vpow2.f32 %v1580_v63  ;;  %v1559_v17 = vpop.xlane.xlu1 %1558  ;;  %v1574_v33 = vsub.f32 %v6444_v50, %v1556_v49 }
 0x271   :  { %v6507_v52 = vpop.eup %5511  ;;  %5521 = vpow2.f32 %v1582_v48  ;;  %v1575_v43 = vsub.f32 %v6450_v51, %v1559_v17  ;;  %v45_v17 = vld [vmem:[%s6928_s4 + $0xc] sm:$0x7] }
 0x272   :  { %v6510_v27 = vpop.eup %5513  ;;  %v1584_v42 = vmul.f32 1.442695, %v1574_v33  ;;  %v3146_v23 = vsel %vm1547_vm6, %v6507_v52, 0.0 }
 0x273   :  { %v1586_v60 = vmul.f32 1.442695, %v1575_v43  ;;  %v3149_v35 = vsel %vm1547_vm6, %v6510_v27, 0.0  ;;  %3147 = vadd.xlane.f32.xlu0 %v3146_v23  ;;  %v1562_v32 = vpop.xlane.xlu0 %1561  ;;  %v46_v23 = vld [vmem:[%s6928_s4 + $0x10] sm:$0x7] }
 0x274   :  { %5523 = vpow2.f32 %v1584_v42  ;;  %3150 = vadd.xlane.f32.xlu1 %v3149_v35  ;;  %v1565_v50 = vpop.xlane.xlu1 %1564  ;;  %v1576_v34 = vsub.f32 %v6459_v62, %v1562_v32 }
 0x275   :  { %5525 = vpow2.f32 %v1586_v60  ;;  %v1577_v51 = vsub.f32 %v6465_v46, %v1565_v50 }
 0x276   :  { %v1588_v29 = vmul.f32 1.442695, %v1576_v34 }
 0x277   :  { %v1590_v1 = vmul.f32 1.442695, %v1577_v51  ;;  %v1568_v2 = vpop.xlane.xlu0 %1567 }
 0x278   :  { %5527 = vpow2.f32 %v1588_v29  ;;  %v1571_v3 = vpop.xlane.xlu1 %1570  ;;  %v1578_v7 = vsub.f32 %v6470_v45, %v1568_v2  ;;  %v3188_v45 = vsel %vm3186_vm7, 4294967295, %v5569_v55 }
 0x279   :  { %v6519_v11 = vpop.eup %5515  ;;  %5529 = vpow2.f32 %v1590_v1  ;;  %v1579_v59 = vsub.f32 %v6474_v58, %v1571_v3  ;;  %v42_v58 = vld [vmem:[%s6928_s4] sm:$0x7]  ;;  %v6531_v8 = vsel %vm3187_vm8, %v3188_v45, 0 }
 0x27a   :  { %v6522_v54 = vpop.eup %5517  ;;  %v1592_v28 = vmul.f32 1.442695, %v1578_v7  ;;  %v3152_v62 = vsel %vm1547_vm6, %v6519_v11, 0.0  ;;  %v6536_v41 = vand.u32 %v6531_v8, %v42_v58  ;;  %v6552_v19 = vand.u32 %v6531_v8, %v43_v26 }
 0x27b   :  { %v1594_v46 = vmul.f32 1.442695, %v1579_v59  ;;  %v3155_v12 = vsel %vm1547_vm6, %v6522_v54, 0.0  ;;  %3153 = vadd.xlane.f32.xlu0 %v3152_v62  ;;  %v6583_v10 = vand.u32 %v6531_v8, %v44_v24  ;;  %v6612_v32 = vand.u32 %v6531_v8, %v46_v23 }
 0x27c   :  { %5531 = vpow2.f32 %v1592_v28  ;;  %3156 = vadd.xlane.f32.xlu1 %v3155_v12  ;;  %5277 = vmatpush3.bf16.msra.mxu0 %v6536_v41 }
 0x27d   :  { %v6533_v38 = vpop.eup %5519  ;;  %5533 = vpow2.f32 %v1594_v46  ;;  %5288 = vmatprep.subr.bf16.mxu0 %v5567_v0  ;;  %5283 = vmatpush3.bf16.msra.mxu1 %v6552_v19 }
 0x27e   :  { %v6538_v9 = vpop.eup %5521  ;;  %v1596_v57 = vsel %vm1547_vm6, %v6533_v38, 0.0  ;;  %5294 = vmatprep.subr.bf16.mxu1 %v5567_v0 }
 0x27f   :  { %v1599_v6 = vsel %vm1547_vm6, %v6538_v9, 0.0  ;;  %1597 = vadd.xlane.f32.xlu0 %v1596_v57 }
 0x280   :  { %1600 = vadd.xlane.f32.xlu1 %v1599_v6 }
 0x281   :  { %v6549_v56 = vpop.eup %5523 }
 0x282   :  { %v6554_v13 = vpop.eup %5525  ;;  %v1602_v4 = vsel %vm1547_vm6, %v6549_v56, 0.0 }
 0x283   :  { %v1605_v47 = vsel %vm1547_vm6, %v6554_v13, 0.0  ;;  %1603 = vadd.xlane.f32.xlu0 %v1602_v4 }
 0x284   :  { %1606 = vadd.xlane.f32.xlu1 %v1605_v47 }
 0x285   :  { %v6562_v25 = vpop.eup %5527 }
 0x286   :  { %v6564_v30 = vpop.eup %5529  ;;  %v1608_v31 = vsel %vm1547_vm6, %v6562_v25, 0.0 }
 0x287   :  { %v1611_v37 = vsel %vm1547_vm6, %v6564_v30, 0.0  ;;  %1609 = vadd.xlane.f32.xlu0 %v1608_v31 }
 0x288   :  { %1612 = vadd.xlane.f32.xlu1 %v1611_v37 }
 0x289   :  { %v6570_v5 = vpop.eup %5531 }
 0x28a   :  { %v6572_v61 = vpop.eup %5533  ;;  %v1614_v20 = vsel %vm1547_vm6, %v6570_v5, 0.0 }
 0x28b   :  { %v1617_v39 = vsel %vm1547_vm6, %v6572_v61, 0.0  ;;  %1615 = vadd.xlane.f32.xlu0 %v1614_v20 }
 0x28c   :  { %1618 = vadd.xlane.f32.xlu1 %v1617_v39 }
 0x2ec   :  { %v3136_v36 = vpop.xlane.xlu0 %3135 }
 0x2ed   :  { %5535 = vrcp.f32 %v3136_v36 }
 0x2f0   :  { %v3139_v44 = vpop.xlane.xlu1 %3138 }
 0x2f1   :  { %5537 = vrcp.f32 %v3139_v44 }
 0x2f4   :  { %v3142_v21 = vpop.xlane.xlu0 %3141 }
 0x2f5   :  { %5539 = vrcp.f32 %v3142_v21 }
 0x2f8   :  { %v3145_v22 = vpop.xlane.xlu1 %3144 }
 0x2f9   :  { %5541 = vrcp.f32 %v3145_v22 }
 0x2fa   :  { %v5536_v40 = vpop.eup %5535 }
 0x2fb   :  { %v3166_v16 = vmul.f32 %v5536_v40, %v6485_v18  ;;  %v6594_v18 = vand.u32 %v6531_v8, %v45_v17 }
 0x2fc   :  { %v3148_v63 = vpop.xlane.xlu0 %3147 }
 0x2fd   :  { %v6585_v48 = vpack.c.bf16 %v3166_v16, %v3166_v16  ;;  %v3151_v49 = vpop.xlane.xlu1 %3150  ;;  %5543 = vrcp.f32 %v3148_v63 }
 0x2fe   :  { %v5538_v33 = vpop.eup %5537  ;;  %5545 = vrcp.f32 %v3151_v49 }
 0x2ff   :  { %v3167_v43 = vmul.f32 %v5538_v33, %v6490_v53  ;;  %5279 = vmatmul.mubr.msk.bf16.vlgmr.msra.gmra.mxu0 %vm3182_vm9, %v6585_v48 }
 0x300   :  { %5289 = vmatpush3.bf16.msra.mxu0 %v6583_v10  ;;  %5290 = vmatprep.mubr.msk.bf16.mxu0 %vm5568_vm1, %v5567_v0 }
 0x301   :  { %v6599_v42 = vpack.c.bf16 %v3167_v43, %v3167_v43  ;;  %5300 = vmatprep.subr.bf16.mxu0 %v5567_v0 }
 0x302   :  { %v5540_v53 = vpop.eup %5539 }
 0x303   :  { %v3168_v60 = vmul.f32 %v5540_v53, %v6495_v15  ;;  %5285 = vmatmul.mubr.msk.bf16.vlgmr.msra.gmra.mxu1 %vm3182_vm9, %v6599_v42  ;;  %v47_v15 = vld [vmem:[%s6928_s4 + $0x14] sm:$0x7] }
 0x304   :  { %5295 = vmatpush3.bf16.msra.mxu1 %v6594_v18  ;;  %v3154_v35 = vpop.xlane.xlu0 %3153  ;;  %5296 = vmatprep.mubr.msk.bf16.mxu1 %vm5568_vm1, %v5567_v0  ;;  %v6624_v2 = vand.u32 %v6531_v8, %v47_v15  ;;  %v53_v15 = vld [vmem:[%s6929_s5 + $0xc] sm:$0x7] }
 0x305   :  { %v6614_v50 = vpack.c.bf16 %v3168_v60, %v3168_v60  ;;  %v3157_v34 = vpop.xlane.xlu1 %3156  ;;  %5547 = vrcp.f32 %v3154_v35  ;;  %5306 = vmatprep.subr.bf16.mxu1 %v5567_v0  ;;  %v51_v60 = vld [vmem:[%s6929_s5 + $0x4] sm:$0x7] }
 0x306   :  { %v5542_v51 = vpop.eup %5541  ;;  %5549 = vrcp.f32 %v3157_v34  ;;  %v3943_v35 = vand.u32 %v6531_v8, %v51_v60 }
 0x307   :  { %v3169_v29 = vmul.f32 %v5542_v51, %v6501_v14  ;;  %5291 = vmatmul.mubr.msk.bf16.vlgmr.msra.gmra.mxu0 %vm3182_vm9, %v6614_v50  ;;  %v48_v14 = vld [vmem:[%s6928_s4 + $0x18] sm:$0x7]  ;;  %v4029_v51 = vand.u32 %v6531_v8, %v53_v15 }
 0x308   :  { %v1598_v1 = vpop.xlane.xlu0 %1597  ;;  %5301 = vmatpush3.bf16.msra.mxu0 %v6612_v32  ;;  %5302 = vmatprep.mubr.msk.bf16.mxu0 %vm5568_vm1, %v5567_v0  ;;  %v6642_v46 = vand.u32 %v6531_v8, %v48_v14  ;;  %v57_v14 = vld [vmem:[%s6929_s5 + $0x1c] sm:$0x7] }
 0x309   :  { %v6629_v3 = vpack.c.bf16 %v3169_v29, %v3169_v29  ;;  %5551 = vrcp.f32 %v1598_v1  ;;  %5312 = vmatprep.subr.bf16.mxu0 %v5567_v0  ;;  %v1601_v59 = vpop.xlane.xlu1 %1600  ;;  %v54_v29 = vld [vmem:[%s6929_s5 + $0x10] sm:$0x7]  ;;  %v55_v1 = vld [vmem:[%s6929_s5 + $0x14] sm:$0x7] }
 0x30a   :  { %v5544_v7 = vpop.eup %5543  ;;  %5553 = vrcp.f32 %v1601_v59 }
 0x30b   :  { %v5546_v28 = vpop.eup %5545  ;;  %v3170_v62 = vmul.f32 %v5544_v7, %v6507_v52  ;;  %5297 = vmatmul.mubr.msk.bf16.vlgmr.msra.gmra.mxu1 %vm3182_vm9, %v6629_v3  ;;  %v49_v52 = vld [vmem:[%s6928_s4 + $0x1c] sm:$0x7]  ;;  %v4201_v7 = vand.u32 %v6531_v8, %v57_v14 }
 0x30c   :  { %5307 = vmatpush3.bf16.msra.mxu1 %v6624_v2  ;;  %5308 = vmatprep.mubr.msk.bf16.mxu1 %vm5568_vm1, %v5567_v0  ;;  %v3171_v12 = vmul.f32 %v5546_v28, %v6510_v27  ;;  %v1604_v45 = vpop.xlane.xlu0 %1603  ;;  %v6654_v58 = vand.u32 %v6531_v8, %v49_v52 }
 0x30d   :  { %v6645_v55 = vpack.c.bf16 %v3170_v62, %v3170_v62  ;;  %5318 = vmatprep.subr.bf16.mxu1 %v5567_v0  ;;  %5555 = vrcp.f32 %v1604_v45  ;;  %v1607_v6 = vpop.xlane.xlu1 %1606 }
 0x30e   :  { %v6659_v27 = vpack.c.bf16 %v3171_v12, %v3171_v12  ;;  %5557 = vrcp.f32 %v1607_v6 }
 0x30f   :  { %5303 = vmatmul.mubr.msk.bf16.vlgmr.msra.gmra.mxu0 %vm3182_vm9, %v6645_v55 }
 0x310   :  { %5313 = vmatpush3.bf16.msra.mxu0 %v6642_v46  ;;  %5314 = vmatprep.mubr.msk.bf16.mxu0 %vm5568_vm1, %v5567_v0  ;;  %v1610_v20 = vpop.xlane.xlu0 %1609 }
 0x311   :  { %5324 = vmatprep.subr.bf16.mxu0 %v5567_v0  ;;  %5559 = vrcp.f32 %v1610_v20  ;;  %v1613_v36 = vpop.xlane.xlu1 %1612 }
 0x312   :  { %v5548_v57 = vpop.eup %5547  ;;  %5561 = vrcp.f32 %v1613_v36 }
 0x313   :  { %v5550_v26 = vpop.eup %5549  ;;  %v3172_v4 = vmul.f32 %v5548_v57, %v6519_v11  ;;  %5309 = vmatmul.mubr.msk.bf16.vlgmr.msra.gmra.mxu1 %vm3182_vm9, %v6659_v27 }
 0x314   :  { %5319 = vmatpush3.bf16.msra.mxu1 %v6654_v58  ;;  %5320 = vmatprep.mubr.msk.bf16.mxu1 %vm5568_vm1, %v5567_v0  ;;  %v3173_v47 = vmul.f32 %v5550_v26, %v6522_v54  ;;  %v1616_v21 = vpop.xlane.xlu0 %1615 }
 0x315   :  { %v6669_v31 = vpack.c.bf16 %v3172_v4, %v3172_v4  ;;  %5330 = vmatprep.subr.bf16.mxu1 %v5567_v0  ;;  %5563 = vrcp.f32 %v1616_v21  ;;  %v1619_v24 = vpop.xlane.xlu1 %1618 }
 0x316   :  { %v5552_v37 = vpop.eup %5551  ;;  %v6677_v11 = vpack.c.bf16 %v3173_v47, %v3173_v47  ;;  %5565 = vrcp.f32 %v1619_v24 }
 0x317   :  { %5315 = vmatmul.mubr.msk.bf16.vlgmr.msra.gmra.mxu0 %vm3182_vm9, %v6669_v31  ;;  %v1628_v39 = vmul.f32 %v5552_v37, %v6533_v38  ;;  %v5554_v54 = vpop.eup %5553 }
 0x318   :  { %5325 = vmatpush3.bf16.msra.mxu0 %v6536_v41  ;;  %5326 = vmatprep.mubr.msk.bf16.mxu0 %vm5568_vm1, %v5567_v0  ;;  %v1629_v41 = vmul.f32 %v5554_v54, %v6538_v9 }
 0x319   :  { %5336 = vmatprep.subr.bf16.mxu0 %v5567_v0  ;;  %v6687_v44 = vpack.c.bf16 %v1628_v39, %v1628_v39 }
 0x31a   :  { %v5556_v38 = vpop.eup %5555 }
 0x31b   :  { %5321 = vmatmul.mubr.msk.bf16.vlgmr.msra.gmra.mxu1 %vm3182_vm9, %v6677_v11  ;;  %v1630_v22 = vmul.f32 %v5556_v38, %v6549_v56  ;;  %v5558_v9 = vpop.eup %5557 }
 0x31c   :  { %5331 = vmatpush3.bf16.msra.mxu1 %v6552_v19  ;;  %5332 = vmatprep.mubr.msk.bf16.mxu1 %vm5568_vm1, %v5567_v0  ;;  %v6695_v19 = vpack.c.bf16 %v1629_v41, %v1629_v41  ;;  %v1631_v40 = vmul.f32 %v5558_v9, %v6554_v13 }
 0x31d   :  { %5342 = vmatprep.subr.bf16.mxu1 %v5567_v0  ;;  %v6705_v16 = vpack.c.bf16 %v1630_v22, %v1630_v22 }
 0x31e   :  { %v5560_v56 = vpop.eup %5559  ;;  %v6713_v63 = vpack.c.bf16 %v1631_v40, %v1631_v40 }
 0x31f   :  { %5327 = vmatmul.mubr.msk.bf16.vlgmr.msra.gmra.mxu0 %vm3182_vm9, %v6687_v44  ;;  %v5562_v13 = vpop.eup %5561 }
 0x320   :  { %5337 = vmatpush3.bf16.msra.mxu0 %v6583_v10  ;;  %5338 = vmatprep.mubr.msk.bf16.mxu0 %vm5568_vm1, %v5567_v0  ;;  %v1632_v10 = vmul.f32 %v5560_v56, %v6562_v25  ;;  %v1633_v49 = vmul.f32 %v5562_v13, %v6564_v30  ;;  %v50_v30 = vld [vmem:[%s6929_s5] sm:$0x7] }
 0x321   :  { %5348 = vmatprep.subr.bf16.mxu0 %v5567_v0  ;;  %v3900_v23 = vand.u32 %v6531_v8, %v50_v30 }
 0x322   :  { %v6723_v17 = vpack.c.bf16 %v1632_v10, %v1632_v10  ;;  %v5564_v33 = vpop.eup %5563  ;;  %v6731_v25 = vpack.c.bf16 %v1633_v49, %v1633_v49 }
 0x323   :  { %5333 = vmatmul.mubr.msk.bf16.vlgmr.msra.gmra.mxu1 %vm3182_vm9, %v6695_v19  ;;  %v1634_v43 = vmul.f32 %v5564_v33, %v6570_v5 }
 0x324   :  { %5343 = vmatpush3.bf16.msra.mxu1 %v6594_v18  ;;  %5344 = vmatprep.mubr.msk.bf16.mxu1 %vm5568_vm1, %v5567_v0  ;;  %v5566_v18 = vpop.eup %5565 }
 0x325   :  { %5354 = vmatprep.subr.bf16.mxu1 %v5567_v0  ;;  %v1635_v53 = vmul.f32 %v5566_v18, %v6572_v61  ;;  %v6745_v5 = vpack.c.bf16 %v1634_v43, %v1634_v43  ;;  %v52_v61 = vld [vmem:[%s6929_s5 + $0x8] sm:$0x7] }
 0x326   :  { %v3986_v34 = vand.u32 %v6531_v8, %v52_v61 }
 0x327   :  { %5339 = vmatmul.mubr.msk.bf16.vlgmr.msra.gmra.mxu0 %vm3182_vm9, %v6705_v16 }
 0x328   :  { %5349 = vmatpush3.bf16.msra.mxu0 %v6612_v32  ;;  %5350 = vmatprep.mubr.msk.bf16.mxu0 %vm5568_vm1, %v5567_v0  ;;  %v6756_v32 = vpack.c.bf16 %v1635_v53, %v1635_v53 }
 0x329   :  { %5360 = vmatprep.subr.bf16.mxu0 %v5567_v0 }
 0x32b   :  { %5345 = vmatmul.mubr.msk.bf16.vlgmr.msra.gmra.mxu1 %vm3182_vm9, %v6713_v63 }
 0x32c   :  { %5355 = vmatpush3.bf16.msra.mxu1 %v6624_v2  ;;  %5356 = vmatprep.mubr.msk.bf16.mxu1 %vm5568_vm1, %v5567_v0  ;;  %v4115_v2 = vand.u32 %v6531_v8, %v55_v1 }
 0x32d   :  { %5366 = vmatprep.subr.bf16.mxu1 %v5567_v0 }
 0x32f   :  { %5351 = vmatmul.mubr.msk.bf16.vlgmr.msra.gmra.mxu0 %vm3182_vm9, %v6723_v17 }
 0x330   :  { %5361 = vmatpush3.bf16.msra.mxu0 %v6642_v46  ;;  %5362 = vmatprep.mubr.msk.bf16.mxu0 %vm5568_vm1, %v5567_v0 }
 0x331   :  { %5372 = vmatprep.subr.bf16.mxu0 %v5567_v0 }
 0x333   :  { %5357 = vmatmul.mubr.msk.bf16.vlgmr.msra.gmra.mxu1 %vm3182_vm9, %v6731_v25 }
 0x334   :  { %5367 = vmatpush3.bf16.msra.mxu1 %v6654_v58  ;;  %5368 = vmatprep.mubr.msk.bf16.mxu1 %vm5568_vm1, %v5567_v0 }
 0x335   :  { %5378 = vmatprep.subr.bf16.mxu1 %v5567_v0 }
 0x337   :  { %5363 = vmatmul.mubr.msk.bf16.vlgmr.msra.gmra.mxu0 %vm3182_vm9, %v6745_v5 }
 0x338   :  { %5373 = vmatpush3.bf16.msra.mxu0 %v3900_v23  ;;  %5374 = vmatprep.mubr.msk.bf16.mxu0 %vm5568_vm1, %v5567_v0 }
 0x339   :  { %5384 = vmatprep.subr.bf16.mxu0 %v5567_v0 }
 0x33b   :  { %5369 = vmatmul.mubr.msk.bf16.vlgmr.msra.gmra.mxu1 %vm3182_vm9, %v6756_v32 }
 0x33c   :  { %5379 = vmatpush3.bf16.msra.mxu1 %v3943_v35  ;;  %5380 = vmatprep.mubr.msk.bf16.mxu1 %vm5568_vm1, %v5567_v0 }
 0x33d   :  { %5390 = vmatprep.subr.bf16.mxu1 %v5567_v0 }
 0x33f   :  { %5375 = vmatmul.mubr.msk.bf16.vlgmr.msra.gmra.mxu0 %vm3182_vm9, %v6585_v48  ;;  %v4072_v48 = vand.u32 %v6531_v8, %v54_v29 }
 0x340   :  { %5385 = vmatpush3.bf16.msra.mxu0 %v3986_v34  ;;  %5386 = vmatprep.mubr.msk.bf16.mxu0 %vm5568_vm1, %v5567_v0 }
 0x341   :  { %5396 = vmatprep.subr.bf16.mxu0 %v5567_v0 }
 0x343   :  { %5381 = vmatmul.mubr.msk.bf16.vlgmr.msra.gmra.mxu1 %vm3182_vm9, %v6599_v42  ;;  %v56_v42 = vld [vmem:[%s6929_s5 + $0x18] sm:$0x7] }
 0x344   :  { %5391 = vmatpush3.bf16.msra.mxu1 %v4029_v51  ;;  %5392 = vmatprep.mubr.msk.bf16.mxu1 %vm5568_vm1, %v5567_v0 }
 0x345   :  { %5402 = vmatprep.subr.bf16.mxu1 %v5567_v0 }
 0x347   :  { %5387 = vmatmul.mubr.msk.bf16.vlgmr.msra.gmra.mxu0 %vm3182_vm9, %v6614_v50  ;;  %v4158_v50 = vand.u32 %v6531_v8, %v56_v42 }
 0x348   :  { %5397 = vmatpush3.bf16.msra.mxu0 %v4072_v48  ;;  %5398 = vmatprep.mubr.msk.bf16.mxu0 %vm5568_vm1, %v5567_v0 }
 0x349   :  { %5408 = vmatprep.subr.bf16.mxu0 %v5567_v0 }
 0x34b   :  { %5393 = vmatmul.mubr.msk.bf16.vlgmr.msra.gmra.mxu1 %vm3182_vm9, %v6629_v3 }
 0x34c   :  { %5403 = vmatpush3.bf16.msra.mxu1 %v4115_v2  ;;  %5404 = vmatprep.mubr.msk.bf16.mxu1 %vm5568_vm1, %v5567_v0 }
 0x34d   :  { %5414 = vmatprep.subr.bf16.mxu1 %v5567_v0 }
 0x34f   :  { %5399 = vmatmul.mubr.msk.bf16.vlgmr.msra.gmra.mxu0 %vm3182_vm9, %v6645_v55 }
 0x350   :  { %5409 = vmatpush3.bf16.msra.mxu0 %v4158_v50  ;;  %5410 = vmatprep.mubr.msk.bf16.mxu0 %vm5568_vm1, %v5567_v0 }
 0x351   :  { %5420 = vmatprep.subr.bf16.mxu0 %v5567_v0 }
 0x353   :  { %5405 = vmatmul.mubr.msk.bf16.vlgmr.msra.gmra.mxu1 %vm3182_vm9, %v6659_v27 }
 0x354   :  { %5415 = vmatpush3.bf16.msra.mxu1 %v4201_v7  ;;  %5416 = vmatprep.mubr.msk.bf16.mxu1 %vm5568_vm1, %v5567_v0 }
 0x355   :  { %5426 = vmatprep.subr.bf16.mxu1 %v5567_v0 }
 0x357   :  { %5411 = vmatmul.mubr.msk.bf16.vlgmr.msra.gmra.mxu0 %vm3182_vm9, %v6669_v31 }
 0x358   :  { %5421 = vmatpush3.bf16.msra.mxu0 %v3900_v23  ;;  %5422 = vmatprep.mubr.msk.bf16.mxu0 %vm5568_vm1, %v5567_v0 }
 0x359   :  { %5432 = vmatprep.subr.bf16.mxu0 %v5567_v0 }
 0x35b   :  { %5417 = vmatmul.mubr.msk.bf16.vlgmr.msra.gmra.mxu1 %vm3182_vm9, %v6677_v11 }
 0x35c   :  { %5427 = vmatpush3.bf16.msra.mxu1 %v3943_v35  ;;  %5428 = vmatprep.mubr.msk.bf16.mxu1 %vm5568_vm1, %v5567_v0 }
 0x35d   :  { %5438 = vmatprep.subr.bf16.mxu1 %v5567_v0 }
 0x35f   :  { %5423 = vmatmul.mubr.msk.bf16.vlgmr.msra.gmra.mxu0 %vm3182_vm9, %v6687_v44 }
 0x360   :  { %5433 = vmatpush3.bf16.msra.mxu0 %v3986_v34  ;;  %5434 = vmatprep.mubr.msk.bf16.mxu0 %vm5568_vm1, %v5567_v0 }
 0x361   :  { %5444 = vmatprep.subr.bf16.mxu0 %v5567_v0 }
 0x363   :  { %5429 = vmatmul.mubr.msk.bf16.vlgmr.msra.gmra.mxu1 %vm3182_vm9, %v6695_v19 }
 0x364   :  { %5439 = vmatpush3.bf16.msra.mxu1 %v4029_v51  ;;  %5440 = vmatprep.mubr.msk.bf16.mxu1 %vm5568_vm1, %v5567_v0 }
 0x365   :  { %5450 = vmatprep.subr.bf16.mxu1 %v5567_v0 }
 0x367   :  { %5435 = vmatmul.mubr.msk.bf16.vlgmr.msra.gmra.mxu0 %vm3182_vm9, %v6705_v16 }
 0x368   :  { %5445 = vmatpush3.bf16.msra.mxu0 %v4072_v48  ;;  %5446 = vmatprep.mubr.msk.bf16.mxu0 %vm5568_vm1, %v5567_v0 }
 0x369   :  { %5456 = vmatprep.subr.bf16.mxu0 %v5567_v0 }
 0x36b   :  { %5441 = vmatmul.mubr.msk.bf16.vlgmr.msra.gmra.mxu1 %vm3182_vm9, %v6713_v63 }
 0x36c   :  { %5451 = vmatpush3.bf16.msra.mxu1 %v4115_v2  ;;  %5452 = vmatprep.mubr.msk.bf16.mxu1 %vm5568_vm1, %v5567_v0 }
 0x36d   :  { %5462 = vmatprep.subr.bf16.mxu1 %v5567_v0 }
 0x36f   :  { %5447 = vmatmul.mubr.msk.bf16.vlgmr.msra.gmra.mxu0 %vm3182_vm9, %v6723_v17 }
 0x370   :  { %5457 = vmatpush3.bf16.msra.mxu0 %v4158_v50  ;;  %5458 = vmatprep.mubr.msk.bf16.mxu0 %vm5568_vm1, %v5567_v0 }
 0x373   :  { %5453 = vmatmul.mubr.msk.bf16.vlgmr.msra.gmra.mxu1 %vm3182_vm9, %v6731_v25 }
 0x374   :  { %5463 = vmatpush3.bf16.msra.mxu1 %v4201_v7  ;;  %5464 = vmatprep.mubr.msk.bf16.mxu1 %vm5568_vm1, %v5567_v0  ;;  %vm4563_vm1 = vcmask 28672  }
 0x377   :  { %5459 = vmatmul.mubr.msk.bf16.vlgmr.msra.gmra.mxu0 %vm3182_vm9, %v6745_v5 }
 0x37b   :  { %5465 = vmatmul.mubr.msk.bf16.vlgmr.msra.gmra.mxu1 %vm3182_vm9, %v6756_v32 }
 0x3bf   :  { %v3227_v8 = vpop.f32.mrf.mxu0 }
 0x3c1   :  { %v5280_v3 = vpop.f32.mrf.mxu0 }
 0x3c3   :  { %v3230_v59 = vpop.f32.mrf.mxu0  ;;  %v3273_v28 = vpop.f32.mrf.mxu1 }
 0x3c5   :  { %v5281_v62 = vpop.f32.mrf.mxu0  ;;  %v5286_v46 = vpop.f32.mrf.mxu1 }
 0x3c7   :  { %v3276_v12 = vpop.f32.mrf.mxu1  ;;  %v3319_v55 = vpop.f32.mrf.mxu0 }
 0x3c9   :  { %v5287_v52 = vpop.f32.mrf.mxu1  ;;  %v5292_v45 = vpop.f32.mrf.mxu0 }
 0x3cb   :  { %v3322_v58 = vpop.f32.mrf.mxu0  ;;  %v3365_v27 = vpop.f32.mrf.mxu1 }
 0x3cd   :  { %v5293_v57 = vpop.f32.mrf.mxu0  ;;  %v5298_v0 = vpop.f32.mrf.mxu1 }
 0x3cf   :  { %v3368_v6 = vpop.f32.mrf.mxu1  ;;  %v3411_v26 = vpop.f32.mrf.mxu0 }
 0x3d1   :  { %v5299_v4 = vpop.f32.mrf.mxu1  ;;  %v5304_v47 = vpop.f32.mrf.mxu0 }
 0x3d3   :  { %v3414_v31 = vpop.f32.mrf.mxu0  ;;  %v3457_v37 = vpop.f32.mrf.mxu1 }
 0x3d5   :  { %v5305_v20 = vpop.f32.mrf.mxu0  ;;  %v5310_v11 = vpop.f32.mrf.mxu1 }
 0x3d7   :  { %v3460_v39 = vpop.f32.mrf.mxu1  ;;  %v3503_v54 = vpop.f32.mrf.mxu0 }
 0x3d9   :  { %v5311_v36 = vpop.f32.mrf.mxu1  ;;  %v5316_v41 = vpop.f32.mrf.mxu0 }
 0x3db   :  { %v3506_v44 = vpop.f32.mrf.mxu0  ;;  %v3549_v38 = vpop.f32.mrf.mxu1 }
 0x3dd   :  { %v5317_v21 = vpop.f32.mrf.mxu0  ;;  %v5322_v19 = vpop.f32.mrf.mxu1 }
 0x3df   :  { %v3552_v22 = vpop.f32.mrf.mxu1  ;;  %v3592_v9 = vpop.f32.mrf.mxu0 }
 0x3e0   :  { %v3593_v24 = vadd.f32 %v3592_v9, %v3227_v8 }
 0x3e1   :  { %v5323_v40 = vpop.f32.mrf.mxu1  ;;  %v5328_v16 = vpop.f32.mrf.mxu0 }
 0x3e2   :  { %4564 = vst.msk [vmem:[%s6930_s6] sm:$0x1f] %vm4563_vm1, %v3593_v24 }
 0x3e3   :  { %v3595_v56 = vpop.f32.mrf.mxu0  ;;  %v3635_v63 = vpop.f32.mrf.mxu1 }
 0x3e4   :  { %v3636_v10 = vadd.f32 %v3635_v63, %v3273_v28 }
 0x3e5   :  { %v5329_v13 = vpop.f32.mrf.mxu0  ;;  %v5334_v49 = vpop.f32.mrf.mxu1 }
 0x3e6   :  { %4565 = vst.msk [vmem:[%s6930_s6 + $0x8] sm:$0x1f] %vm4563_vm1, %v3636_v10 }
 0x3e7   :  { %v3638_v17 = vpop.f32.mrf.mxu1  ;;  %v3678_v33 = vpop.f32.mrf.mxu0 }
 0x3e8   :  { %v3679_v25 = vadd.f32 %v3678_v33, %v3319_v55 }
 0x3e9   :  { %v5335_v43 = vpop.f32.mrf.mxu1  ;;  %v5340_v30 = vpop.f32.mrf.mxu0 }
 0x3ea   :  { %4566 = vst.msk [vmem:[%s6930_s6 + $0x10] sm:$0x1f] %vm4563_vm1, %v3679_v25 }
 0x3eb   :  { %v3681_v18 = vpop.f32.mrf.mxu0  ;;  %v3721_v23 = vpop.f32.mrf.mxu1 }
 0x3ec   :  { %v3722_v53 = vadd.f32 %v3721_v23, %v3365_v27 }
 0x3ed   :  { %v5341_v5 = vpop.f32.mrf.mxu0  ;;  %v5346_v60 = vpop.f32.mrf.mxu1 }
 0x3ee   :  { %4567 = vst.msk [vmem:[%s6930_s6 + $0x18] sm:$0x1f] %vm4563_vm1, %v3722_v53 }
 0x3ef   :  { %v3724_v35 = vpop.f32.mrf.mxu1  ;;  %v3764_v32 = vpop.f32.mrf.mxu0 }
 0x3f0   :  { %v3765_v61 = vadd.f32 %v3764_v32, %v3411_v26 }
 0x3f1   :  { %v5347_v34 = vpop.f32.mrf.mxu1  ;;  %v5352_v15 = vpop.f32.mrf.mxu0 }
 0x3f2   :  { %4568 = vst.msk [vmem:[%s6930_s6 + $0x20] sm:$0x1f] %vm4563_vm1, %v3765_v61 }
 0x3f3   :  { %v3767_v51 = vpop.f32.mrf.mxu0  ;;  %v3807_v29 = vpop.f32.mrf.mxu1 }
 0x3f4   :  { %v3808_v48 = vadd.f32 %v3807_v29, %v3457_v37 }
 0x3f5   :  { %v5353_v1 = vpop.f32.mrf.mxu0  ;;  %v5358_v2 = vpop.f32.mrf.mxu1 }
 0x3f6   :  { %4569 = vst.msk [vmem:[%s6930_s6 + $0x28] sm:$0x1f] %vm4563_vm1, %v3808_v48 }
 0x3f7   :  { %v3810_v42 = vpop.f32.mrf.mxu1  ;;  %v3850_v50 = vpop.f32.mrf.mxu0 }
 0x3f8   :  { %v3851_v14 = vadd.f32 %v3850_v50, %v3503_v54 }
 0x3f9   :  { %v5359_v7 = vpop.f32.mrf.mxu1  ;;  %v5364_v8 = vpop.f32.mrf.mxu0 }
 0x3fa   :  { %4570 = vst.msk [vmem:[%s6930_s6 + $0x30] sm:$0x1f] %vm4563_vm1, %v3851_v14 }
 0x3fb   :  { %v3853_v3 = vpop.f32.mrf.mxu0  ;;  %v3893_v59 = vpop.f32.mrf.mxu1 }
 0x3fc   :  { %v3894_v28 = vadd.f32 %v3893_v59, %v3549_v38 }
 0x3fd   :  { %v5365_v62 = vpop.f32.mrf.mxu0  ;;  %v5370_v46 = vpop.f32.mrf.mxu1 }
 0x3fe   :  { %4571 = vst.msk [vmem:[%s6930_s6 + $0x38] sm:$0x1f] %vm4563_vm1, %v3894_v28 }
 0x3ff   :  { %v3896_v12 = vpop.f32.mrf.mxu1  ;;  %v3936_v55 = vpop.f32.mrf.mxu0 }
 0x401   :  { %v5371_v52 = vpop.f32.mrf.mxu1  ;;  %v5376_v45 = vpop.f32.mrf.mxu0 }
 0x403   :  { %v3939_v58 = vpop.f32.mrf.mxu0  ;;  %v3979_v27 = vpop.f32.mrf.mxu1 }
 0x405   :  { %v5377_v57 = vpop.f32.mrf.mxu0  ;;  %v5382_v0 = vpop.f32.mrf.mxu1 }
 0x407   :  { %v3982_v6 = vpop.f32.mrf.mxu1  ;;  %v4022_v26 = vpop.f32.mrf.mxu0 }
 0x409   :  { %v5383_v4 = vpop.f32.mrf.mxu1  ;;  %v5388_v47 = vpop.f32.mrf.mxu0 }
 0x40b   :  { %v4025_v31 = vpop.f32.mrf.mxu0  ;;  %v4065_v37 = vpop.f32.mrf.mxu1 }
 0x40d   :  { %v5389_v20 = vpop.f32.mrf.mxu0  ;;  %v5394_v11 = vpop.f32.mrf.mxu1 }
 0x40f   :  { %v4068_v39 = vpop.f32.mrf.mxu1  ;;  %v4108_v54 = vpop.f32.mrf.mxu0 }
 0x411   :  { %v5395_v36 = vpop.f32.mrf.mxu1  ;;  %v5400_v41 = vpop.f32.mrf.mxu0 }
 0x413   :  { %v4111_v44 = vpop.f32.mrf.mxu0  ;;  %v4151_v38 = vpop.f32.mrf.mxu1 }
 0x415   :  { %v5401_v21 = vpop.f32.mrf.mxu0  ;;  %v5406_v19 = vpop.f32.mrf.mxu1 }
 0x417   :  { %v4154_v22 = vpop.f32.mrf.mxu1  ;;  %v4194_v9 = vpop.f32.mrf.mxu0 }
 0x419   :  { %v5407_v24 = vpop.f32.mrf.mxu1  ;;  %v5412_v40 = vpop.f32.mrf.mxu0 }
 0x41b   :  { %v4197_v16 = vpop.f32.mrf.mxu0  ;;  %v4237_v56 = vpop.f32.mrf.mxu1 }
 0x41d   :  { %v5413_v63 = vpop.f32.mrf.mxu0  ;;  %v5418_v10 = vpop.f32.mrf.mxu1 }
 0x41f   :  { %v4240_v13 = vpop.f32.mrf.mxu1  ;;  %v4277_v49 = vpop.f32.mrf.mxu0 }
 0x420   :  { %v4278_v17 = vadd.f32 %v4277_v49, %v3936_v55 }
 0x421   :  { %v5419_v33 = vpop.f32.mrf.mxu1  ;;  %v5424_v25 = vpop.f32.mrf.mxu0 }
 0x422   :  { %4572 = vst.msk [vmem:[%s6931_s7] sm:$0x1f] %vm4563_vm1, %v4278_v17 }
 0x423   :  { %v4280_v43 = vpop.f32.mrf.mxu0  ;;  %v4317_v30 = vpop.f32.mrf.mxu1 }
 0x424   :  { %v4318_v18 = vadd.f32 %v4317_v30, %v3979_v27 }
 0x425   :  { %v5425_v23 = vpop.f32.mrf.mxu0  ;;  %v5430_v53 = vpop.f32.mrf.mxu1 }
 0x426   :  { %4573 = vst.msk [vmem:[%s6931_s7 + $0x8] sm:$0x1f] %vm4563_vm1, %v4318_v18 }
 0x427   :  { %v4320_v5 = vpop.f32.mrf.mxu1  ;;  %v4357_v60 = vpop.f32.mrf.mxu0 }
 0x428   :  { %v4358_v35 = vadd.f32 %v4357_v60, %v4022_v26 }
 0x429   :  { %v5431_v32 = vpop.f32.mrf.mxu1  ;;  %v5436_v61 = vpop.f32.mrf.mxu0 }
 0x42a   :  { %4574 = vst.msk [vmem:[%s6931_s7 + $0x10] sm:$0x1f] %vm4563_vm1, %v4358_v35 }
 0x42b   :  { %v4360_v34 = vpop.f32.mrf.mxu0  ;;  %v4397_v15 = vpop.f32.mrf.mxu1 }
 0x42c   :  { %v4398_v51 = vadd.f32 %v4397_v15, %v4065_v37 }
 0x42d   :  { %v5437_v29 = vpop.f32.mrf.mxu0  ;;  %v5442_v48 = vpop.f32.mrf.mxu1 }
 0x42e   :  { %4575 = vst.msk [vmem:[%s6931_s7 + $0x18] sm:$0x1f] %vm4563_vm1, %v4398_v51 }
 0x42f   :  { %v4400_v1 = vpop.f32.mrf.mxu1  ;;  %v4437_v2 = vpop.f32.mrf.mxu0 }
 0x430   :  { %v4438_v42 = vadd.f32 %v4437_v2, %v4108_v54 }
 0x431   :  { %v5443_v50 = vpop.f32.mrf.mxu1  ;;  %v5448_v14 = vpop.f32.mrf.mxu0 }
 0x432   :  { %4576 = vst.msk [vmem:[%s6931_s7 + $0x20] sm:$0x1f] %vm4563_vm1, %v4438_v42 }
 0x433   :  { %v4440_v7 = vpop.f32.mrf.mxu0  ;;  %v4477_v8 = vpop.f32.mrf.mxu1 }
 0x434   :  { %v4478_v3 = vadd.f32 %v4477_v8, %v4151_v38 }
 0x435   :  { %v5449_v59 = vpop.f32.mrf.mxu0  ;;  %v5454_v28 = vpop.f32.mrf.mxu1 }
 0x436   :  { %4577 = vst.msk [vmem:[%s6931_s7 + $0x28] sm:$0x1f] %vm4563_vm1, %v4478_v3 }
 0x437   :  { %v4480_v62 = vpop.f32.mrf.mxu1  ;;  %v4517_v46 = vpop.f32.mrf.mxu0 }
 0x438   :  { %v4518_v12 = vadd.f32 %v4517_v46, %v4194_v9 }
 0x439   :  { %v5455_v55 = vpop.f32.mrf.mxu1  ;;  %v5460_v52 = vpop.f32.mrf.mxu0 }
 0x43a   :  { %4578 = vst.msk [vmem:[%s6931_s7 + $0x30] sm:$0x1f] %vm4563_vm1, %v4518_v12 }
 0x43b   :  { %v4520_v45 = vpop.f32.mrf.mxu0  ;;  %v4557_v58 = vpop.f32.mrf.mxu1 }
 0x43c   :  { %v4558_v27 = vadd.f32 %v4557_v58, %v4237_v56 }
 0x43d   :  { %v5461_v57 = vpop.f32.mrf.mxu0  ;;  %v5466_v0 = vpop.f32.mrf.mxu1 }
 0x43e   :  { %4579 = vst.msk [vmem:[%s6931_s7 + $0x38] sm:$0x1f] %vm4563_vm1, %v4558_v27 }
 0x43f   :  { %v4560_v6 = vpop.f32.mrf.mxu1 }
 0x441   :  { %v5467_v26 = vpop.f32.mrf.mxu1 }

// kernel: residual_block_forward.25
= control target key start
LH: loop header
LB: loop body
LE: loop exit
PB: predicated region body
PF: predicated region fallthrough
CT: control target
= control target key end

     0   :  { %vm80_vm0 = vcmask 1041408   ;;  %v613_v0 = vmov 0.0   ;;  %vm614_vm1 = vmmov 0   ;;  %vm76_vm2 = vcmask 31744   ;;  %s832_s0 = inlined_call_operand.vmem [shape: bf16[4,64], index: 0, kind: input, shape index: {}]   ;;  %s833_s5 = inlined_call_operand.vmem [shape: bf16[4,4], index: 5, kind: input, shape index: {}]   ;;  %s834_s1 = inlined_call_operand.vmem [shape: bf16[4,64], index: 1, kind: input, shape index: {}]   ;;  %s835_s6 = inlined_call_operand.vmem [shape: f32[4,1], index: 6, kind: input, shape index: {}]   ;;  %s836_s10 = inlined_call_operand.vmem [shape: f32[4,1], index: 10, kind: input, shape index: {}]   ;;  %s837_s15 = inlined_call_operand.vmem [shape: f32[4,1], index: 15, kind: input, shape index: {}]   ;;  %s838_s9 = inlined_call_operand.vmem [shape: bf16[4,4], index: 9, kind: input, shape index: {}]   ;;  %s839_s19 = inlined_call_operand.vmem [shape: f32[8,1], index: 19, kind: input, shape index: {}]   ;;  %s840_s12 = inlined_call_operand.vmem [shape: f32[4,1], index: 12, kind: input, shape index: {}]   ;;  %s841_s8 = inlined_call_operand.vmem [shape: f32[4,1], index: 8, kind: input, shape index: {}]   ;;  %s842_s17 = inlined_call_operand.vmem [shape: f32[8,1], index: 17, kind: input, shape index: {}]   ;;  %s843_s7 = inlined_call_operand.vmem [shape: bf16[4,4], index: 7, kind: input, shape index: {}]   ;;  %s844_s11 = inlined_call_operand.vmem [shape: bf16[4,4], index: 11, kind: input, shape index: {}]   ;;  %s845_s13 = inlined_call_operand.vmem [shape: bf16[4,4], index: 13, kind: input, shape index: {}]   ;;  %s846_s2 = inlined_call_operand.vmem [shape: f32[4,64], index: 2, kind: input, shape index: {}]   ;;  %s847_s14 = inlined_call_operand.vmem [shape: bf16[4,4], index: 14, kind: input, shape index: {}]   ;;  %s848_s3 = inlined_call_operand.vmem [shape: f32[4,64], index: 3, kind: input, shape index: {}]   ;;  %s849_s16 = inlined_call_operand.vmem [shape: bf16[8,4], index: 16, kind: input, shape index: {}]   ;;  %s850_s18 = inlined_call_operand.vmem [shape: bf16[8,4], index: 18, kind: input, shape index: {}]   ;;  %s851_s4 = inlined_call_operand.vmem [shape: f32[4,64], index: 4, kind: input, shape index: {}]   ;;  %s852_s21 = inlined_call_operand.vmem [shape: f32[4,64], index: 21, kind: output, shape index: {1}]   ;;  %s853_s20 = inlined_call_operand.vmem [shape: f32[4,64], index: 20, kind: output, shape index: {0}]  }
   0x1   :  { %854 = sst [smem:[#allocation2_spill]] %s832_s0  ;;  %554 = vmatprep.subr.bf16.mxu0 %v613_v0  ;;  %556 = vmatprep.mubr.msk.bf16.mxu0 %vm614_vm1, %v613_v0  ;;  %v615_v5 = vmov 0   ;;  %v179_v10 = vld [vmem:[%s838_s9] sm:$0x3]  ;;  %vm519_vm3 = vcmask 523268   ;;  %vm517_vm4 = vcmask 519168  }
   0x2   :  { %855 = sst [smem:[#allocation3_spill]] %s833_s5  ;;  %560 = vmatprep.subr.bf16.mxu1 %v613_v0  ;;  %562 = vmatprep.mubr.msk.bf16.mxu1 %vm614_vm1, %v613_v0  ;;  %v462_v11 = vld [vmem:[%s839_s19] sm:$0xff] }
   0x3   :  { %856 = sst [smem:[#allocation4_spill]] %s834_s1  ;;  %605 = vset.pattern.permute.xlu0 %v615_v5  ;;  %606 = vset.pattern.permute.xlu1 %v615_v5  ;;  %v236_v12 = vld [vmem:[%s840_s12] sm:$0xf] }
   0x4   :  { %857 = sst [smem:[#allocation5_spill]] %s835_s6  ;;  %239 = vperm.xlu1 %606, %v236_v12   ;;  %v127_v13 = vld [vmem:[%s841_s8] sm:$0xf] }
   0x5   :  { %858 = sst [smem:[#allocation6_spill]] %s836_s10  ;;  %v397_v14 = vld [vmem:[%s842_s17] sm:$0xff] }
   0x6   :  { %859 = sst [smem:[#allocation7_spill]] %s837_s15  ;;  %v125_v26 = vld [vmem:[%s843_s7] sm:$0x3] }
   0x7   :  { %s860_s26 = sld [smem:[#allocation2_spill]]  ;;  %v234_v34 = vld [vmem:[%s844_s11] sm:$0x3] }
   0x8   :  { %s861_s28 = sld [smem:[#allocation4_spill]]  ;;  %130 = vperm.xlu1 %606, %v127_v13   ;;  %v290_v44 = vld [vmem:[%s845_s13] sm:$0x3] }
   0x9   :  { %s862_s10 = sld [smem:[#allocation3_spill]]  ;;  %v288_v46 = vld [vmem:[%s846_s2] sm:$0xf] }
   0xa   :  { %s863_s22 = sld [smem:[#allocation5_spill]]  ;;  %v292_v54 = vld [vmem:[%s847_s14] sm:$0x3] }
   0xb   :  { %s864_s24 = sld [smem:[#allocation6_spill]]  ;;  %v393_v62 = vld [vmem:[%s848_s3] sm:$0xf] }
   0xc   :  { %400 = vperm.xlu1 %606, %v397_v14  }
   0xd   :  { %v69_v1 = vld [vmem:[%s860_s26] sm:$0x3]  ;;  %s865_s26 = sld [smem:[#allocation7_spill]] }
   0xe   :  { %v180_v2 = vld [vmem:[%s861_s28] sm:$0x3]  ;;  %v82_v3 = vsel %vm80_vm0, %v69_v1, 0 }
   0xf   :  { %555 = vmatpush3.bf16.msra.mxu0 %v82_v3  ;;  %v68_v4 = vld [vmem:[%s862_s10] sm:$0x3]  ;;  %v191_v7 = vsel %vm80_vm0, %v180_v2, 0 }
  0x10   :  { %v70_v6 = vld [vmem:[%s863_s22] sm:$0xf]  ;;  %566 = vmatprep.subr.bf16.mxu0 %v613_v0 }
  0x11   :  { %73 = vperm.xlu0 %605, %v70_v6   ;;  %v181_v8 = vld [vmem:[%s864_s24] sm:$0xf] }
  0x12   :  { %557 = vmatmul.mubr.msk.bf16.vlgmr.msra.gmra.mxu0 %vm76_vm2, %v68_v4 }
  0x13   :  { %567 = vmatpush3.bf16.msra.mxu0 %v191_v7  ;;  %568 = vmatprep.mubr.msk.bf16.mxu0 %vm614_vm1, %v613_v0  ;;  %v386_v9 = vld [vmem:[%s865_s26] sm:$0xf] }
  0x14   :  { %578 = vmatprep.subr.bf16.mxu0 %v613_v0 }
  0x15   :  { %184 = vperm.xlu0 %605, %v181_v8  }
  0x19   :  { %389 = vperm.xlu0 %605, %v386_v9  }
  0x1a   :  { %569 = vmatmul.mubr.msk.bf16.vlgmr.msra.gmra.mxu0 %vm76_vm2, %v179_v10 }
  0x1b   :  { %580 = vmatprep.mubr.msk.bf16.mxu0 %vm614_vm1, %v613_v0 }
  0x1d   :  { %465 = vperm.xlu0 %605, %v462_v11  }
  0x7f   :  { %v240_v35 = vpop.permute.xlu1 %239 }
  0x83   :  { %v131_v36 = vpop.permute.xlu1 %130 }
  0x87   :  { %v401_v7 = vpop.permute.xlu1 %400 }
  0x8c   :  { %v74_v15 = vpop.permute.xlu0 %73 }
  0x90   :  { %v185_v24 = vpop.permute.xlu0 %184 }
  0x94   :  { %v390_v61 = vpop.permute.xlu0 %389 }
  0xd2   :  { %v118_v16 = vpop.f32.mrf.mxu0 }
  0xd3   :  { %v119_v17 = vadd.f32 %v118_v16, %v74_v15 }
  0xd4   :  { %v558_v18 = vpop.f32.mrf.mxu0 }
  0xd5   :  { %v124_v19 = vmax.f32 %v119_v17, 0.0 }
  0xd6   :  { %v121_v20 = vpop.f32.mrf.mxu0 }
  0xd7   :  { %v126_v21 = vpack.c.bf16 %v124_v19, %v124_v19 }
  0xd8   :  { %v559_v22 = vpop.f32.mrf.mxu0 }
  0xd9   :  { %v137_v23 = vsel %vm80_vm0, %v126_v21, 0  ;;  %v460_v22 = vld [vmem:[%s850_s18] sm:$0xf] }
  0xda   :  { %561 = vmatpush3.bf16.msra.mxu1 %v137_v23  ;;  %v227_v25 = vpop.f32.mrf.mxu0  ;;  %v466_v23 = vpop.permute.xlu0 %465 }
  0xdb   :  { %v228_v27 = vadd.f32 %v227_v25, %v185_v24  ;;  %572 = vmatprep.subr.bf16.mxu1 %v613_v0  ;;  %v514_v25 = vld [vmem:[%s851_s4] sm:$0xf] }
  0xdc   :  { %v570_v28 = vpop.f32.mrf.mxu0 }
  0xdd   :  { %v233_v29 = vmax.f32 %v228_v27, 0.0  ;;  %563 = vmatmul.mubr.msk.bf16.vlgmr.msra.gmra.mxu1 %vm76_vm2, %v125_v26 }
  0xde   :  { %v230_v30 = vpop.f32.mrf.mxu0  ;;  %574 = vmatprep.mubr.msk.bf16.mxu1 %vm614_vm1, %v613_v0 }
  0xdf   :  { %v235_v31 = vpack.c.bf16 %v233_v29, %v233_v29 }
  0xe0   :  { %v571_v32 = vpop.f32.mrf.mxu0 }
  0xe1   :  { %v246_v33 = vsel %vm80_vm0, %v235_v31, 0 }
  0xe2   :  { %573 = vmatpush3.bf16.msra.mxu1 %v246_v33 }
  0xe3   :  { %584 = vmatprep.subr.bf16.mxu1 %v613_v0 }
  0xe5   :  { %575 = vmatmul.mubr.msk.bf16.vlgmr.msra.gmra.mxu1 %vm76_vm2, %v234_v34 }
  0xe6   :  { %586 = vmatprep.mubr.msk.bf16.mxu1 %vm614_vm1, %v613_v0 }
 0x19d   :  { %v173_v37 = vpop.f32.mrf.mxu1 }
 0x19e   :  { %v174_v38 = vadd.f32 %v173_v37, %v131_v36 }
 0x19f   :  { %v564_v39 = vpop.f32.mrf.mxu1 }
 0x1a0   :  { %v291_v40 = vpack.c.bf16 %v174_v38, %v174_v38 }
 0x1a1   :  { %v176_v41 = vpop.f32.mrf.mxu1 }
 0x1a2   :  { %v344_v42 = vsel %vm80_vm0, %v291_v40, 0 }
 0x1a3   :  { %v565_v43 = vpop.f32.mrf.mxu1  ;;  %585 = vmatpush3.bf16.msra.mxu1 %v344_v42 }
 0x1a4   :  { %596 = vmatprep.subr.bf16.mxu1 %v613_v0 }
 0x1a5   :  { %v282_v45 = vpop.f32.mrf.mxu1 }
 0x1a6   :  { %v283_v47 = vadd.f32 %v282_v45, %v240_v35  ;;  %587 = vmatmul.mubr.msk.bf16.vlgmr.msra.gmra.mxu1 %vm76_vm2, %v290_v44 }
 0x1a7   :  { %v576_v48 = vpop.f32.mrf.mxu1  ;;  %598 = vmatprep.mubr.msk.bf16.mxu1 %vm614_vm1, %v613_v0 }
 0x1a8   :  { %v289_v49 = vadd.f32 %v288_v46, %v283_v47 }
 0x1a9   :  { %v285_v50 = vpop.f32.mrf.mxu1 }
 0x1aa   :  { %v293_v51 = vpack.c.bf16 %v289_v49, %v289_v49 }
 0x1ab   :  { %v577_v52 = vpop.f32.mrf.mxu1 }
 0x1ac   :  { %v298_v53 = vsel %vm80_vm0, %v293_v51, 0 }
 0x1ad   :  { %579 = vmatpush3.bf16.msra.mxu0 %v298_v53 }
 0x1ae   :  { %590 = vmatprep.subr.bf16.mxu0 %v613_v0 }
 0x1b0   :  { %581 = vmatmul.mubr.msk.bf16.vlgmr.msra.gmra.mxu0 %vm76_vm2, %v292_v54 }
 0x1b1   :  { %592 = vmatprep.mubr.msk.bf16.mxu0 %vm614_vm1, %v613_v0  ;;  %v395_v0 = vld [vmem:[%s849_s16] sm:$0xf] }
 0x266   :  { %v380_v55 = vpop.f32.mrf.mxu1 }
 0x268   :  { %v588_v56 = vpop.f32.mrf.mxu1 }
 0x26a   :  { %v383_v57 = vpop.f32.mrf.mxu1 }
 0x26c   :  { %v589_v58 = vpop.f32.mrf.mxu1 }
 0x270   :  { %v334_v59 = vpop.f32.mrf.mxu0 }
 0x271   :  { %v381_v60 = vadd.f32 %v380_v55, %v334_v59 }
 0x272   :  { %v582_v63 = vpop.f32.mrf.mxu0 }
 0x273   :  { %v392_v1 = vadd.f32 %v390_v61, %v381_v60 }
 0x274   :  { %v337_v2 = vpop.f32.mrf.mxu0 }
 0x275   :  { %v394_v3 = vadd.f32 %v393_v62, %v392_v1 }
 0x276   :  { %v583_v4 = vpop.f32.mrf.mxu0 }
 0x277   :  { %v396_v5 = vpack.c.bf16 %v394_v3, %v394_v3 }
 0x279   :  { %v407_v6 = vsel %vm80_vm0, %v396_v5, 0 }
 0x27a   :  { %591 = vmatpush3.bf16.msra.mxu0 %v407_v6 }
 0x27d   :  { %593 = vmatmul.mubr.msk.bf16.vlgmr.msra.gmra.mxu0 %vm76_vm2, %v395_v0 }
 0x33d   :  { %v443_v8 = vpop.f32.mrf.mxu0 }
 0x33e   :  { %v444_v9 = vadd.f32 %v443_v8, %v401_v7 }
 0x33f   :  { %v594_v10 = vpop.f32.mrf.mxu0 }
 0x340   :  { %v536_v11 = vmul.f32 -1.442695, %v444_v9 }
 0x341   :  { %v446_v12 = vpop.f32.mrf.mxu0 }
 0x342   :  { %607 = vpow2.f32 %v536_v11 }
 0x343   :  { %v595_v13 = vpop.f32.mrf.mxu0  ;;  %609 = vtanh.f32 %v444_v9 }
 0x34f   :  { %v608_v14 = vpop.eup %607 }
 0x350   :  { %v452_v15 = vadd.f32 1.0, %v608_v14  ;;  %v610_v16 = vpop.eup %609 }
 0x351   :  { %v457_v17 = vrot.slane %v610_v16, 4 }
 0x352   :  { %611 = vrcp.f32 %v452_v15 }
 0x35f   :  { %v612_v18 = vpop.eup %611 }
 0x360   :  { %v459_v19 = vmul.f32 %v612_v18, %v457_v17 }
 0x362   :  { %v461_v20 = vpack.c.bf16 %v459_v19, %v459_v19 }
 0x364   :  { %v472_v21 = vsel %vm80_vm0, %v461_v20, 0 }
 0x365   :  { %597 = vmatpush3.bf16.msra.mxu1 %v472_v21 }
 0x368   :  { %599 = vmatmul.mubr.msk.bf16.vlgmr.msra.gmra.mxu1 %vm76_vm2, %v460_v22 }
 0x428   :  { %v508_v24 = vpop.f32.mrf.mxu1 }
 0x429   :  { %v509_v26 = vadd.f32 %v508_v24, %v466_v23 }
 0x42a   :  { %v600_v27 = vpop.f32.mrf.mxu1 }
 0x42b   :  { %v515_v28 = vadd.f32 %v514_v25, %v509_v26  ;;  %520 = vst.msk [vmem:[%s852_s21 - $0x4] sm:$0xf0] %vm519_vm3, %v509_v26 }
 0x42c   :  { %v511_v29 = vpop.f32.mrf.mxu1 }
 0x42d   :  { %v516_v30 = vmul.f32 0.70710677, %v515_v28 }
 0x42e   :  { %v601_v31 = vpop.f32.mrf.mxu1 }
 0x42f   :  { %518 = vst.msk [vmem:[%s853_s20] sm:$0xf] %vm517_vm4, %v516_v30 }

</bundles_post_ra>
